<compile_context>
chip_gen: v6e
topology: v6e:2x2x1
jax: 0.10.0
libtpu: 0.0.40
codegen_flags: <defaults>
</compile_context>

<pallas_src>
import functools

import jax
import jax.numpy as jnp
from jax.experimental import pallas as pl
from jax.experimental.pallas import tpu as pltpu


D_PAD = 128    # padded word_dim
H_PAD = 512    # padded LSTM hidden size


# --------------------- generic tiled dense kernel (x @ W + b) ----------------
def dense_kernel(x_ref, w_ref, b_ref, o_ref):
    o_ref[...] = (jnp.dot(x_ref[...], w_ref[...],
                          preferred_element_type=jnp.float32)
                  + b_ref[...])


def dense_pallas(x, w, b, *, tm=256, tn=512):
    """x: (N, K) bf16, w: (K, M) bf16, b: (1, M) f32 -> (N, M) f32."""
    N, K = x.shape
    M = w.shape[1]
    tm = min(tm, N)
    tn = min(tn, M)
    grid = (pl.cdiv(N, tm), pl.cdiv(M, tn))
    flops = 2 * N * K * M
    bytes_accessed = (x.size * x.dtype.itemsize + w.size * w.dtype.itemsize
                      + b.size * b.dtype.itemsize + N * M * 4)
    return pl.pallas_call(
        dense_kernel,
        out_shape=jax.ShapeDtypeStruct((N, M), jnp.float32),
        grid_spec=pltpu.PrefetchScalarGridSpec(
            num_scalar_prefetch=0,
            grid=grid,
            in_specs=[
                pl.BlockSpec((tm, K), lambda i, j: (i, 0)),   # activations
                pl.BlockSpec((K, tn), lambda i, j: (0, j)),   # weight tile
                pl.BlockSpec((1, tn), lambda i, j: (0, j)),   # bias tile
            ],
            out_specs=pl.BlockSpec((tm, tn), lambda i, j: (i, j)),
        ),
        compiler_params=pltpu.CompilerParams(
            dimension_semantics=("parallel", "parallel")),
        cost_estimate=pl.CostEstimate(flops=flops, transcendentals=0,
                                      bytes_accessed=bytes_accessed),
    )(x, w, b)


# ----------------------------- LSTM + fc1 kernel -----------------------------
def lstm_kernel(gx_ref, whh_ref, w1_ref, b1_ref, z_ref, h_scr, c_scr):
    """One grid step == one time step.  gx already holds x@W_ih + bias."""
    t = pl.program_id(0)

    @pl.when(t == 0)
    def _():
        h_scr[...] = jnp.zeros_like(h_scr)
        c_scr[...] = jnp.zeros_like(c_scr)

    Hp = h_scr.shape[1]
    h_prev = h_scr[...]                  # (B, Hp) f32
    c_prev = c_scr[...]                  # (B, Hp) f32

    # Single recurrent matmul per step (input projection was hoisted out).
    gates = gx_ref[0] + jnp.dot(h_prev.astype(jnp.bfloat16), whh_ref[...],
                                preferred_element_type=jnp.float32)  # (B, 4Hp)

    # PyTorch gate order i, f, g, o; slices are lane-aligned (Hp = 512).
    i_g = jax.nn.sigmoid(gates[:, 0 * Hp:1 * Hp])
    f_g = jax.nn.sigmoid(gates[:, 1 * Hp:2 * Hp])
    g_g = jnp.tanh(gates[:, 2 * Hp:3 * Hp])
    o_g = jax.nn.sigmoid(gates[:, 3 * Hp:4 * Hp])

    c_new = f_g * c_prev + i_g * g_g
    h_new = o_g * jnp.tanh(c_new)

    c_scr[...] = c_new
    h_scr[...] = h_new

    # Fused fc1 epilogue: write z_t = h_t @ W_fc1 + b_fc1 (hidden never hits HBM).
    z_ref[0] = (jnp.dot(h_new.astype(jnp.bfloat16), w1_ref[...],
                        preferred_element_type=jnp.float32) + b1_ref[...])


def lstm_fc1_pallas(gates_x, w_hh, w_fc1, b_fc1):
    """gates_x: (T, B, 4Hp) f32 -> z: (T, B, Dp) f32."""
    T, B, G = gates_x.shape
    Hp = w_hh.shape[0]
    Dp = w_fc1.shape[1]
    flops = 2 * T * B * Hp * (4 * Hp + Dp)
    bytes_accessed = (gates_x.size * 4 + w_hh.size * w_hh.dtype.itemsize
                      + w_fc1.size * w_fc1.dtype.itemsize
                      + b_fc1.size * 4 + T * B * Dp * 4)
    return pl.pallas_call(
        lstm_kernel,
        out_shape=jax.ShapeDtypeStruct((T, B, Dp), jnp.float32),
        grid_spec=pltpu.PrefetchScalarGridSpec(
            num_scalar_prefetch=0,
            grid=(T,),
            in_specs=[
                pl.BlockSpec((1, B, G), lambda t: (t, 0, 0)),           # gates_x_t
                # Constant operands: whole-array resident in VMEM, no per-step
                # DMA and no double-buffer duplication.
                pl.BlockSpec(memory_space=pltpu.MemorySpace.VMEM),       # W_hh (bf16)
                pl.BlockSpec(memory_space=pltpu.MemorySpace.VMEM),       # W_fc1 (bf16)
                pl.BlockSpec(memory_space=pltpu.MemorySpace.VMEM),       # b_fc1 (f32)
            ],
            out_specs=pl.BlockSpec((1, B, Dp), lambda t: (t, 0, 0)),
            scratch_shapes=[
                pltpu.VMEM((B, Hp), jnp.float32),                        # h carry
                pltpu.VMEM((B, Hp), jnp.float32),                        # c carry
            ],
        ),
        compiler_params=pltpu.CompilerParams(
            dimension_semantics=("arbitrary",)),     # sequential recurrence
        cost_estimate=pl.CostEstimate(flops=flops,
                                      transcendentals=4 * T * B * Hp,
                                      bytes_accessed=bytes_accessed),
    )(gates_x, w_hh, w_fc1, b_fc1)


# ------------------------------ LM forward -----------------------------------
@functools.partial(jax.jit, static_argnames=("vocab_size",))
def lm_forward(tokens, params, *, vocab_size):
    """tokens: int32 (B, T) -> scores float32 (B, T, vocab_size)."""
    B, T = tokens.shape
    # Pad batch to a sublane multiple so every kernel tile is (8,128)-aligned.
    Bp = ((B + 7) // 8) * 8
    tokens_p = jnp.pad(tokens, ((0, Bp - B), (0, 0))) if Bp != B else tokens

    # Embedding gather (plain-JAX glue), directly time-major: (T, Bp, Dp) bf16.
    x = jnp.take(params["embed"], tokens_p.T, axis=0)
    Dp = x.shape[-1]

    # Hoisted input projection: one big batched matmul (T*Bp, Dp) x (Dp, 4Hp).
    gates_x = dense_pallas(x.reshape(T * Bp, Dp),
                           params["w_ih"], params["b_lstm"])     # (T*Bp, 4Hp) f32
    gates_x = gates_x.reshape(T, Bp, gates_x.shape[1])

    # Recurrence + fused fc1 -> z (T, Bp, Dp).
    z = lstm_fc1_pallas(gates_x, params["w_hh"],
                        params["w_fc1"], params["b_fc1"])

    # Only relayout in the whole pipeline: small (T, Bp, 128) tensor.
    z_flat = jnp.transpose(z, (1, 0, 2)).reshape(Bp * T, Dp).astype(jnp.bfloat16)

    # Vocab projection, tiled over rows x vocab tiles (lane-dense padded V).
    scores = dense_pallas(z_flat, params["w_fc"], params["b_fc"])  # (Bp*T, Vp)
    Vp = scores.shape[1]
    return scores.reshape(Bp, T, Vp)[:B, :, :vocab_size]


# --------------------------- pure-JAX reference -------------------------------
def lm_reference(tokens, params, *, vocab_size):
    """Reference using the same padded/bf16 params (lax.scan LSTM)."""
    B, T = tokens.shape
    Hp = params["w_hh"].shape[0]
    x = jnp.take(params["embed"], tokens, axis=0)                       # (B,T,Dp)
    gx = jnp.dot(x, params["w_ih"],
                 preferred_element_type=jnp.float32) + params["b_lstm"]  # (B,T,4Hp)

    def step(carry, g_t):
        h, c = carry
        gates = g_t + jnp.dot(h.astype(jnp.bfloat16), params["w_hh"],
                              preferred_element_type=jnp.float32)
        i = jax.nn.sigmoid(gates[:, 0 * Hp:1 * Hp])
        f = jax.nn.sigmoid(gates[:, 1 * Hp:2 * Hp])
        g = jnp.tanh(gates[:, 2 * Hp:3 * Hp])
        o = jax.nn.sigmoid(gates[:, 3 * Hp:4 * Hp])
        c = f * c + i * g
        h = o * jnp.tanh(c)
        return (h, c), h

    init = (jnp.zeros((B, Hp), jnp.float32), jnp.zeros((B, Hp), jnp.float32))
    _, hs = jax.lax.scan(step, init, jnp.transpose(gx, (1, 0, 2)))      # (T,B,Hp)
    hs = jnp.transpose(hs, (1, 0, 2))                                   # (B,T,Hp)
    z = jnp.dot(hs.astype(jnp.bfloat16), params["w_fc1"],
                preferred_element_type=jnp.float32) + params["b_fc1"]
    scores = jnp.dot(z.astype(jnp.bfloat16), params["w_fc"],
                     preferred_element_type=jnp.float32) + params["b_fc"]
    return scores[..., :vocab_size]


# ------------------------------ parameters -----------------------------------
def init_params(key, vocab_size, word_dim=100, hidden=500):
    """Logical-size params. LSTM weights stored transposed as (in, 4H), gate
    order i,f,g,o; bias = b_ih + b_hh combined (matches nn.LSTM semantics).
    A real PyTorch checkpoint would need the same transpose + bias-sum."""
    ks = jax.random.split(key, 8)
    s = 0.02
    return {
        "embed": s * jax.random.normal(ks[0], (vocab_size, word_dim), jnp.float32),
        "w_ih": s * jax.random.normal(ks[1], (word_dim, 4 * hidden), jnp.float32),
        "w_hh": s * jax.random.normal(ks[2], (hidden, 4 * hidden), jnp.float32),
        "b_lstm": s * jax.random.normal(ks[3], (1, 4 * hidden), jnp.float32),
        "w_fc1": s * jax.random.normal(ks[4], (hidden, word_dim), jnp.float32),
        "b_fc1": s * jax.random.normal(ks[5], (1, word_dim), jnp.float32),
        "w_fc": s * jax.random.normal(ks[6], (word_dim, vocab_size), jnp.float32),
        "b_fc": s * jax.random.normal(ks[7], (1, vocab_size), jnp.float32),
    }


def _pad_to(x, shape):
    return jnp.pad(x, [(0, s - d) for d, s in zip(x.shape, shape)])


def _pad_gate_cols(w, h, hp):
    """Zero-pad each of the 4 gate blocks (i,f,g,o) from h to hp columns."""
    lead = w.shape[:-1]
    w = w.reshape(*lead, 4, h)
    w = jnp.pad(w, [(0, 0)] * len(lead) + [(0, 0), (0, hp - h)])
    return w.reshape(*lead, 4 * hp)


def pad_and_cast_params(p, *, word_dim, hidden, vocab_size,
                        dp=D_PAD, hp=H_PAD):
    """Zero-pad all dims to 128 multiples (padded lanes stay exactly inert)
    and cast matmul weights to bf16 (f32 accumulation keeps numerics)."""
    vp = (vocab_size + 127) // 128 * 128
    return {
        "embed": _pad_to(p["embed"], (vocab_size, dp)).astype(jnp.bfloat16),
        "w_ih": _pad_to(_pad_gate_cols(p["w_ih"], hidden, hp),
                        (dp, 4 * hp)).astype(jnp.bfloat16),
        "b_lstm": _pad_gate_cols(p["b_lstm"], hidden, hp).astype(jnp.float32),
        "w_hh": _pad_to(_pad_gate_cols(p["w_hh"], hidden, hp),
                        (hp, 4 * hp)).astype(jnp.bfloat16),
        "w_fc1": _pad_to(p["w_fc1"], (hp, dp)).astype(jnp.bfloat16),
        "b_fc1": _pad_to(p["b_fc1"], (1, dp)).astype(jnp.float32),
        "w_fc": _pad_to(p["w_fc"], (dp, vp)).astype(jnp.bfloat16),
        "b_fc": _pad_to(p["b_fc"], (1, vp)).astype(jnp.float32),
    }


if __name__ == "__main__":
    VOCAB = 64
    WORD_DIM = 100
    HIDDEN = 500
    B, T = 2, 8

    key = jax.random.PRNGKey(0)
    k_tok, k_par = jax.random.split(key)
    params = init_params(k_par, VOCAB, WORD_DIM, HIDDEN)
    padded = pad_and_cast_params(params, word_dim=WORD_DIM, hidden=HIDDEN,
                                 vocab_size=VOCAB)
    tokens = jax.random.randint(k_tok, (B, T), 0, VOCAB, dtype=jnp.int32)

    scores = lm_forward(tokens, padded, vocab_size=VOCAB)
    jax.block_until_ready(scores)
    assert scores.shape == (B, T, VOCAB) and scores.dtype == jnp.float32

    # Correctness check against a pure-JAX reference on the same padded params.
    ref = jax.jit(functools.partial(lm_reference, vocab_size=VOCAB))(tokens, padded)
    jax.block_until_ready(ref)
    assert jnp.allclose(scores, ref, atol=1e-3, rtol=1e-2), (
        float(jnp.max(jnp.abs(scores - ref))))

    print("KERNEL_OK")
</pallas_src>

<mosaic_0001>
module attributes {stable_mosaic.version = 11 : i64} {
  func.func @dense_kernel(%arg0: i32, %arg1: i32, %arg2: memref<64x128xbf16, #tpu.memory_space<vmem>>, %arg3: memref<128x128xbf16, #tpu.memory_space<vmem>>, %arg4: memref<1x128xf32, #tpu.memory_space<vmem>>, %arg5: memref<64x128xf32, #tpu.memory_space<vmem>>) attributes {dimension_semantics = [#tpu.dimension_semantics<parallel>, #tpu.dimension_semantics<parallel>], iteration_bounds = array<i64: 1, 1>, scalar_prefetch = 0 : i64, scratch_operands = 0 : i64, tpu.core_type = #tpu.core_type<tc>, window_params = [{transform_indices = @transform_0, window_bounds = array<i64: 64, 128>}, {transform_indices = @transform_1, window_bounds = array<i64: 128, 128>}, {transform_indices = @transform_2, window_bounds = array<i64: 1, 128>}, {transform_indices = @transform_3, window_bounds = array<i64: 64, 128>}]} {
    %c0 = arith.constant 0 : index
    %c0_0 = arith.constant 0 : index
    %0 = vector.load %arg2[%c0, %c0_0] : memref<64x128xbf16, #tpu.memory_space<vmem>>, vector<64x128xbf16>
    %c0_1 = arith.constant 0 : index
    %c0_2 = arith.constant 0 : index
    %1 = vector.load %arg3[%c0_1, %c0_2] : memref<128x128xbf16, #tpu.memory_space<vmem>>, vector<128x128xbf16>
    %cst = arith.constant dense<0.000000e+00> : vector<64x128xf32>
    %2 = tpu.matmul %0, %1, %cst {dimension_numbers = #tpu.dot_dimension_numbers<[1], [0], [0], [1], [0, 0, 1, 1], [], []>} : vector<64x128xbf16>, vector<128x128xbf16>, vector<64x128xf32> -> vector<64x128xf32>
    %c0_3 = arith.constant 0 : index
    %c0_4 = arith.constant 0 : index
    %3 = vector.load %arg4[%c0_3, %c0_4] : memref<1x128xf32, #tpu.memory_space<vmem>>, vector<1x128xf32>
    %4 = vector.broadcast %3 : vector<1x128xf32> to vector<64x128xf32>
    %5 = arith.addf %2, %4 : vector<64x128xf32>
    %c0_5 = arith.constant 0 : index
    %c0_6 = arith.constant 0 : index
    %6 = vector.load %arg5[%c0_5, %c0_6] : memref<64x128xf32, #tpu.memory_space<vmem>>, vector<64x128xf32>
    tpu.vector_store %arg5[%c0_5, %c0_6], %5 {strides = array<i32>} : memref<64x128xf32, #tpu.memory_space<vmem>>, vector<64x128xf32>,
    return
  }
  func.func @transform_0(%arg0: i32, %arg1: i32) -> (i32, i32) {
    %c0_i32 = arith.constant 0 : i32
    %c0_i32_0 = arith.constant 0 : i32
    return %arg0, %c0_i32 : i32, i32
  }
  func.func @transform_1(%arg0: i32, %arg1: i32) -> (i32, i32) {
    %c0_i32 = arith.constant 0 : i32
    %c0_i32_0 = arith.constant 0 : i32
    return %c0_i32, %arg1 : i32, i32
  }
  func.func @transform_2(%arg0: i32, %arg1: i32) -> (i32, i32) {
    %c0_i32 = arith.constant 0 : i32
    %c0_i32_0 = arith.constant 0 : i32
    return %c0_i32, %arg1 : i32, i32
  }
  func.func @transform_3(%arg0: i32, %arg1: i32) -> (i32, i32) {
    %c0_i32 = arith.constant 0 : i32
    return %arg0, %arg1 : i32, i32
  }
}

module attributes {stable_mosaic.version = 11 : i64} {
  func.func @dense_kernel(%arg0: i32, %arg1: i32, %arg2: memref<64x128xbf16, #tpu.memory_space<vmem>>, %arg3: memref<128x512xbf16, #tpu.memory_space<vmem>>, %arg4: memref<1x512xf32, #tpu.memory_space<vmem>>, %arg5: memref<64x512xf32, #tpu.memory_space<vmem>>) attributes {dimension_semantics = [#tpu.dimension_semantics<parallel>, #tpu.dimension_semantics<parallel>], iteration_bounds = array<i64: 1, 4>, scalar_prefetch = 0 : i64, scratch_operands = 0 : i64, tpu.core_type = #tpu.core_type<tc>, window_params = [{transform_indices = @transform_0, window_bounds = array<i64: 64, 128>}, {transform_indices = @transform_1, window_bounds = array<i64: 128, 512>}, {transform_indices = @transform_2, window_bounds = array<i64: 1, 512>}, {transform_indices = @transform_3, window_bounds = array<i64: 64, 512>}]} {
    %c0 = arith.constant 0 : index
    %c0_0 = arith.constant 0 : index
    %0 = vector.load %arg2[%c0, %c0_0] : memref<64x128xbf16, #tpu.memory_space<vmem>>, vector<64x128xbf16>
    %c0_1 = arith.constant 0 : index
    %c0_2 = arith.constant 0 : index
    %1 = vector.load %arg3[%c0_1, %c0_2] : memref<128x512xbf16, #tpu.memory_space<vmem>>, vector<128x512xbf16>
    %cst = arith.constant dense<0.000000e+00> : vector<64x512xf32>
    %2 = tpu.matmul %0, %1, %cst {dimension_numbers = #tpu.dot_dimension_numbers<[1], [0], [0], [1], [0, 0, 1, 1], [], []>} : vector<64x128xbf16>, vector<128x512xbf16>, vector<64x512xf32> -> vector<64x512xf32>
    %c0_3 = arith.constant 0 : index
    %c0_4 = arith.constant 0 : index
    %3 = vector.load %arg4[%c0_3, %c0_4] : memref<1x512xf32, #tpu.memory_space<vmem>>, vector<1x512xf32>
    %4 = vector.broadcast %3 : vector<1x512xf32> to vector<64x512xf32>
    %5 = arith.addf %2, %4 : vector<64x512xf32>
    %c0_5 = arith.constant 0 : index
    %c0_6 = arith.constant 0 : index
    %6 = vector.load %arg5[%c0_5, %c0_6] : memref<64x512xf32, #tpu.memory_space<vmem>>, vector<64x512xf32>
    tpu.vector_store %arg5[%c0_5, %c0_6], %5 {strides = array<i32>} : memref<64x512xf32, #tpu.memory_space<vmem>>, vector<64x512xf32>,
    return
  }
  func.func @transform_0(%arg0: i32, %arg1: i32) -> (i32, i32) {
    %c0_i32 = arith.constant 0 : i32
    %c0_i32_0 = arith.constant 0 : i32
    return %arg0, %c0_i32 : i32, i32
  }
  func.func @transform_1(%arg0: i32, %arg1: i32) -> (i32, i32) {
    %c0_i32 = arith.constant 0 : i32
    %c0_i32_0 = arith.constant 0 : i32
    return %c0_i32, %arg1 : i32, i32
  }
  func.func @transform_2(%arg0: i32, %arg1: i32) -> (i32, i32) {
    %c0_i32 = arith.constant 0 : i32
    %c0_i32_0 = arith.constant 0 : i32
    return %c0_i32, %arg1 : i32, i32
  }
  func.func @transform_3(%arg0: i32, %arg1: i32) -> (i32, i32) {
    %c0_i32 = arith.constant 0 : i32
    return %arg0, %arg1 : i32, i32
  }
}

module attributes {stable_mosaic.version = 11 : i64} {
  func.func @lstm_kernel(%arg0: i32, %arg1: memref<1x8x2048xf32, #tpu.memory_space<vmem>>, %arg2: memref<512x2048xbf16, #tpu.memory_space<vmem>>, %arg3: memref<512x128xbf16, #tpu.memory_space<vmem>>, %arg4: memref<1x128xf32, #tpu.memory_space<vmem>>, %arg5: memref<1x8x128xf32, #tpu.memory_space<vmem>>, %arg6: memref<8x512xf32, #tpu.memory_space<vmem>>, %arg7: memref<8x512xf32, #tpu.memory_space<vmem>>) attributes {dimension_semantics = [#tpu.dimension_semantics<arbitrary>], iteration_bounds = array<i64: 8>, scalar_prefetch = 0 : i64, scratch_operands = 2 : i64, tpu.core_type = #tpu.core_type<tc>, window_params = [{transform_indices = @transform_0, window_bounds = array<i64: 1, 8, 2048>}, {pipeline_mode = #tpu.pipeline_mode<synchronous>, transform_indices = @transform_1, window_bounds = array<i64: 512, 2048>}, {pipeline_mode = #tpu.pipeline_mode<synchronous>, transform_indices = @transform_2, window_bounds = array<i64: 512, 128>}, {pipeline_mode = #tpu.pipeline_mode<synchronous>, transform_indices = @transform_3, window_bounds = array<i64: 1, 128>}, {transform_indices = @transform_4, window_bounds = array<i64: 1, 8, 128>}]} {
    %c0_i32 = arith.constant 0 : i32
    %0 = arith.cmpi eq, %arg0, %c0_i32 : i32
    %1 = arith.extui %0 : i1 to i32
    %c0_i32_0 = arith.constant 0 : i32
    %2 = arith.cmpi ne, %1, %c0_i32_0 : i32
    scf.if %2 {
      %cst_24 = arith.constant 0.000000e+00 : f32
      %47 = vector.broadcast %cst_24 : f32 to vector<8x512xf32>
      %c0_25 = arith.constant 0 : index
      %c0_26 = arith.constant 0 : index
      %48 = vector.load %arg6[%c0_25, %c0_26] : memref<8x512xf32, #tpu.memory_space<vmem>>, vector<8x512xf32>
      tpu.vector_store %arg6[%c0_25, %c0_26], %47 {strides = array<i32>} : memref<8x512xf32, #tpu.memory_space<vmem>>, vector<8x512xf32>,
      %cst_27 = arith.constant 0.000000e+00 : f32
      %49 = vector.broadcast %cst_27 : f32 to vector<8x512xf32>
      %c0_28 = arith.constant 0 : index
      %c0_29 = arith.constant 0 : index
      %50 = vector.load %arg7[%c0_28, %c0_29] : memref<8x512xf32, #tpu.memory_space<vmem>>, vector<8x512xf32>
      tpu.vector_store %arg7[%c0_28, %c0_29], %49 {strides = array<i32>} : memref<8x512xf32, #tpu.memory_space<vmem>>, vector<8x512xf32>,
    } else {
    }
    %c0 = arith.constant 0 : index
    %c0_1 = arith.constant 0 : index
    %3 = vector.load %arg6[%c0, %c0_1] : memref<8x512xf32, #tpu.memory_space<vmem>>, vector<8x512xf32>
    %c0_2 = arith.constant 0 : index
    %c0_3 = arith.constant 0 : index
    %4 = vector.load %arg7[%c0_2, %c0_3] : memref<8x512xf32, #tpu.memory_space<vmem>>, vector<8x512xf32>
    %c0_4 = arith.constant 0 : index
    %c0_5 = arith.constant 0 : index
    %c0_6 = arith.constant 0 : index
    %5 = vector.load %arg1[%c0_4, %c0_5, %c0_6] : memref<1x8x2048xf32, #tpu.memory_space<vmem>>, vector<1x8x2048xf32>
    %6 = vector.shape_cast %5 : vector<1x8x2048xf32> to vector<8x2048xf32>
    %7 = arith.truncf %3 : vector<8x512xf32> to vector<8x512xbf16>
    %c0_7 = arith.constant 0 : index
    %c0_8 = arith.constant 0 : index
    %8 = vector.load %arg2[%c0_7, %c0_8] : memref<512x2048xbf16, #tpu.memory_space<vmem>>, vector<512x2048xbf16>
    %cst = arith.constant dense<0.000000e+00> : vector<8x2048xf32>
    %9 = tpu.matmul %7, %8, %cst {dimension_numbers = #tpu.dot_dimension_numbers<[1], [0], [0], [1], [0, 0, 1, 1], [], []>} : vector<8x512xbf16>, vector<512x2048xbf16>, vector<8x2048xf32> -> vector<8x2048xf32>
    %10 = arith.addf %6, %9 : vector<8x2048xf32>
    %11 = vector.extract_strided_slice %10 {offsets = [0, 0], sizes = [8, 512], strides = [1, 1]} : vector<8x2048xf32> to vector<8x512xf32>
    %12 = arith.negf %11 : vector<8x512xf32>
    %13 = math.exp %12 : vector<8x512xf32>
    %cst_9 = arith.constant 1.000000e+00 : f32
    %14 = vector.broadcast %cst_9 : f32 to vector<8x512xf32>
    %15 = arith.addf %14, %13 : vector<8x512xf32>
    %16 = arith.divf %14, %15 : vector<8x512xf32>
    %17 = vector.extract_strided_slice %10 {offsets = [0, 512], sizes = [8, 512], strides = [1, 1]} : vector<8x2048xf32> to vector<8x512xf32>
    %18 = arith.negf %17 : vector<8x512xf32>
    %19 = math.exp %18 : vector<8x512xf32>
    %cst_10 = arith.constant 1.000000e+00 : f32
    %20 = vector.broadcast %cst_10 : f32 to vector<8x512xf32>
    %21 = arith.addf %20, %19 : vector<8x512xf32>
    %22 = arith.divf %20, %21 : vector<8x512xf32>
    %23 = vector.extract_strided_slice %10 {offsets = [0, 1024], sizes = [8, 512], strides = [1, 1]} : vector<8x2048xf32> to vector<8x512xf32>
    %24 = math.tanh %23 : vector<8x512xf32>
    %25 = vector.extract_strided_slice %10 {offsets = [0, 1536], sizes = [8, 512], strides = [1, 1]} : vector<8x2048xf32> to vector<8x512xf32>
    %26 = arith.negf %25 : vector<8x512xf32>
    %27 = math.exp %26 : vector<8x512xf32>
    %cst_11 = arith.constant 1.000000e+00 : f32
    %28 = vector.broadcast %cst_11 : f32 to vector<8x512xf32>
    %29 = arith.addf %28, %27 : vector<8x512xf32>
    %30 = arith.divf %28, %29 : vector<8x512xf32>
    %31 = arith.mulf %22, %4 : vector<8x512xf32>
    %32 = arith.mulf %16, %24 : vector<8x512xf32>
    %33 = arith.addf %31, %32 : vector<8x512xf32>
    %34 = math.tanh %33 : vector<8x512xf32>
    %35 = arith.mulf %30, %34 : vector<8x512xf32>
    %c0_12 = arith.constant 0 : index
    %c0_13 = arith.constant 0 : index
    %36 = vector.load %arg7[%c0_12, %c0_13] : memref<8x512xf32, #tpu.memory_space<vmem>>, vector<8x512xf32>
    tpu.vector_store %arg7[%c0_12, %c0_13], %33 {strides = array<i32>} : memref<8x512xf32, #tpu.memory_space<vmem>>, vector<8x512xf32>,
    %c0_14 = arith.constant 0 : index
    %c0_15 = arith.constant 0 : index
    %37 = vector.load %arg6[%c0_14, %c0_15] : memref<8x512xf32, #tpu.memory_space<vmem>>, vector<8x512xf32>
    tpu.vector_store %arg6[%c0_14, %c0_15], %35 {strides = array<i32>} : memref<8x512xf32, #tpu.memory_space<vmem>>, vector<8x512xf32>,
    %38 = arith.truncf %35 : vector<8x512xf32> to vector<8x512xbf16>
    %c0_16 = arith.constant 0 : index
    %c0_17 = arith.constant 0 : index
    %39 = vector.load %arg3[%c0_16, %c0_17] : memref<512x128xbf16, #tpu.memory_space<vmem>>, vector<512x128xbf16>
    %cst_18 = arith.constant dense<0.000000e+00> : vector<8x128xf32>
    %40 = tpu.matmul %38, %39, %cst_18 {dimension_numbers = #tpu.dot_dimension_numbers<[1], [0], [0], [1], [0, 0, 1, 1], [], []>} : vector<8x512xbf16>, vector<512x128xbf16>, vector<8x128xf32> -> vector<8x128xf32>
    %c0_19 = arith.constant 0 : index
    %c0_20 = arith.constant 0 : index
    %41 = vector.load %arg4[%c0_19, %c0_20] : memref<1x128xf32, #tpu.memory_space<vmem>>, vector<1x128xf32>
    %42 = vector.broadcast %41 : vector<1x128xf32> to vector<8x128xf32>
    %43 = arith.addf %40, %42 : vector<8x128xf32>
    %c0_21 = arith.constant 0 : index
    %c0_22 = arith.constant 0 : index
    %c0_23 = arith.constant 0 : index
    %44 = vector.load %arg5[%c0_21, %c0_22, %c0_23] : memref<1x8x128xf32, #tpu.memory_space<vmem>>, vector<1x8x128xf32>
    %45 = vector.shape_cast %44 : vector<1x8x128xf32> to vector<8x128xf32>
    %46 = vector.shape_cast %43 : vector<8x128xf32> to vector<1x8x128xf32>
    tpu.vector_store %arg5[%c0_21, %c0_22, %c0_23], %46 {strides = array<i32>} : memref<1x8x128xf32, #tpu.memory_space<vmem>>, vector<1x8x128xf32>,
    return
  }
  func.func @transform_0(%arg0: i32) -> (i32, i32, i32) {
    %c0_i32 = arith.constant 0 : i32
    %c0_i32_0 = arith.constant 0 : i32
    %c0_i32_1 = arith.constant 0 : i32
    return %arg0, %c0_i32, %c0_i32_0 : i32, i32, i32
  }
  func.func @transform_1(%arg0: i32) -> (i32, i32) {
    %c0_i32 = arith.constant 0 : i32
    %c0_i32_0 = arith.constant 0 : i32
    %c0_i32_1 = arith.constant 0 : i32
    return %c0_i32, %c0_i32_0 : i32, i32
  }
  func.func @transform_2(%arg0: i32) -> (i32, i32) {
    %c0_i32 = arith.constant 0 : i32
    %c0_i32_0 = arith.constant 0 : i32
    %c0_i32_1 = arith.constant 0 : i32
    return %c0_i32, %c0_i32_0 : i32, i32
  }
  func.func @transform_3(%arg0: i32) -> (i32, i32) {
    %c0_i32 = arith.constant 0 : i32
    %c0_i32_0 = arith.constant 0 : i32
    %c0_i32_1 = arith.constant 0 : i32
    return %c0_i32, %c0_i32_0 : i32, i32
  }
  func.func @transform_4(%arg0: i32) -> (i32, i32, i32) {
    %c0_i32 = arith.constant 0 : i32
    %c0_i32_0 = arith.constant 0 : i32
    %c0_i32_1 = arith.constant 0 : i32
    return %arg0, %c0_i32, %c0_i32_0 : i32, i32, i32
  }
}

</mosaic_0001>

<bundles_post_ra>
// kernel: lm_forward.5
= control target key start
LH: loop header
LB: loop body
LE: loop exit
PB: predicated region body
PF: predicated region fallthrough
CT: control target
= control target key end

     0   :  { %s355_s1 = inlined_call_operand.vmem [shape: bf16[128,128], index: 1, kind: input, shape index: {}]   ;;  %s356_s0 = inlined_call_operand.vmem [shape: bf16[64,128], index: 0, kind: input, shape index: {}]   ;;  %s357_s2 = inlined_call_operand.vmem [shape: f32[1,128], index: 2, kind: input, shape index: {}]   ;;  %s358_s3 = inlined_call_operand.vmem [shape: f32[64,128], index: 3, kind: output, shape index: {}]  }
   0x1   :  { %v260_v0 = vld [vmem:[%s355_s1 + $0x38] sm:$0xff]   ;;  %v261_v1 = vld [vmem:[%s355_s1 + $0x30] sm:$0xff]   ;;  %v262_v2 = vld [vmem:[%s355_s1 + $0x28] sm:$0xff]  }
   0x2   :  { %220 = vmatprep.subr.bf16.mxu0 %v260_v0  ;;  %244 = vmatprep.subr.bf16.mxu1 %v260_v0  ;;  %v263_v3 = vld [vmem:[%s355_s1 + $0x20] sm:$0xff]   ;;  %v269_v5 = vld [vmem:[%s356_s0 + $0x10] sm:$0xff]   ;;  %v264_v6 = vld [vmem:[%s355_s1 + $0x18] sm:$0xff]  }
   0x3   :  { %221 = vmatpush3.bf16.msra.mxu0 %v260_v0  ;;  %252 = vmatpush3.bf16.msra.mxu1 %v260_v0  ;;  %v268_v4 = vld [vmem:[%s356_s0] sm:$0xff]   ;;  %v265_v7 = vld [vmem:[%s355_s1 + $0x10] sm:$0xff]   ;;  %v266_v8 = vld [vmem:[%s355_s1 + $0x8] sm:$0xff]  }
   0x4   :  { %222 = vmatprep.subr.bf16.mxu0 %v261_v1  ;;  %245 = vmatprep.subr.bf16.mxu1 %v261_v1  ;;  %v267_v9 = vld [vmem:[%s355_s1] sm:$0xff]   ;;  %v270_v10 = vld [vmem:[%s356_s0 + $0x8] sm:$0xff]   ;;  %v271_v11 = vld [vmem:[%s356_s0 + $0x18] sm:$0xff]  }
   0x5   :  { %236 = vmatprep.mubr.bf16.mxu0 %v268_v4  ;;  %240 = vmatprep.mubr.bf16.mxu1 %v269_v5  ;;  %v195_v12 = vld [vmem:[%s357_s2] ss:$0 sm:$0xff] }
   0x7   :  { %223 = vmatpush3.bf16.msra.mxu0 %v261_v1  ;;  %253 = vmatpush3.bf16.msra.mxu1 %v261_v1 }
   0x8   :  { %224 = vmatprep.subr.bf16.mxu0 %v262_v2  ;;  %246 = vmatprep.subr.bf16.mxu1 %v262_v2 }
   0xb   :  { %225 = vmatpush3.bf16.msra.mxu0 %v262_v2  ;;  %254 = vmatpush3.bf16.msra.mxu1 %v262_v2 }
   0xc   :  { %226 = vmatprep.subr.bf16.mxu0 %v263_v3  ;;  %247 = vmatprep.subr.bf16.mxu1 %v263_v3 }
   0xf   :  { %227 = vmatpush3.bf16.msra.mxu0 %v263_v3  ;;  %255 = vmatpush3.bf16.msra.mxu1 %v263_v3 }
  0x10   :  { %228 = vmatprep.subr.bf16.mxu0 %v264_v6  ;;  %248 = vmatprep.subr.bf16.mxu1 %v264_v6 }
  0x13   :  { %229 = vmatpush3.bf16.msra.mxu0 %v264_v6  ;;  %256 = vmatpush3.bf16.msra.mxu1 %v264_v6 }
  0x14   :  { %230 = vmatprep.subr.bf16.mxu0 %v265_v7  ;;  %249 = vmatprep.subr.bf16.mxu1 %v265_v7 }
  0x17   :  { %231 = vmatpush3.bf16.msra.mxu0 %v265_v7  ;;  %257 = vmatpush3.bf16.msra.mxu1 %v265_v7 }
  0x18   :  { %232 = vmatprep.subr.bf16.mxu0 %v266_v8  ;;  %250 = vmatprep.subr.bf16.mxu1 %v266_v8 }
  0x1b   :  { %233 = vmatpush3.bf16.msra.mxu0 %v266_v8  ;;  %258 = vmatpush3.bf16.msra.mxu1 %v266_v8 }
  0x1c   :  { %234 = vmatprep.subr.bf16.mxu0 %v267_v9  ;;  %251 = vmatprep.subr.bf16.mxu1 %v267_v9 }
  0x1f   :  { %235 = vmatpush3.bf16.msra.mxu0 %v267_v9  ;;  %259 = vmatpush3.bf16.msra.mxu1 %v267_v9 }
  0x22   :  { %237 = vmatmul.mubr.bf16.vlgmr.msra.gmra.mxu0 %v270_v10  ;;  %241 = vmatmul.mubr.bf16.vlgmr.msra.gmra.mxu1 %v271_v11 }
  0xe2   :  { %v238_v13 = vpop.f32.mrf.mxu0  ;;  %v242_v14 = vpop.f32.mrf.mxu1 }
  0xe3   :  { %v161_v15 = vadd.f32 %v238_v13, %v195_v12  ;;  %v177_v16 = vadd.f32 %v242_v14, %v195_v12 }
  0xe4   :  { %v152_v17 = vpop.f32.mrf.mxu0  ;;  %v168_v18 = vpop.f32.mrf.mxu1 }
  0xe5   :  { %185 = vst [vmem:[%s358_s3 + $0x10] sm:$0xff] %v161_v15  ;;  %189 = vst [vmem:[%s358_s3 + $0x30] sm:$0xff] %v177_v16  ;;  %v153_v19 = vadd.f32 %v195_v12, %v152_v17  ;;  %v169_v20 = vadd.f32 %v195_v12, %v168_v18 }
  0xe6   :  { %v239_v21 = vpop.f32.mrf.mxu0  ;;  %v243_v22 = vpop.f32.mrf.mxu1 }
  0xe7   :  { %183 = vst [vmem:[%s358_s3] sm:$0xff] %v153_v19  ;;  %187 = vst [vmem:[%s358_s3 + $0x20] sm:$0xff] %v169_v20  ;;  %v164_v23 = vadd.f32 %v239_v21, %v195_v12  ;;  %v180_v24 = vadd.f32 %v243_v22, %v195_v12 }
  0xe8   :  { %v155_v25 = vpop.f32.mrf.mxu0  ;;  %v171_v26 = vpop.f32.mrf.mxu1 }
  0xe9   :  { %186 = vst [vmem:[%s358_s3 + $0x18] sm:$0xff] %v164_v23  ;;  %190 = vst [vmem:[%s358_s3 + $0x38] sm:$0xff] %v180_v24  ;;  %v156_v27 = vadd.f32 %v195_v12, %v155_v25  ;;  %v172_v28 = vadd.f32 %v195_v12, %v171_v26 }
  0xeb   :  { %184 = vst [vmem:[%s358_s3 + $0x8] sm:$0xff] %v156_v27  ;;  %188 = vst [vmem:[%s358_s3 + $0x28] sm:$0xff] %v172_v28 }

// kernel: lm_forward.3
= control target key start
LH: loop header
LB: loop body
LE: loop exit
PB: predicated region body
PF: predicated region fallthrough
CT: control target
= control target key end

     0   :  { %8 = vsyncpa [#allocation3], 0  ;;  %s1542_s0 = inlined_call_operand.vmem [shape: bf16[64,128], index: 0, kind: input, shape index: {}]   ;;  %s1543_s1 = inlined_call_operand.hbm [shape: bf16[128,2048], index: 1, kind: input, shape index: {}]   ;;  %s1544_s2 = inlined_call_operand.hbm [shape: f32[1,2048], index: 2, kind: input, shape index: {}]   ;;  %s1545_s3 = inlined_call_operand.vmem [shape: f32[64,2048], index: 3, kind: output, shape index: {}]  }
   0x1   :  { %10 = vsyncpa [#allocation3 + $0x1], 0 }
   0x2   :  { %11 = vsyncpa [#allocation5], 0 }
   0x3   :  { %13 = vsyncpa [#allocation5 + $0x1], 0  ;;  %s1204_s12 = smov 0   ;;  %s1206_s13 = smov 0  }
   0x4   :  { %s1208_s14 = smov 0   ;;  %s1210_s15 = smov 0  }
   0x5   :  { %s1212_s16 = smov 0   ;;  %s1214_s17 = smov 0  }
   0x6 LB: > { %s891_s18 = sadd.s32 4294967295, %s1176_s17   ;;  %s28_s19 = sadd.s32 1, %s1172_s16  ;;  %s1176_s17 = sphi %s1214_s17, %s19_s17   ;;  %s1172_s16 = sphi %s1212_s16, %s1555_s16   ;;  %s1168_s15 = sphi %s1210_s15, %s1554_s15   ;;  %s1164_s14 = sphi %s1208_s14, %s1553_s14   ;;  %s1160_s13 = sphi %s1206_s13, %s1552_s13   ;;  %s1156_s12 = sphi %s1204_s12, %s1551_s12  }
   0x7   : > { %p29_p0 = scmp.ge.s32.totalorder %s28_s19, 4  ;;  %s64_s20 = sadd.s32 1, %s1164_s14 }
   0x8   : > { %p71_p1 = scmp.ne.s32.totalorder %s1164_s14, %s1160_s13  ;;  %p72_p2 = scmp.eq.s32.totalorder %s1176_s17, 0 }
   0x9   : > { %s1557_s19 = smov (%p29_p0, %s28_s19), 0  ;;  %p77_p4 = scmp.ne.s32.totalorder %s1160_s13, %s1156_s12 }
   0xa   : > { %p1240_p3 = por %p72_p2, %p71_p1  ;;  %s61_s22 = ssub.s32 %s1172_s16, %s1557_s19 }
   0xb   : > { %p78_p5 = scmp.eq.s32.totalorder %s891_s18, 0  ;;  %p62_p6 = scmp.eq.s32.totalorder %s61_s22, 0 }
   0xc   : > { %p129_p7 = scmp.eq.s32.totalorder %s891_s18, 3  ;;  %p961_p10 = scmp.lt.s32.totalorder %s1176_s17, 4 }
   0xd   : > { %p1247_p8 = por %p78_p5, %p77_p4  ;;  %s1260_s26 = sand.u32 1, %s1164_s14  }
   0xe   : > { %s1252_s24 = scalar_select %p62_p6, %s1164_s14, %s64_s20  }
   0xf   : > { %p1254_p9 = por %p129_p7, %p71_p1  ;;  %s947_s27 = sshll.u32 %s1172_s16, 8 }
  0x10   : > { %s896_s28 = sshll.u32 %s1260_s26, 8  ;;  %s174_s4 = scalar_lea.hbm %s1543_s1, %s947_s27 }
  0x11   : > { %s168_s5 = scalar_lea.vmem [#allocation2], %s896_s28  ;;  %p1269_p11 = pnand %p961_p10, %p1240_p3 }
  0x12   : > { %s175_s6 = sshll.u32 %s168_s5, 4  ;;  %p902_p12 = scmp.ge.s32.totalorder %s1176_s17, 1  ;;  %s176_s6 = int_to_ptr.vmem [resolvable:$true] %s175_s6 }
  0x13   : > { %s165_s8 = scalar_lea.sflag [#allocation3], %s1260_s26  ;;  %p1068_p13 = pneg %p1269_p11 }
  0x14   : > { %s1079_s9 = scalar_lea.vmem %s176_s6, 4096  ;;  %s1178_s10 = smov [#allocation2]  }
  0x15   : > { %p1080_p0 = scmp.ne.s32.totalorder %s176_s6, %s1079_s9  ;;  %s1084_s11 = sshll.u32 %s1178_s10, 4  ;;  %s1085_s11 = int_to_ptr.vmem [resolvable:$false] %s1084_s11 }
  0x16   : > { %s1086_s12 = scalar_lea.vmem %s1085_s11, 8192  ;;  %p1087_p3 = scmp.lt.s32.totalorder %s176_s6, %s1085_s11 }
  0x17   : > { %p1082_p1 = pnand %p1080_p0, %p1068_p13  ;;  %p1088_p4 = scmp.lt.s32.totalorder %s1086_s12, %s1079_s9 }
  0x19   : > { %p1083_p2 = pneg %p1082_p1  ;;  %p1089_p5 = por %p1088_p4, %p1087_p3 }
  0x1b   : > { %p1090_p6 = pnand %p1089_p5, %p1083_p2 }
  0x1d   : > { %1093 = shalt.err (!%p1090_p6)
}
  0x1e   : > { %s1179_s18 = smov 1024   ;;  %s1180_s20 = smov 256  }
  0x1f   : > { %s1181_s21 = smov 16   ;;  %p202_p7 = scmp.lt.s32.totalorder %s1176_s17, 5 }
  0x20   : > { %957 = dma.hbm_to_vmem [thread:$0]  (!%p1269_p11), %s174_s4, 4096, %s176_s6, %s165_s8, %s1179_s18, %s1180_s20, %s1181_s21  }
  0x21   : > { %s899_s22 = sshll.u32 %s1260_s26, 2  ;;  %s948_s27 = sshll.u32 %s1172_s16, 6 }
  0x22   : > { %p1287_p10 = pnand %p902_p12, %p202_p7  ;;  %s195_s5 = scalar_lea.hbm %s1544_s2, %s948_s27 }
  0x23   : > { %s189_s9 = scalar_lea.vmem [#allocation4], %s899_s22  ;;  %s186_s11 = scalar_lea.sflag [#allocation5], %s1260_s26 }
  0x24   : > { %s197_s10 = sshll.u32 %s189_s9, 4  ;;  %s1182_s4 = smov [#allocation4]   ;;  %s198_s10 = int_to_ptr.vmem [resolvable:$true] %s197_s10 }
  0x25   : > { %s1107_s12 = scalar_lea.vmem %s198_s10, 64  ;;  %s1112_s6 = sshll.u32 %s1182_s4, 4  ;;  %s1113_s6 = int_to_ptr.vmem [resolvable:$false] %s1112_s6 }
  0x26   : > { %p1108_p0 = scmp.ne.s32.totalorder %s198_s10, %s1107_s12  ;;  %s1114_s8 = scalar_lea.vmem %s1113_s6, 128 }
  0x27   : > { %p1115_p12 = scmp.lt.s32.totalorder %s198_s10, %s1113_s6  ;;  %p1116_p3 = scmp.lt.s32.totalorder %s1114_s8, %s1107_s12 }
  0x28   : > { %p1110_p1 = pnand %p1108_p0, %p1068_p13 }
  0x29   : > { %p1117_p4 = por %p1116_p3, %p1115_p12 }
  0x2a   : > { %p1111_p2 = pneg %p1110_p1 }
  0x2c   : > { %p1118_p5 = pnand %p1117_p4, %p1111_p2 }
  0x2e   : > { %1121 = shalt.err (!%p1118_p5)
}
  0x2f   : > { %960 = dma.hbm_to_vmem [thread:$0]  (!%p1269_p11), %s195_s5, 64, %s198_s10, %s186_s11  }
  0x30   : > { %206 = sbr.rel (%p1287_p10) target bundleno = 325 (0x145), region = 32  ;;  %s1303_s26 = sand.u32 (!%p1287_p10), 1, %s1160_s13  }
  0x31   : > { %s903_s18 = sshll.u32 (!%p1287_p10), %s1303_s26, 8  ;;  %s209_s20 = scalar_lea.sflag (!%p1287_p10), [#allocation3], %s1303_s26 }
  0x32   : > { %s1309_s21 = scalar_lea.vmem (!%p1287_p10), [#allocation2], %s903_s18 }
  0x35   : > { %1147 = dma.done.wait (%p1247_p8), %s209_s20, 4096  }
  0x36   : > { %1149 = vsyncadd (%p1247_p8), %s209_s20, 4294963200  ;;  %s904_s7 = sshll.u32 %s1303_s26, 2  ;;  %s218_s22 = scalar_lea.sflag [#allocation5], %s1303_s26 }
  0x37   : > { %s1317_s27 = scalar_lea.vmem [#allocation4], %s904_s7 }
  0x38   : > { %1151 = dma.done.wait (%p1247_p8), %s218_s22, 64  }
  0x39   : > { %1153 = vsyncadd (%p1247_p8), %s218_s22, 4294967232  ;;  %v1183_v0 = vmov 0   ;;  %v1014_v1 = vld [vmem:[%s1309_s21 + $0xe4] ss:$16 sps:$4 sm:$0xff]   ;;  %v1016_v2 = vld [vmem:[%s1309_s21 + $0xec] ss:$16 sps:$4 sm:$0xff]   ;;  %v306_v37 = vlaneseq }
  0x3a   : > { %542 = vmatprep.mubr.bf16.mxu0 %v1183_v0  ;;  %615 = vmatprep.mubr.bf16.mxu1 %v1183_v0  ;;  %v1018_v3 = vld [vmem:[%s1309_s21 + $0xe0] ss:$16 sps:$4 sm:$0xff]   ;;  %v1019_v4 = vld [vmem:[%s1309_s21 + $0xe8] ss:$16 sps:$4 sm:$0xff]   ;;  %v1020_v5 = vld [vmem:[%s1309_s21 + $0xc4] ss:$16 sps:$4 sm:$0xff]  }
  0x3b   : > { %510 = vmatprep.subr.bf16.mxu0 %v1014_v1  ;;  %583 = vmatprep.subr.bf16.mxu1 %v1016_v2  ;;  %v1022_v6 = vld [vmem:[%s1309_s21 + $0xcc] ss:$16 sps:$4 sm:$0xff]   ;;  %v1024_v7 = vld [vmem:[%s1309_s21 + $0xc0] ss:$16 sps:$4 sm:$0xff]   ;;  %v1025_v8 = vld [vmem:[%s1309_s21 + $0xc8] ss:$16 sps:$4 sm:$0xff]  }
  0x3c   : > { %511 = vmatpush1.bf16.msra.mxu0 %v1018_v3  ;;  %584 = vmatpush1.bf16.msra.mxu1 %v1019_v4  ;;  %v1026_v9 = vld [vmem:[%s1309_s21 + $0xa4] ss:$16 sps:$4 sm:$0xff]   ;;  %v1028_v10 = vld [vmem:[%s1309_s21 + $0xac] ss:$16 sps:$4 sm:$0xff]   ;;  %v1030_v11 = vld [vmem:[%s1309_s21 + $0xa0] ss:$16 sps:$4 sm:$0xff]  }
  0x3d   : > { %512 = vmatprep.subr.bf16.mxu0 %v1020_v5  ;;  %585 = vmatprep.subr.bf16.mxu1 %v1022_v6  ;;  %v1031_v12 = vld [vmem:[%s1309_s21 + $0xa8] ss:$16 sps:$4 sm:$0xff]   ;;  %v1032_v13 = vld [vmem:[%s1309_s21 + $0x84] ss:$16 sps:$4 sm:$0xff]   ;;  %v1034_v14 = vld [vmem:[%s1309_s21 + $0x8c] ss:$16 sps:$4 sm:$0xff]  }
  0x3e   : > { %v1036_v15 = vld [vmem:[%s1309_s21 + $0x80] ss:$16 sps:$4 sm:$0xff]   ;;  %v1037_v16 = vld [vmem:[%s1309_s21 + $0x88] ss:$16 sps:$4 sm:$0xff]   ;;  %v1038_v17 = vld [vmem:[%s1309_s21 + $0x64] ss:$16 sps:$4 sm:$0xff]  }
  0x3f   : > { %v1040_v18 = vld [vmem:[%s1309_s21 + $0x6c] ss:$16 sps:$4 sm:$0xff]   ;;  %v1042_v19 = vld [vmem:[%s1309_s21 + $0x60] ss:$16 sps:$4 sm:$0xff]   ;;  %v1043_v20 = vld [vmem:[%s1309_s21 + $0x68] ss:$16 sps:$4 sm:$0xff]  }
  0x40   : > { %513 = vmatpush1.bf16.msra.mxu0 %v1024_v7  ;;  %586 = vmatpush1.bf16.msra.mxu1 %v1025_v8  ;;  %v1044_v21 = vld [vmem:[%s1309_s21 + $0x44] ss:$16 sps:$4 sm:$0xff]   ;;  %v1046_v22 = vld [vmem:[%s1309_s21 + $0x4c] ss:$16 sps:$4 sm:$0xff]   ;;  %v1048_v23 = vld [vmem:[%s1309_s21 + $0x40] ss:$16 sps:$4 sm:$0xff]  }
  0x41   : > { %514 = vmatprep.subr.bf16.mxu0 %v1026_v9  ;;  %587 = vmatprep.subr.bf16.mxu1 %v1028_v10  ;;  %v1049_v24 = vld [vmem:[%s1309_s21 + $0x48] ss:$16 sps:$4 sm:$0xff]   ;;  %v1050_v25 = vld [vmem:[%s1309_s21 + $0x24] ss:$16 sps:$4 sm:$0xff]   ;;  %v1052_v26 = vld [vmem:[%s1309_s21 + $0x2c] ss:$16 sps:$4 sm:$0xff]  }
  0x42   : > { %v1054_v27 = vld [vmem:[%s1309_s21 + $0x20] ss:$16 sps:$4 sm:$0xff]   ;;  %v1055_v28 = vld [vmem:[%s1309_s21 + $0x28] ss:$16 sps:$4 sm:$0xff]   ;;  %v1056_v29 = vld [vmem:[%s1309_s21 + $0x4] ss:$16 sps:$4 sm:$0xff]  }
  0x43   : > { %v1058_v30 = vld [vmem:[%s1309_s21 + $0xc] ss:$16 sps:$4 sm:$0xff]   ;;  %v1060_v31 = vld [vmem:[%s1309_s21] ss:$16 sps:$4 sm:$0xff]   ;;  %v1061_v32 = vld [vmem:[%s1309_s21 + $0x8] ss:$16 sps:$4 sm:$0xff]  }
  0x44   : > { %515 = vmatpush1.bf16.msra.mxu0 %v1030_v11  ;;  %588 = vmatpush1.bf16.msra.mxu1 %v1031_v12  ;;  %v1062_v33 = vld [vmem:[%s1542_s0] sm:$0xff]   ;;  %v1063_v34 = vld [vmem:[%s1542_s0 + $0x8] sm:$0xff]   ;;  %v1064_v35 = vld [vmem:[%s1542_s0 + $0x10] sm:$0xff]   ;;  %v307_v38 = vshrl.u32 %v306_v37, 7  ;;  %s1388_s12 = scalar_lea.vmem [#allocation6], %s903_s18  ;;  %s949_s4 = sshll.u32 (%p1254_p9), %s1168_s15, 5 }
  0x45   : > { %516 = vmatprep.subr.bf16.mxu0 %v1032_v13  ;;  %589 = vmatprep.subr.bf16.mxu1 %v1034_v14  ;;  %v1065_v36 = vld [vmem:[%s1542_s0 + $0x18] sm:$0xff]   ;;  %v304_v41 = vld [vmem:[%s1317_s27] sm:$0xf]  ;;  %s1461_s26 = scalar_lea.vmem (%p1254_p9), %s1545_s3, %s949_s4 }
  0x46   : > { %v308_v39 = vsub.s32 0, %v307_v38  ;;  %v316_v40 = vsub.s32 2, %v307_v38  ;;  %v312_v42 = vsub.s32 1, %v307_v38  ;;  %v320_v43 = vsub.s32 3, %v307_v38 }
  0x48   : > { %517 = vmatpush1.bf16.msra.mxu0 %v1036_v15  ;;  %590 = vmatpush1.bf16.msra.mxu1 %v1037_v16  ;;  %v1376_v44 = vrot.slane %v304_v41, %v308_v39  ;;  %v1378_v45 = vrot.slane %v304_v41, %v316_v40  ;;  %v1380_v46 = vrot.slane %v304_v41, %v312_v42 }
  0x49   : > { %518 = vmatprep.subr.bf16.mxu0 %v1038_v17  ;;  %591 = vmatprep.subr.bf16.mxu1 %v1040_v18  ;;  %v1382_v47 = vrot.slane %v304_v41, %v320_v43 }
  0x4c   : > { %519 = vmatpush1.bf16.msra.mxu0 %v1042_v19  ;;  %592 = vmatpush1.bf16.msra.mxu1 %v1043_v20 }
  0x4d   : > { %520 = vmatprep.subr.bf16.mxu0 %v1044_v21  ;;  %593 = vmatprep.subr.bf16.mxu1 %v1046_v22 }
  0x50   : > { %521 = vmatpush1.bf16.msra.mxu0 %v1048_v23  ;;  %594 = vmatpush1.bf16.msra.mxu1 %v1049_v24 }
  0x51   : > { %522 = vmatprep.subr.bf16.mxu0 %v1050_v25  ;;  %595 = vmatprep.subr.bf16.mxu1 %v1052_v26 }
  0x54   : > { %523 = vmatpush1.bf16.msra.mxu0 %v1054_v27  ;;  %596 = vmatpush1.bf16.msra.mxu1 %v1055_v28 }
  0x55   : > { %524 = vmatprep.subr.bf16.mxu0 %v1056_v29  ;;  %597 = vmatprep.subr.bf16.mxu1 %v1058_v30 }
  0x58   : > { %525 = vmatpush1.bf16.msra.mxu0 %v1060_v31  ;;  %598 = vmatpush1.bf16.msra.mxu1 %v1061_v32 }
  0x5b   : > { %543 = vmatmul.mubr.bf16.vlgmr.msra.gmra.mxu0 %v1062_v33  ;;  %616 = vmatmul.mubr.bf16.vlgmr.msra.gmra.mxu1 %v1062_v33 }
  0x5c   : > { %552 = vmatprep.mubr.bf16.mxu0 %v1183_v0  ;;  %625 = vmatprep.mubr.bf16.mxu1 %v1183_v0 }
  0x63   : > { %553 = vmatmul.mubr.bf16.gmra.mxu0 %v1063_v34  ;;  %626 = vmatmul.mubr.bf16.gmra.mxu1 %v1063_v34 }
  0x64   : > { %562 = vmatprep.mubr.bf16.mxu0 %v1183_v0  ;;  %635 = vmatprep.mubr.bf16.mxu1 %v1183_v0 }
  0x6b   : > { %563 = vmatmul.mubr.bf16.gmra.mxu0 %v1064_v35  ;;  %636 = vmatmul.mubr.bf16.gmra.mxu1 %v1064_v35 }
  0x6c   : > { %572 = vmatprep.mubr.bf16.mxu0 %v1183_v0  ;;  %645 = vmatprep.mubr.bf16.mxu1 %v1183_v0 }
  0x73   : > { %573 = vmatmul.mubr.bf16.gmra.mxu0 %v1065_v36  ;;  %646 = vmatmul.mubr.bf16.gmra.mxu1 %v1065_v36 }
 0x11b   : > { %v544_v48 = vpop.f32.mrf.mxu0  ;;  %v617_v49 = vpop.f32.mrf.mxu1 }
 0x11c   : > { %v545_v50 = vadd.f32 %v544_v48, %v1376_v44  ;;  %v618_v51 = vadd.f32 %v617_v49, %v1378_v45 }
 0x11d   : > { %v546_v52 = vpop.f32.mrf.mxu0  ;;  %v619_v53 = vpop.f32.mrf.mxu1 }
 0x11e   : > { %656 = vst [vmem:[%s1388_s12] sm:$0xff] %v545_v50  ;;  %658 = vst [vmem:[%s1388_s12 + $0x10] sm:$0xff] %v618_v51  ;;  %v547_v54 = vadd.f32 %v546_v52, %v1380_v46  ;;  %v620_v55 = vadd.f32 %v619_v53, %v1382_v47 }
 0x11f   : > { %v548_v56 = vpop.f32.mrf.mxu0  ;;  %v621_v57 = vpop.f32.mrf.mxu1 }
 0x120   : > { %657 = vst [vmem:[%s1388_s12 + $0x8] sm:$0xff] %v547_v54  ;;  %659 = vst [vmem:[%s1388_s12 + $0x18] sm:$0xff] %v620_v55  ;;  %v549_v58 = vadd.f32 %v548_v56, %v1376_v44  ;;  %v622_v59 = vadd.f32 %v621_v57, %v1378_v45 }
 0x121   : > { %v550_v60 = vpop.f32.mrf.mxu0  ;;  %v623_v61 = vpop.f32.mrf.mxu1 }
 0x122   : > { %660 = vst [vmem:[%s1388_s12 + $0x20] sm:$0xff] %v549_v58  ;;  %662 = vst [vmem:[%s1388_s12 + $0x30] sm:$0xff] %v622_v59  ;;  %v551_v62 = vadd.f32 %v550_v60, %v1380_v46  ;;  %v624_v63 = vadd.f32 %v623_v61, %v1382_v47 }
 0x123   : > { %v554_v0 = vpop.f32.mrf.mxu0  ;;  %v627_v1 = vpop.f32.mrf.mxu1 }
 0x124   : > { %661 = vst [vmem:[%s1388_s12 + $0x28] sm:$0xff] %v551_v62  ;;  %663 = vst [vmem:[%s1388_s12 + $0x38] sm:$0xff] %v624_v63  ;;  %v555_v2 = vadd.f32 %v554_v0, %v1376_v44  ;;  %v628_v3 = vadd.f32 %v627_v1, %v1378_v45 }
 0x125   : > { %v556_v4 = vpop.f32.mrf.mxu0  ;;  %v629_v5 = vpop.f32.mrf.mxu1 }
 0x126   : > { %664 = vst [vmem:[%s1388_s12 + $0x40] sm:$0xff] %v555_v2  ;;  %666 = vst [vmem:[%s1388_s12 + $0x50] sm:$0xff] %v628_v3  ;;  %v557_v6 = vadd.f32 %v556_v4, %v1380_v46  ;;  %v630_v7 = vadd.f32 %v629_v5, %v1382_v47 }
 0x127   : > { %v558_v8 = vpop.f32.mrf.mxu0  ;;  %v631_v9 = vpop.f32.mrf.mxu1 }
 0x128   : > { %665 = vst [vmem:[%s1388_s12 + $0x48] sm:$0xff] %v557_v6  ;;  %667 = vst [vmem:[%s1388_s12 + $0x58] sm:$0xff] %v630_v7  ;;  %v559_v10 = vadd.f32 %v558_v8, %v1376_v44  ;;  %v632_v11 = vadd.f32 %v631_v9, %v1378_v45 }
 0x129   : > { %v560_v12 = vpop.f32.mrf.mxu0  ;;  %v633_v13 = vpop.f32.mrf.mxu1  ;;  %v721_v52 = vld [vmem:[%s1388_s12 + $0x20] sm:$0xff] (%p1254_p9)  ;;  %v725_v54 = vld [vmem:[%s1388_s12 + $0x30] sm:$0xff] (%p1254_p9) }
 0x12a   : > { %668 = vst [vmem:[%s1388_s12 + $0x60] sm:$0xff] %v559_v10  ;;  %670 = vst [vmem:[%s1388_s12 + $0x70] sm:$0xff] %v632_v11  ;;  %v561_v14 = vadd.f32 %v560_v12, %v1380_v46  ;;  %v634_v15 = vadd.f32 %v633_v13, %v1382_v47 }
 0x12b   : > { %v564_v16 = vpop.f32.mrf.mxu0  ;;  %v637_v17 = vpop.f32.mrf.mxu1  ;;  %v723_v53 = vld [vmem:[%s1388_s12 + $0x28] sm:$0xff] (%p1254_p9)  ;;  %722 = vst [vmem:[%s1461_s26 + $0x80] sm:$0xff] (%p1254_p9), %v721_v52  ;;  %v727_v55 = vld [vmem:[%s1388_s12 + $0x38] sm:$0xff] (%p1254_p9)  ;;  %726 = vst [vmem:[%s1461_s26 + $0x90] sm:$0xff] (%p1254_p9), %v725_v54 }
 0x12c   : > { %669 = vst [vmem:[%s1388_s12 + $0x68] sm:$0xff] %v561_v14  ;;  %671 = vst [vmem:[%s1388_s12 + $0x78] sm:$0xff] %v634_v15  ;;  %v565_v18 = vadd.f32 %v564_v16, %v1376_v44  ;;  %v638_v19 = vadd.f32 %v637_v17, %v1378_v45 }
 0x12d   : > { %v566_v20 = vpop.f32.mrf.mxu0  ;;  %v639_v21 = vpop.f32.mrf.mxu1  ;;  %724 = vst [vmem:[%s1461_s26 + $0x88] sm:$0xff] (%p1254_p9), %v723_v53  ;;  %v729_v56 = vld [vmem:[%s1388_s12 + $0x40] sm:$0xff] (%p1254_p9)  ;;  %728 = vst [vmem:[%s1461_s26 + $0x98] sm:$0xff] (%p1254_p9), %v727_v55  ;;  %v733_v58 = vld [vmem:[%s1388_s12 + $0x50] sm:$0xff] (%p1254_p9) }
 0x12e   : > { %672 = vst [vmem:[%s1388_s12 + $0x80] sm:$0xff] %v565_v18  ;;  %674 = vst [vmem:[%s1388_s12 + $0x90] sm:$0xff] %v638_v19  ;;  %v567_v22 = vadd.f32 %v566_v20, %v1380_v46  ;;  %v640_v23 = vadd.f32 %v639_v21, %v1382_v47 }
 0x12f   : > { %v568_v24 = vpop.f32.mrf.mxu0  ;;  %v641_v25 = vpop.f32.mrf.mxu1  ;;  %730 = vst [vmem:[%s1461_s26 + $0x100] sm:$0xff] (%p1254_p9), %v729_v56  ;;  %v731_v57 = vld [vmem:[%s1388_s12 + $0x48] sm:$0xff] (%p1254_p9)  ;;  %v735_v59 = vld [vmem:[%s1388_s12 + $0x58] sm:$0xff] (%p1254_p9)  ;;  %734 = vst [vmem:[%s1461_s26 + $0x110] sm:$0xff] (%p1254_p9), %v733_v58 }
 0x130   : > { %673 = vst [vmem:[%s1388_s12 + $0x88] sm:$0xff] %v567_v22  ;;  %675 = vst [vmem:[%s1388_s12 + $0x98] sm:$0xff] %v640_v23  ;;  %v569_v26 = vadd.f32 %v568_v24, %v1376_v44  ;;  %v642_v27 = vadd.f32 %v641_v25, %v1378_v45 }
 0x131   : > { %v570_v28 = vpop.f32.mrf.mxu0  ;;  %v643_v29 = vpop.f32.mrf.mxu1  ;;  %732 = vst [vmem:[%s1461_s26 + $0x108] sm:$0xff] (%p1254_p9), %v731_v57  ;;  %736 = vst [vmem:[%s1461_s26 + $0x118] sm:$0xff] (%p1254_p9), %v735_v59  ;;  %v737_v60 = vld [vmem:[%s1388_s12 + $0x60] sm:$0xff] (%p1254_p9)  ;;  %v741_v62 = vld [vmem:[%s1388_s12 + $0x70] sm:$0xff] (%p1254_p9) }
 0x132   : > { %676 = vst [vmem:[%s1388_s12 + $0xa0] sm:$0xff] %v569_v26  ;;  %678 = vst [vmem:[%s1388_s12 + $0xb0] sm:$0xff] %v642_v27  ;;  %v571_v30 = vadd.f32 %v570_v28, %v1380_v46  ;;  %v644_v31 = vadd.f32 %v643_v29, %v1382_v47 }
 0x133   : > { %v574_v32 = vpop.f32.mrf.mxu0  ;;  %v647_v33 = vpop.f32.mrf.mxu1  ;;  %v739_v61 = vld [vmem:[%s1388_s12 + $0x68] sm:$0xff] (%p1254_p9)  ;;  %738 = vst [vmem:[%s1461_s26 + $0x180] sm:$0xff] (%p1254_p9), %v737_v60  ;;  %742 = vst [vmem:[%s1461_s26 + $0x190] sm:$0xff] (%p1254_p9), %v741_v62  ;;  %v743_v63 = vld [vmem:[%s1388_s12 + $0x78] sm:$0xff] (%p1254_p9) }
 0x134   : > { %677 = vst [vmem:[%s1388_s12 + $0xa8] sm:$0xff] %v571_v30  ;;  %679 = vst [vmem:[%s1388_s12 + $0xb8] sm:$0xff] %v644_v31  ;;  %v575_v34 = vadd.f32 %v574_v32, %v1376_v44  ;;  %v648_v35 = vadd.f32 %v647_v33, %v1378_v45 }
 0x135   : > { %v576_v36 = vpop.f32.mrf.mxu0  ;;  %v649_v37 = vpop.f32.mrf.mxu1  ;;  %740 = vst [vmem:[%s1461_s26 + $0x188] sm:$0xff] (%p1254_p9), %v739_v61  ;;  %v745_v0 = vld [vmem:[%s1388_s12 + $0x80] sm:$0xff] (%p1254_p9)  ;;  %744 = vst [vmem:[%s1461_s26 + $0x198] sm:$0xff] (%p1254_p9), %v743_v63  ;;  %v749_v2 = vld [vmem:[%s1388_s12 + $0x90] sm:$0xff] (%p1254_p9) }
 0x136   : > { %680 = vst [vmem:[%s1388_s12 + $0xc0] sm:$0xff] %v575_v34  ;;  %682 = vst [vmem:[%s1388_s12 + $0xd0] sm:$0xff] %v648_v35  ;;  %v577_v38 = vadd.f32 %v576_v36, %v1380_v46  ;;  %v650_v39 = vadd.f32 %v649_v37, %v1382_v47 }
 0x137   : > { %v578_v40 = vpop.f32.mrf.mxu0  ;;  %v651_v41 = vpop.f32.mrf.mxu1  ;;  %v747_v1 = vld [vmem:[%s1388_s12 + $0x88] sm:$0xff] (%p1254_p9)  ;;  %746 = vst [vmem:[%s1461_s26 + $0x200] sm:$0xff] (%p1254_p9), %v745_v0  ;;  %v751_v3 = vld [vmem:[%s1388_s12 + $0x98] sm:$0xff] (%p1254_p9)  ;;  %750 = vst [vmem:[%s1461_s26 + $0x210] sm:$0xff] (%p1254_p9), %v749_v2 }
 0x138   : > { %681 = vst [vmem:[%s1388_s12 + $0xc8] sm:$0xff] %v577_v38  ;;  %683 = vst [vmem:[%s1388_s12 + $0xd8] sm:$0xff] %v650_v39  ;;  %v579_v42 = vadd.f32 %v578_v40, %v1376_v44  ;;  %v652_v43 = vadd.f32 %v651_v41, %v1378_v45  ;;  %694 = sbr.rel (!%p1254_p9) target bundleno = 325 (0x145), region = 44  ;;  %v713_v44 = vld [vmem:[%s1388_s12] sm:$0xff] (%p1254_p9)  ;;  %v715_v45 = vld [vmem:[%s1388_s12 + $0x8] sm:$0xff] (%p1254_p9) }
 0x139   : > { %v580_v48 = vpop.f32.mrf.mxu0  ;;  %v653_v49 = vpop.f32.mrf.mxu1  ;;  %714 = vst [vmem:[%s1461_s26] sm:$0xff] (%p1254_p9), %v713_v44  ;;  %716 = vst [vmem:[%s1461_s26 + $0x8] sm:$0xff] (%p1254_p9), %v715_v45  ;;  %v753_v4 = vld [vmem:[%s1388_s12 + $0xa0] sm:$0xff] (%p1254_p9)  ;;  %v757_v6 = vld [vmem:[%s1388_s12 + $0xb0] sm:$0xff] (%p1254_p9) }
 0x13a   : > { %684 = vst [vmem:[%s1388_s12 + $0xe0] sm:$0xff] %v579_v42  ;;  %686 = vst [vmem:[%s1388_s12 + $0xf0] sm:$0xff] %v652_v43  ;;  %v581_v50 = vadd.f32 %v580_v48, %v1380_v46  ;;  %v654_v51 = vadd.f32 %v653_v49, %v1382_v47  ;;  %v717_v46 = vld [vmem:[%s1388_s12 + $0x10] sm:$0xff] (%p1254_p9)  ;;  %v719_v47 = vld [vmem:[%s1388_s12 + $0x18] sm:$0xff] (%p1254_p9) }
 0x13b   : > { %718 = vst [vmem:[%s1461_s26 + $0x10] sm:$0xff] (%p1254_p9), %v717_v46  ;;  %720 = vst [vmem:[%s1461_s26 + $0x18] sm:$0xff] (%p1254_p9), %v719_v47  ;;  %v755_v5 = vld [vmem:[%s1388_s12 + $0xa8] sm:$0xff] (%p1254_p9)  ;;  %v759_v7 = vld [vmem:[%s1388_s12 + $0xb8] sm:$0xff] (%p1254_p9) }
 0x13c   : > { %685 = vst [vmem:[%s1388_s12 + $0xe8] sm:$0xff] %v581_v50  ;;  %687 = vst [vmem:[%s1388_s12 + $0xf8] sm:$0xff] %v654_v51 }
 0x13d   : > { %748 = vst [vmem:[%s1461_s26 + $0x208] sm:$0xff] %v747_v1  ;;  %752 = vst [vmem:[%s1461_s26 + $0x218] sm:$0xff] %v751_v3  ;;  %v761_v8 = vld [vmem:[%s1388_s12 + $0xc0] sm:$0xff]  ;;  %v765_v10 = vld [vmem:[%s1388_s12 + $0xd0] sm:$0xff] }
 0x13e   : > { %754 = vst [vmem:[%s1461_s26 + $0x280] sm:$0xff] %v753_v4  ;;  %756 = vst [vmem:[%s1461_s26 + $0x288] sm:$0xff] %v755_v5 }
 0x13f   : > { %758 = vst [vmem:[%s1461_s26 + $0x290] sm:$0xff] %v757_v6  ;;  %760 = vst [vmem:[%s1461_s26 + $0x298] sm:$0xff] %v759_v7  ;;  %v763_v9 = vld [vmem:[%s1388_s12 + $0xc8] sm:$0xff]  ;;  %v767_v11 = vld [vmem:[%s1388_s12 + $0xd8] sm:$0xff] }
 0x140   : > { %762 = vst [vmem:[%s1461_s26 + $0x300] sm:$0xff] %v761_v8  ;;  %764 = vst [vmem:[%s1461_s26 + $0x308] sm:$0xff] %v763_v9 }
 0x141   : > { %766 = vst [vmem:[%s1461_s26 + $0x310] sm:$0xff] %v765_v10  ;;  %v769_v12 = vld [vmem:[%s1388_s12 + $0xe0] sm:$0xff]  ;;  %768 = vst [vmem:[%s1461_s26 + $0x318] sm:$0xff] %v767_v11  ;;  %v773_v14 = vld [vmem:[%s1388_s12 + $0xf0] sm:$0xff] }
 0x142   : > { %770 = vst [vmem:[%s1461_s26 + $0x380] sm:$0xff] %v769_v12  ;;  %774 = vst [vmem:[%s1461_s26 + $0x390] sm:$0xff] %v773_v14 }
 0x143   : > { %v771_v13 = vld [vmem:[%s1388_s12 + $0xe8] sm:$0xff]  ;;  %v775_v15 = vld [vmem:[%s1388_s12 + $0xf8] sm:$0xff] }
 0x144   : > { %772 = vst [vmem:[%s1461_s26 + $0x388] sm:$0xff] %v771_v13  ;;  %776 = vst [vmem:[%s1461_s26 + $0x398] sm:$0xff] %v775_v15 }
 0x145 PF: > { %s19_s17 = sadd.s32 1, %s1176_s17   ;;  %s1551_s12 = smov %s1160_s13 }
 0x146   : > { %p16_p8 = scmp.ge.s32.totalorder %s19_s17, 6   ;;  %s1552_s13 = smov %s1164_s14 }
 0x147   : > { %s1553_s14 = smov %s1252_s24  ;;  %s1554_s15 = smov %s1172_s16 }
 0x148   : > { %s1555_s16 = smov %s1557_s19  ;;  %18 = sbr.rel (!%p16_p8) target bundleno = 6 (0x6), region = 111 }
 0x14d   :  { %792 = vsyncpa [#allocation3], 1 }
 0x14e   :  { %794 = vsyncpa [#allocation3 + $0x1], 1 }
 0x14f   :  { %795 = vsyncpa [#allocation5], 1 }
 0x150   :  { %797 = vsyncpa [#allocation5 + $0x1], 1 }

// kernel: lm_forward.4
= control target key start
LH: loop header
LB: loop body
LE: loop exit
PB: predicated region body
PF: predicated region fallthrough
CT: control target
= control target key end

     0   :  { %9 = vsyncpa [#allocation5], 0  ;;  %s5632_s0 = inlined_call_operand.vmem [shape: f32[8,8,2048], index: 0, kind: input, shape index: {}]   ;;  %s5633_s1 = inlined_call_operand.hbm [shape: bf16[512,2048], index: 1, kind: input, shape index: {}]   ;;  %s5634_s2 = inlined_call_operand.hbm [shape: bf16[512,128], index: 2, kind: input, shape index: {}]   ;;  %s5635_s3 = inlined_call_operand.hbm [shape: f32[1,128], index: 3, kind: input, shape index: {}]   ;;  %s5636_s4 = inlined_call_operand.vmem [shape: f32[8,8,128], index: 4, kind: output, shape index: {}]  }
   0x1   :  { %10 = vsyncpa [#allocation7], 0  ;;  %s5443_s15 = smov 0  }
   0x2 LB: > { %s5449_s16 = sadd.s32 4294967295, %s5409_s15   ;;  %p4561_p0 = scmp.ge.s32.totalorder %s5409_s15, 1  ;;  %s5409_s15 = sphi %s5443_s15, %s16_s15  }
   0x3   : > { %p136_p1 = scmp.lt.s32.totalorder %s5409_s15, 9  ;;  %p4562_p2 = scmp.ne.s32.totalorder %s5449_s16, 0 }
   0x4   : > { %s5411_s17 = smov [#allocation6]   ;;  %p5200_p4 = scmp.eq.s32.totalorder %s5449_s16, 0 }
   0x5   : > { %s161_s18 = sshll.u32 %s5411_s17, 4  ;;  %p5454_p3 = pnand %p4561_p0, %p136_p1  ;;  %s162_s18 = int_to_ptr.vmem [resolvable:$true] %s161_s18 }
   0x6   : > { %s5412_s20 = smov [#allocation4]   ;;  %s5413_s23 = smov [#allocation8]  }
   0x7   : > { %p5190_p5 = pneg %p5454_p3  ;;  %s148_s21 = sshll.u32 %s5412_s20, 4  ;;  %s5461_s21 = int_to_ptr.vmem [resolvable:$true] %s148_s21 }
   0x8   : > { %s175_s24 = sshll.u32 %s5413_s23, 4  ;;  %s5328_s25 = scalar_lea.vmem %s162_s18, 4096  ;;  %s5469_s24 = int_to_ptr.vmem [resolvable:$true] %s175_s24 }
   0x9   : > { %p5465_p6 = pnand %p5200_p4, %p5190_p5  ;;  %p5329_p8 = scmp.ne.s32.totalorder %s162_s18, %s5328_s25 }
   0xa   : > { %p5336_p11 = scmp.lt.s32.totalorder %s162_s18, %s162_s18  ;;  %p5337_p12 = scmp.lt.s32.totalorder %s5328_s25, %s5328_s25 }
   0xb   : > { %p5319_p7 = pneg %p5465_p6 }
   0xc   : > { %p5338_p13 = por %p5337_p12, %p5336_p11 }
   0xd   : > { %p5331_p9 = pnand %p5329_p8, %p5319_p7 }
   0xf   : > { %p5332_p10 = pneg %p5331_p9 }
  0x11   : > { %p5339_p0 = pnand %p5338_p13, %p5332_p10 }
  0x13   : > { %5342 = shalt.err (!%p5339_p0)
}
  0x14   : > { %s5414_s26 = smov 64   ;;  %s5415_s27 = smov 4  }
  0x15   : > { %5196 = dma.hbm_to_vmem [thread:$0]  (!%p5465_p6), %s5634_s2, 4096, %s162_s18, [#allocation7], %s5414_s26, %s5414_s26, %s5415_s27  }
  0x16   : > { %s5354_s30 = scalar_lea.vmem %s5461_s21, 65536  ;;  %p5362_p9 = scmp.lt.s32.totalorder %s5461_s21, %s5461_s21 }
  0x17   : > { %p5355_p1 = scmp.ne.s32.totalorder %s5461_s21, %s5354_s30  ;;  %p5363_p10 = scmp.lt.s32.totalorder %s5354_s30, %s5354_s30 }
  0x19   : > { %p5357_p5 = pnand %p5355_p1, %p5319_p7  ;;  %p5364_p11 = por %p5363_p10, %p5362_p9 }
  0x1b   : > { %p5358_p8 = pneg %p5357_p5 }
  0x1d   : > { %p5365_p12 = pnand %p5364_p11, %p5358_p8 }
  0x1f   : > { %5368 = shalt.err (!%p5365_p12)
}
  0x20   : > { %s5416_s5 = smov 1024   ;;  %s5380_s8 = scalar_lea.vmem %s5469_s24, 16 }
  0x21   : > { %5193 = dma.hbm_to_vmem [thread:$0]  (!%p5465_p6), %s5633_s1, 65536, %s5461_s21, [#allocation5], %s5416_s5, %s5416_s5, %s5414_s26  }
  0x22   : > { %p5381_p13 = scmp.ne.s32.totalorder %s5469_s24, %s5380_s8  ;;  %s5387_s9 = scalar_lea.vmem %s5469_s24, 32 }
  0x23   : > { %p5388_p5 = scmp.lt.s32.totalorder %s5469_s24, %s5469_s24  ;;  %p5389_p8 = scmp.lt.s32.totalorder %s5387_s9, %s5380_s8 }
  0x24   : > { %p5383_p0 = pnand %p5381_p13, %p5319_p7 }
  0x25   : > { %p5390_p9 = por %p5389_p8, %p5388_p5 }
  0x26   : > { %p5384_p1 = pneg %p5383_p0 }
  0x28   : > { %p5391_p10 = pnand %p5390_p9, %p5384_p1 }
  0x2a   : > { %5394 = shalt.err (!%p5391_p10)
}
  0x2b   : > { %5199 = dma.hbm_to_vmem [thread:$0]  (!%p5465_p6), %s5635_s3, 16, %s5469_s24, [#allocation7]  }
  0x2c   : > { %196 = sbr.rel (%p5454_p3) target bundleno = 1018 (0x3fa), region = 36 }
  0x31   : > { %5400 = dma.done.wait (%p5200_p4), [#allocation5], 65536  }
  0x32   : > { %5402 = vsyncadd (%p5200_p4), [#allocation5], 4294901760 }
  0x33   : > { %5404 = dma.done.wait (%p5200_p4), [#allocation7], 4112  }
  0x34   : > { %5406 = vsyncadd (%p5200_p4), [#allocation7], 4294963184  ;;  %p229_p7 = scmp.lt.s32.totalorder %s5449_s16, 7 }
  0x35   : > { %242 = sbr.rel (%p4562_p2) target bundleno = 63 (0x3f), region = 52 }
  0x36   : > { %s230_s12 = scalar_select %p229_p7, %s5449_s16, 7 }
  0x38   : > { %s5133_s13 = sshll.u32 %s230_s12, 7  ;;  %s4572_s14 = sshll.u32 %s230_s12, 3 }
  0x39   : > { %s5523_s19 = scalar_lea.vmem %s5632_s0, %s5133_s13  ;;  %s5528_s22 = scalar_lea.vmem %s5636_s4, %s4572_s14 }
  0x3a   : > { %v5417_v0 = vmov 0.0  }
  0x3b   : > { %243 = vst [vmem:[#allocation2 + $0x10] sm:$0xff] %v5417_v0  ;;  %244 = vst [vmem:[#allocation2] sm:$0xff] %v5417_v0 }
  0x3c   : > { %245 = vst [vmem:[#allocation2 + $0x18] sm:$0xff] %v5417_v0  ;;  %246 = vst [vmem:[#allocation2 + $0x8] sm:$0xff] %v5417_v0 }
  0x3d   : > { %247 = vst [vmem:[#allocation3] sm:$0xff] %v5417_v0  ;;  %248 = vst [vmem:[#allocation3 + $0x18] sm:$0xff] %v5417_v0 }
  0x3e   : > { %249 = vst [vmem:[#allocation3 + $0x8] sm:$0xff] %v5417_v0  ;;  %250 = vst [vmem:[#allocation3 + $0x10] sm:$0xff] %v5417_v0 }
  0x3f PF: > { %v391_v1 = vld [vmem:[#allocation4 + $0x380] sm:$0xff] }
  0x40   : > { %v399_v2 = vld [vmem:[#allocation4 + $0x3c0] sm:$0xff] }
  0x41   : > { %v647_v3 = vld [vmem:[#allocation4 + $0xb80] sm:$0xff]  ;;  %v4687_v4 = vcombine.high %v391_v1, %v399_v2  ;;  %v4686_v6 = vcombine.low %v391_v1, %v399_v2 }
  0x42   : > { %v655_v5 = vld [vmem:[#allocation4 + $0xbc0] sm:$0xff] }
  0x43   : > { %v375_v7 = vld [vmem:[#allocation4 + $0x300] sm:$0xff]  ;;  %v4943_v9 = vcombine.high %v647_v3, %v655_v5  ;;  %v4942_v10 = vcombine.low %v647_v3, %v655_v5  ;;  %3351 = vmatprep.subr.bf16.mxu0 %v4687_v4  ;;  %v254_v55 = vld [vmem:[#allocation2 + $0x8] sm:$0xff] }
  0x44   : > { %v383_v8 = vld [vmem:[#allocation4 + $0x340] sm:$0xff]  ;;  %3352 = vmatpush1.bf16.msra.mxu0 %v4686_v6  ;;  %v5534_v60 = vpack.c.bf16 %v254_v55, %v254_v55 }
  0x45   : > { %v4671_v11 = vcombine.high %v375_v7, %v383_v8  ;;  %v631_v12 = vld [vmem:[#allocation4 + $0xb00] sm:$0xff]  ;;  %3392 = vmatprep.subr.bf16.mxu1 %v4943_v9  ;;  %v4670_v19 = vcombine.low %v375_v7, %v383_v8 }
  0x46   : > { %v639_v13 = vld [vmem:[#allocation4 + $0xb40] sm:$0xff]  ;;  %3393 = vmatpush1.bf16.msra.mxu1 %v4942_v10  ;;  %3424 = vmatprep.mubr.bf16.mxu1 %v5534_v60 }
  0x47   : > { %v359_v14 = vld [vmem:[#allocation4 + $0x280] sm:$0xff]  ;;  %v4927_v15 = vcombine.high %v631_v12, %v639_v13  ;;  %3353 = vmatprep.subr.bf16.mxu0 %v4671_v11  ;;  %v4926_v20 = vcombine.low %v631_v12, %v639_v13 }
  0x48   : > { %v367_v16 = vld [vmem:[#allocation4 + $0x2c0] sm:$0xff]  ;;  %3354 = vmatpush1.bf16.msra.mxu0 %v4670_v19 }
  0x49   : > { %v615_v17 = vld [vmem:[#allocation4 + $0xa80] sm:$0xff]  ;;  %v4655_v21 = vcombine.high %v359_v14, %v367_v16  ;;  %3394 = vmatprep.subr.bf16.mxu1 %v4927_v15  ;;  %v4654_v27 = vcombine.low %v359_v14, %v367_v16 }
  0x4a   : > { %v623_v18 = vld [vmem:[#allocation4 + $0xac0] sm:$0xff]  ;;  %3395 = vmatpush1.bf16.msra.mxu1 %v4926_v20 }
  0x4b   : > { %v4911_v22 = vcombine.high %v615_v17, %v623_v18  ;;  %v343_v23 = vld [vmem:[#allocation4 + $0x200] sm:$0xff]  ;;  %3355 = vmatprep.subr.bf16.mxu0 %v4655_v21  ;;  %v4910_v28 = vcombine.low %v615_v17, %v623_v18 }
  0x4c   : > { %v351_v24 = vld [vmem:[#allocation4 + $0x240] sm:$0xff]  ;;  %3356 = vmatpush1.bf16.msra.mxu0 %v4654_v27 }
  0x4d   : > { %v599_v25 = vld [vmem:[#allocation4 + $0xa00] sm:$0xff]  ;;  %v4639_v29 = vcombine.high %v343_v23, %v351_v24  ;;  %3396 = vmatprep.subr.bf16.mxu1 %v4911_v22  ;;  %v4638_v35 = vcombine.low %v343_v23, %v351_v24 }
  0x4e   : > { %v607_v26 = vld [vmem:[#allocation4 + $0xa40] sm:$0xff]  ;;  %3397 = vmatpush1.bf16.msra.mxu1 %v4910_v28 }
  0x4f   : > { %v4895_v30 = vcombine.high %v599_v25, %v607_v26  ;;  %v327_v31 = vld [vmem:[#allocation4 + $0x180] sm:$0xff]  ;;  %3357 = vmatprep.subr.bf16.mxu0 %v4639_v29  ;;  %v4894_v36 = vcombine.low %v599_v25, %v607_v26 }
  0x50   : > { %v335_v32 = vld [vmem:[#allocation4 + $0x1c0] sm:$0xff]  ;;  %3358 = vmatpush1.bf16.msra.mxu0 %v4638_v35 }
  0x51   : > { %v583_v33 = vld [vmem:[#allocation4 + $0x980] sm:$0xff]  ;;  %v4623_v37 = vcombine.high %v327_v31, %v335_v32  ;;  %3398 = vmatprep.subr.bf16.mxu1 %v4895_v30  ;;  %v4622_v43 = vcombine.low %v327_v31, %v335_v32 }
  0x52   : > { %v591_v34 = vld [vmem:[#allocation4 + $0x9c0] sm:$0xff]  ;;  %3399 = vmatpush1.bf16.msra.mxu1 %v4894_v36 }
  0x53   : > { %v4879_v38 = vcombine.high %v583_v33, %v591_v34  ;;  %v311_v39 = vld [vmem:[#allocation4 + $0x100] sm:$0xff]  ;;  %3359 = vmatprep.subr.bf16.mxu0 %v4623_v37  ;;  %v4878_v44 = vcombine.low %v583_v33, %v591_v34 }
  0x54   : > { %v319_v40 = vld [vmem:[#allocation4 + $0x140] sm:$0xff]  ;;  %3360 = vmatpush1.bf16.msra.mxu0 %v4622_v43 }
  0x55   : > { %v567_v41 = vld [vmem:[#allocation4 + $0x900] sm:$0xff]  ;;  %v4607_v45 = vcombine.high %v311_v39, %v319_v40  ;;  %3400 = vmatprep.subr.bf16.mxu1 %v4879_v38  ;;  %v4606_v51 = vcombine.low %v311_v39, %v319_v40 }
  0x56   : > { %v575_v42 = vld [vmem:[#allocation4 + $0x940] sm:$0xff]  ;;  %3401 = vmatpush1.bf16.msra.mxu1 %v4878_v44 }
  0x57   : > { %v4863_v46 = vcombine.high %v567_v41, %v575_v42  ;;  %v295_v47 = vld [vmem:[#allocation4 + $0x80] sm:$0xff]  ;;  %3361 = vmatprep.subr.bf16.mxu0 %v4607_v45  ;;  %v4862_v52 = vcombine.low %v567_v41, %v575_v42 }
  0x58   : > { %v303_v48 = vld [vmem:[#allocation4 + $0xc0] sm:$0xff]  ;;  %3362 = vmatpush1.bf16.msra.mxu0 %v4606_v51 }
  0x59   : > { %v551_v49 = vld [vmem:[#allocation4 + $0x880] sm:$0xff]  ;;  %v4591_v53 = vcombine.high %v295_v47, %v303_v48  ;;  %3402 = vmatprep.subr.bf16.mxu1 %v4863_v46  ;;  %v4590_v63 = vcombine.low %v295_v47, %v303_v48 }
  0x5a   : > { %v559_v50 = vld [vmem:[#allocation4 + $0x8c0] sm:$0xff]  ;;  %3403 = vmatpush1.bf16.msra.mxu1 %v4862_v52 }
  0x5b   : > { %v252_v54 = vld [vmem:[#allocation2] sm:$0xff]  ;;  %v4847_v56 = vcombine.high %v551_v49, %v559_v50  ;;  %3363 = vmatprep.subr.bf16.mxu0 %v4591_v53  ;;  %v4846_v0 = vcombine.low %v551_v49, %v559_v50 }
  0x5c   : > { %v279_v57 = vld [vmem:[#allocation4] sm:$0xff]  ;;  %v5532_v59 = vpack.c.bf16 %v252_v54, %v252_v54  ;;  %3364 = vmatpush1.bf16.msra.mxu0 %v4590_v63 }
  0x5d   : > { %v287_v58 = vld [vmem:[#allocation4 + $0x40] sm:$0xff]  ;;  %3404 = vmatprep.subr.bf16.mxu1 %v4847_v56 }
  0x5e   : > { %v535_v61 = vld [vmem:[#allocation4 + $0x800] sm:$0xff]  ;;  %3383 = vmatprep.mubr.bf16.mxu0 %v5532_v59  ;;  %v4575_v1 = vcombine.high %v279_v57, %v287_v58  ;;  %v4574_v7 = vcombine.low %v279_v57, %v287_v58  ;;  %3405 = vmatpush1.bf16.msra.mxu1 %v4846_v0 }
  0x5f   : > { %v543_v62 = vld [vmem:[#allocation4 + $0x840] sm:$0xff] }
  0x60   : > { %v4831_v2 = vcombine.high %v535_v61, %v543_v62  ;;  %v519_v3 = vld [vmem:[#allocation4 + $0x780] sm:$0xff]  ;;  %3365 = vmatprep.subr.bf16.mxu0 %v4575_v1  ;;  %v4830_v8 = vcombine.low %v535_v61, %v543_v62 }
  0x61   : > { %v527_v4 = vld [vmem:[#allocation4 + $0x7c0] sm:$0xff]  ;;  %3366 = vmatpush1.bf16.msra.mxu0 %v4574_v7  ;;  %v648_v7 = vld [vmem:[#allocation4 + $0xb88] sm:$0xff] }
  0x62   : > { %v775_v5 = vld [vmem:[#allocation4 + $0xf80] sm:$0xff]  ;;  %v4815_v9 = vcombine.high %v519_v3, %v527_v4  ;;  %3406 = vmatprep.subr.bf16.mxu1 %v4831_v2  ;;  %v4814_v15 = vcombine.low %v519_v3, %v527_v4 }
  0x63   : > { %v783_v6 = vld [vmem:[#allocation4 + $0xfc0] sm:$0xff]  ;;  %3407 = vmatpush1.bf16.msra.mxu1 %v4830_v8  ;;  %v656_v8 = vld [vmem:[#allocation4 + $0xbc8] sm:$0xff] }
  0x64   : > { %v5071_v10 = vcombine.high %v775_v5, %v783_v6  ;;  %v503_v11 = vld [vmem:[#allocation4 + $0x700] sm:$0xff]  ;;  %3367 = vmatprep.subr.bf16.mxu0 %v4815_v9  ;;  %v5070_v16 = vcombine.low %v775_v5, %v783_v6  ;;  %v392_v5 = vld [vmem:[#allocation4 + $0x388] sm:$0xff] }
  0x65   : > { %v511_v12 = vld [vmem:[#allocation4 + $0x740] sm:$0xff]  ;;  %3368 = vmatpush2.bf16.msra.mxu0 %v4814_v15  ;;  %v400_v6 = vld [vmem:[#allocation4 + $0x3c8] sm:$0xff] }
  0x66   : > { %v759_v13 = vld [vmem:[#allocation4 + $0xf00] sm:$0xff]  ;;  %v4799_v17 = vcombine.high %v503_v11, %v511_v12  ;;  %3408 = vmatprep.subr.bf16.mxu1 %v5071_v10  ;;  %v4798_v23 = vcombine.low %v503_v11, %v511_v12  ;;  %v251_v10 = vld [vmem:[#allocation2 + $0x10] sm:$0xff]  ;;  %v253_v12 = vld [vmem:[#allocation2 + $0x18] sm:$0xff] }
  0x67   : > { %v767_v14 = vld [vmem:[#allocation4 + $0xf40] sm:$0xff]  ;;  %3409 = vmatpush2.bf16.msra.mxu1 %v5070_v16  ;;  %v376_v15 = vld [vmem:[#allocation4 + $0x308] sm:$0xff] }
  0x68   : > { %v5055_v18 = vcombine.high %v759_v13, %v767_v14  ;;  %v487_v19 = vld [vmem:[#allocation4 + $0x680] sm:$0xff]  ;;  %3369 = vmatprep.subr.bf16.mxu0 %v4799_v17  ;;  %v5054_v24 = vcombine.low %v759_v13, %v767_v14  ;;  %v4689_v13 = vcombine.high %v392_v5, %v400_v6  ;;  %v4945_v14 = vcombine.high %v648_v7, %v656_v8  ;;  %v384_v16 = vld [vmem:[#allocation4 + $0x348] sm:$0xff] }
  0x69   : > { %v495_v20 = vld [vmem:[#allocation4 + $0x6c0] sm:$0xff]  ;;  %3370 = vmatpush2.bf16.msra.mxu0 %v4798_v23  ;;  %v5538_v17 = vpack.c.bf16 %v251_v10, %v251_v10  ;;  %v4673_v23 = vcombine.high %v376_v15, %v384_v16  ;;  %v520_v10 = vld [vmem:[#allocation4 + $0x788] sm:$0xff] }
  0x6a   : > { %v743_v21 = vld [vmem:[#allocation4 + $0xe80] sm:$0xff]  ;;  %v4783_v25 = vcombine.high %v487_v19, %v495_v20  ;;  %3410 = vmatprep.subr.bf16.mxu1 %v5055_v18  ;;  %v4782_v31 = vcombine.low %v487_v19, %v495_v20  ;;  %v632_v18 = vld [vmem:[#allocation4 + $0xb08] sm:$0xff]  ;;  %v5540_v20 = vpack.c.bf16 %v253_v12, %v253_v12 }
  0x6b   : > { %v751_v22 = vld [vmem:[#allocation4 + $0xec0] sm:$0xff]  ;;  %3411 = vmatpush2.bf16.msra.mxu1 %v5054_v24  ;;  %v640_v19 = vld [vmem:[#allocation4 + $0xb48] sm:$0xff] }
  0x6c   : > { %v5039_v26 = vcombine.high %v743_v21, %v751_v22  ;;  %v471_v27 = vld [vmem:[#allocation4 + $0x600] sm:$0xff]  ;;  %3371 = vmatprep.subr.bf16.mxu0 %v4783_v25  ;;  %v5038_v32 = vcombine.low %v743_v21, %v751_v22  ;;  %v4688_v21 = vcombine.low %v392_v5, %v400_v6  ;;  %v4944_v22 = vcombine.low %v648_v7, %v656_v8  ;;  %v360_v24 = vld [vmem:[#allocation4 + $0x288] sm:$0xff] }
  0x6d   : > { %v479_v28 = vld [vmem:[#allocation4 + $0x640] sm:$0xff]  ;;  %3372 = vmatpush2.bf16.msra.mxu0 %v4782_v31  ;;  %v368_v25 = vld [vmem:[#allocation4 + $0x2c8] sm:$0xff] }
  0x6e   : > { %v727_v29 = vld [vmem:[#allocation4 + $0xe00] sm:$0xff]  ;;  %v4767_v33 = vcombine.high %v471_v27, %v479_v28  ;;  %3412 = vmatprep.subr.bf16.mxu1 %v5039_v26  ;;  %v4766_v39 = vcombine.low %v471_v27, %v479_v28  ;;  %v4929_v26 = vcombine.high %v632_v18, %v640_v19  ;;  %v616_v27 = vld [vmem:[#allocation4 + $0xa88] sm:$0xff]  ;;  %v4657_v31 = vcombine.high %v360_v24, %v368_v25 }
  0x6f   : > { %v735_v30 = vld [vmem:[#allocation4 + $0xe40] sm:$0xff]  ;;  %3413 = vmatpush2.bf16.msra.mxu1 %v5038_v32  ;;  %v624_v28 = vld [vmem:[#allocation4 + $0xac8] sm:$0xff] }
  0x70   : > { %v5023_v34 = vcombine.high %v727_v29, %v735_v30  ;;  %v455_v35 = vld [vmem:[#allocation4 + $0x580] sm:$0xff]  ;;  %3373 = vmatprep.subr.bf16.mxu0 %v4767_v33  ;;  %v5022_v40 = vcombine.low %v727_v29, %v735_v30  ;;  %v4672_v29 = vcombine.low %v376_v15, %v384_v16  ;;  %v4928_v30 = vcombine.low %v632_v18, %v640_v19  ;;  %v344_v32 = vld [vmem:[#allocation4 + $0x208] sm:$0xff] }
  0x71   : > { %v463_v36 = vld [vmem:[#allocation4 + $0x5c0] sm:$0xff]  ;;  %3374 = vmatpush2.bf16.msra.mxu0 %v4766_v39  ;;  %v352_v33 = vld [vmem:[#allocation4 + $0x248] sm:$0xff] }
  0x72   : > { %v711_v37 = vld [vmem:[#allocation4 + $0xd80] sm:$0xff]  ;;  %v4751_v41 = vcombine.high %v455_v35, %v463_v36  ;;  %3414 = vmatprep.subr.bf16.mxu1 %v5023_v34  ;;  %v4750_v47 = vcombine.low %v455_v35, %v463_v36  ;;  %v600_v34 = vld [vmem:[#allocation4 + $0xa08] sm:$0xff]  ;;  %v4913_v35 = vcombine.high %v616_v27, %v624_v28  ;;  %v4641_v39 = vcombine.high %v344_v32, %v352_v33 }
  0x73   : > { %v719_v38 = vld [vmem:[#allocation4 + $0xdc0] sm:$0xff]  ;;  %3415 = vmatpush2.bf16.msra.mxu1 %v5022_v40  ;;  %v608_v36 = vld [vmem:[#allocation4 + $0xa48] sm:$0xff] }
  0x74   : > { %v5007_v42 = vcombine.high %v711_v37, %v719_v38  ;;  %v439_v43 = vld [vmem:[#allocation4 + $0x500] sm:$0xff]  ;;  %3375 = vmatprep.subr.bf16.mxu0 %v4751_v41  ;;  %v5006_v48 = vcombine.low %v711_v37, %v719_v38  ;;  %v4656_v37 = vcombine.low %v360_v24, %v368_v25  ;;  %v4912_v38 = vcombine.low %v616_v27, %v624_v28  ;;  %v328_v40 = vld [vmem:[#allocation4 + $0x188] sm:$0xff] }
  0x75   : > { %v447_v44 = vld [vmem:[#allocation4 + $0x540] sm:$0xff]  ;;  %3376 = vmatpush2.bf16.msra.mxu0 %v4750_v47  ;;  %v336_v41 = vld [vmem:[#allocation4 + $0x1c8] sm:$0xff] }
  0x76   : > { %v695_v45 = vld [vmem:[#allocation4 + $0xd00] sm:$0xff]  ;;  %v4735_v49 = vcombine.high %v439_v43, %v447_v44  ;;  %3416 = vmatprep.subr.bf16.mxu1 %v5007_v42  ;;  %v4734_v55 = vcombine.low %v439_v43, %v447_v44  ;;  %v584_v42 = vld [vmem:[#allocation4 + $0x988] sm:$0xff]  ;;  %v4897_v43 = vcombine.high %v600_v34, %v608_v36  ;;  %v4625_v47 = vcombine.high %v328_v40, %v336_v41 }
  0x77   : > { %v703_v46 = vld [vmem:[#allocation4 + $0xd40] sm:$0xff]  ;;  %3417 = vmatpush2.bf16.msra.mxu1 %v5006_v48  ;;  %v592_v44 = vld [vmem:[#allocation4 + $0x9c8] sm:$0xff] }
  0x78   : > { %v4991_v50 = vcombine.high %v695_v45, %v703_v46  ;;  %v423_v51 = vld [vmem:[#allocation4 + $0x480] sm:$0xff]  ;;  %3377 = vmatprep.subr.bf16.mxu0 %v4735_v49  ;;  %v4990_v56 = vcombine.low %v695_v45, %v703_v46  ;;  %v4640_v45 = vcombine.low %v344_v32, %v352_v33  ;;  %v4896_v46 = vcombine.low %v600_v34, %v608_v36  ;;  %v312_v48 = vld [vmem:[#allocation4 + $0x108] sm:$0xff] }
  0x79   : > { %v431_v52 = vld [vmem:[#allocation4 + $0x4c0] sm:$0xff]  ;;  %3378 = vmatpush2.bf16.msra.mxu0 %v4734_v55  ;;  %v320_v49 = vld [vmem:[#allocation4 + $0x148] sm:$0xff] }
  0x7a   : > { %v679_v53 = vld [vmem:[#allocation4 + $0xc80] sm:$0xff]  ;;  %v4719_v57 = vcombine.high %v423_v51, %v431_v52  ;;  %3418 = vmatprep.subr.bf16.mxu1 %v4991_v50  ;;  %v4718_v1 = vcombine.low %v423_v51, %v431_v52  ;;  %v568_v50 = vld [vmem:[#allocation4 + $0x908] sm:$0xff]  ;;  %v4881_v51 = vcombine.high %v584_v42, %v592_v44  ;;  %v4609_v55 = vcombine.high %v312_v48, %v320_v49 }
  0x7b   : > { %v687_v54 = vld [vmem:[#allocation4 + $0xcc0] sm:$0xff]  ;;  %3419 = vmatpush2.bf16.msra.mxu1 %v4990_v56  ;;  %v576_v52 = vld [vmem:[#allocation4 + $0x948] sm:$0xff] }
  0x7c   : > { %v4975_v58 = vcombine.high %v679_v53, %v687_v54  ;;  %v407_v61 = vld [vmem:[#allocation4 + $0x400] sm:$0xff]  ;;  %3379 = vmatprep.subr.bf16.mxu0 %v4719_v57  ;;  %v4974_v2 = vcombine.low %v679_v53, %v687_v54  ;;  %v4624_v53 = vcombine.low %v328_v40, %v336_v41  ;;  %v4880_v54 = vcombine.low %v584_v42, %v592_v44  ;;  %v296_v56 = vld [vmem:[#allocation4 + $0x88] sm:$0xff] }
  0x7d   : > { %v415_v62 = vld [vmem:[#allocation4 + $0x440] sm:$0xff]  ;;  %3380 = vmatpush2.bf16.msra.mxu0 %v4718_v1  ;;  %v304_v57 = vld [vmem:[#allocation4 + $0xc8] sm:$0xff] }
  0x7e   : > { %v663_v63 = vld [vmem:[#allocation4 + $0xc00] sm:$0xff]  ;;  %v4703_v3 = vcombine.high %v407_v61, %v415_v62  ;;  %3420 = vmatprep.subr.bf16.mxu1 %v4975_v58  ;;  %v4702_v9 = vcombine.low %v407_v61, %v415_v62  ;;  %v552_v58 = vld [vmem:[#allocation4 + $0x888] sm:$0xff]  ;;  %v4865_v61 = vcombine.high %v568_v50, %v576_v52  ;;  %v4593_v1 = vcombine.high %v296_v56, %v304_v57 }
  0x7f   : > { %v671_v0 = vld [vmem:[#allocation4 + $0xc40] sm:$0xff]  ;;  %3421 = vmatpush2.bf16.msra.mxu1 %v4974_v2  ;;  %v560_v62 = vld [vmem:[#allocation4 + $0x8c8] sm:$0xff]  ;;  %v4592_v7 = vcombine.low %v296_v56, %v304_v57 }
  0x80   : > { %v4959_v4 = vcombine.high %v663_v63, %v671_v0  ;;  %3381 = vmatprep.subr.bf16.mxu0 %v4703_v3  ;;  %v4958_v11 = vcombine.low %v663_v63, %v671_v0  ;;  %v4608_v63 = vcombine.low %v312_v48, %v320_v49  ;;  %v4864_v0 = vcombine.low %v568_v50, %v576_v52  ;;  %v280_v2 = vld [vmem:[#allocation4 + $0x8] sm:$0xff] }
  0x81   : > { %3382 = vmatpush2.bf16.msra.mxu0 %v4702_v9  ;;  %v288_v3 = vld [vmem:[#allocation4 + $0x48] sm:$0xff]  ;;  %v4849_v5 = vcombine.high %v552_v58, %v560_v62  ;;  %v4848_v8 = vcombine.low %v552_v58, %v560_v62 }
  0x82   : > { %3422 = vmatprep.subr.bf16.mxu1 %v4959_v4  ;;  %3433 = vmatprep.subr.bf16.mxu0 %v4689_v13  ;;  %v536_v4 = vld [vmem:[#allocation4 + $0x808] sm:$0xff]  ;;  %v4577_v9 = vcombine.high %v280_v2, %v288_v3  ;;  %v4576_v15 = vcombine.low %v280_v2, %v288_v3 }
  0x83   : > { %3423 = vmatpush2.bf16.msra.mxu1 %v4958_v11  ;;  %v544_v6 = vld [vmem:[#allocation4 + $0x848] sm:$0xff] }
  0x84   : > { %3474 = vmatprep.subr.bf16.mxu1 %v4945_v14  ;;  %3384 = vmatmul.mubr.bf16.vlgmr.msra.gmra.mxu0 %v5538_v17  ;;  %v528_v11 = vld [vmem:[#allocation4 + $0x7c8] sm:$0xff]  ;;  %v4833_v13 = vcombine.high %v536_v4, %v544_v6  ;;  %v4832_v16 = vcombine.low %v536_v4, %v544_v6 }
  0x85   : > { %3434 = vmatpush1.bf16.msra.mxu0 %v4688_v21  ;;  %3465 = vmatprep.mubr.bf16.mxu0 %v5532_v59  ;;  %v776_v12 = vld [vmem:[#allocation4 + $0xf88] sm:$0xff]  ;;  %v4817_v18 = vcombine.high %v520_v10, %v528_v11  ;;  %v4816_v25 = vcombine.low %v520_v10, %v528_v11 }
  0x86   : > { %3425 = vmatmul.mubr.bf16.vlgmr.msra.gmra.mxu1 %v5540_v20  ;;  %3435 = vmatprep.subr.bf16.mxu0 %v4673_v23  ;;  %v784_v14 = vld [vmem:[#allocation4 + $0xfc8] sm:$0xff] }
  0x87   : > { %3475 = vmatpush1.bf16.msra.mxu1 %v4944_v22  ;;  %3506 = vmatprep.mubr.bf16.mxu1 %v5534_v60  ;;  %v504_v19 = vld [vmem:[#allocation4 + $0x708] sm:$0xff]  ;;  %v5073_v23 = vcombine.high %v776_v12, %v784_v14 }
  0x88   : > { %3476 = vmatprep.subr.bf16.mxu1 %v4929_v26  ;;  %v512_v21 = vld [vmem:[#allocation4 + $0x748] sm:$0xff]  ;;  %v5072_v26 = vcombine.low %v776_v12, %v784_v14 }
  0x89   : > { %3436 = vmatpush1.bf16.msra.mxu0 %v4672_v29  ;;  %v760_v22 = vld [vmem:[#allocation4 + $0xf08] sm:$0xff]  ;;  %v4801_v27 = vcombine.high %v504_v19, %v512_v21  ;;  %v4800_v33 = vcombine.low %v504_v19, %v512_v21  ;;  %v657_v19 = vld [vmem:[#allocation4 + $0xbd0] sm:$0xff] }
  0x8a   : > { %3437 = vmatprep.subr.bf16.mxu0 %v4657_v31  ;;  %v768_v24 = vld [vmem:[#allocation4 + $0xf48] sm:$0xff] }
  0x8b   : > { %3477 = vmatpush1.bf16.msra.mxu1 %v4928_v30  ;;  %v5057_v28 = vcombine.high %v760_v22, %v768_v24  ;;  %v488_v29 = vld [vmem:[#allocation4 + $0x688] sm:$0xff]  ;;  %v5056_v34 = vcombine.low %v760_v22, %v768_v24 }
  0x8c   : > { %3478 = vmatprep.subr.bf16.mxu1 %v4913_v35  ;;  %v496_v30 = vld [vmem:[#allocation4 + $0x6c8] sm:$0xff] }
  0x8d   : > { %3438 = vmatpush1.bf16.msra.mxu0 %v4656_v37  ;;  %v744_v31 = vld [vmem:[#allocation4 + $0xe88] sm:$0xff]  ;;  %v4785_v35 = vcombine.high %v488_v29, %v496_v30  ;;  %v4784_v41 = vcombine.low %v488_v29, %v496_v30 }
  0x8e   : > { %3439 = vmatprep.subr.bf16.mxu0 %v4641_v39  ;;  %v752_v32 = vld [vmem:[#allocation4 + $0xec8] sm:$0xff] }
  0x8f   : > { %3479 = vmatpush1.bf16.msra.mxu1 %v4912_v38  ;;  %v5041_v36 = vcombine.high %v744_v31, %v752_v32  ;;  %v472_v37 = vld [vmem:[#allocation4 + $0x608] sm:$0xff]  ;;  %v5040_v42 = vcombine.low %v744_v31, %v752_v32 }
  0x90   : > { %3480 = vmatprep.subr.bf16.mxu1 %v4897_v43  ;;  %v480_v38 = vld [vmem:[#allocation4 + $0x648] sm:$0xff] }
  0x91   : > { %3440 = vmatpush1.bf16.msra.mxu0 %v4640_v45  ;;  %v728_v39 = vld [vmem:[#allocation4 + $0xe08] sm:$0xff]  ;;  %v4769_v43 = vcombine.high %v472_v37, %v480_v38  ;;  %v4768_v49 = vcombine.low %v472_v37, %v480_v38 }
  0x92   : > { %3441 = vmatprep.subr.bf16.mxu0 %v4625_v47  ;;  %v736_v40 = vld [vmem:[#allocation4 + $0xe48] sm:$0xff] }
  0x93   : > { %3481 = vmatpush1.bf16.msra.mxu1 %v4896_v46  ;;  %v5025_v44 = vcombine.high %v728_v39, %v736_v40  ;;  %v456_v45 = vld [vmem:[#allocation4 + $0x588] sm:$0xff]  ;;  %v5024_v50 = vcombine.low %v728_v39, %v736_v40 }
  0x94   : > { %3482 = vmatprep.subr.bf16.mxu1 %v4881_v51  ;;  %v464_v46 = vld [vmem:[#allocation4 + $0x5c8] sm:$0xff] }
  0x95   : > { %3442 = vmatpush1.bf16.msra.mxu0 %v4624_v53  ;;  %v712_v47 = vld [vmem:[#allocation4 + $0xd88] sm:$0xff]  ;;  %v4753_v51 = vcombine.high %v456_v45, %v464_v46  ;;  %v4752_v57 = vcombine.low %v456_v45, %v464_v46 }
  0x96   : > { %3443 = vmatprep.subr.bf16.mxu0 %v4609_v55  ;;  %v720_v48 = vld [vmem:[#allocation4 + $0xdc8] sm:$0xff] }
  0x97   : > { %3483 = vmatpush1.bf16.msra.mxu1 %v4880_v54  ;;  %v5009_v52 = vcombine.high %v712_v47, %v720_v48  ;;  %v440_v53 = vld [vmem:[#allocation4 + $0x508] sm:$0xff]  ;;  %v5008_v58 = vcombine.low %v712_v47, %v720_v48 }
  0x98   : > { %3484 = vmatprep.subr.bf16.mxu1 %v4865_v61  ;;  %v448_v54 = vld [vmem:[#allocation4 + $0x548] sm:$0xff] }
  0x99   : > { %3444 = vmatpush1.bf16.msra.mxu0 %v4608_v63  ;;  %v696_v55 = vld [vmem:[#allocation4 + $0xd08] sm:$0xff]  ;;  %v4737_v61 = vcombine.high %v440_v53, %v448_v54  ;;  %v4736_v3 = vcombine.low %v440_v53, %v448_v54 }
  0x9a   : > { %3445 = vmatprep.subr.bf16.mxu0 %v4593_v1  ;;  %v704_v56 = vld [vmem:[#allocation4 + $0xd48] sm:$0xff] }
  0x9b   : > { %3485 = vmatpush1.bf16.msra.mxu1 %v4864_v0  ;;  %v4993_v62 = vcombine.high %v696_v55, %v704_v56  ;;  %v424_v63 = vld [vmem:[#allocation4 + $0x488] sm:$0xff]  ;;  %v4992_v4 = vcombine.low %v696_v55, %v704_v56 }
  0x9c   : > { %3486 = vmatprep.subr.bf16.mxu1 %v4849_v5  ;;  %v432_v0 = vld [vmem:[#allocation4 + $0x4c8] sm:$0xff] }
  0x9d   : > { %3446 = vmatpush1.bf16.msra.mxu0 %v4592_v7  ;;  %v680_v1 = vld [vmem:[#allocation4 + $0xc88] sm:$0xff]  ;;  %v4721_v5 = vcombine.high %v424_v63, %v432_v0  ;;  %v4720_v11 = vcombine.low %v424_v63, %v432_v0 }
  0x9e   : > { %3447 = vmatprep.subr.bf16.mxu0 %v4577_v9  ;;  %v688_v2 = vld [vmem:[#allocation4 + $0xcc8] sm:$0xff] }
  0x9f   : > { %3487 = vmatpush1.bf16.msra.mxu1 %v4848_v8  ;;  %v4977_v6 = vcombine.high %v680_v1, %v688_v2  ;;  %v408_v7 = vld [vmem:[#allocation4 + $0x408] sm:$0xff]  ;;  %v4976_v12 = vcombine.low %v680_v1, %v688_v2 }
  0xa0   : > { %3488 = vmatprep.subr.bf16.mxu1 %v4833_v13  ;;  %v416_v8 = vld [vmem:[#allocation4 + $0x448] sm:$0xff] }
  0xa1   : > { %3448 = vmatpush1.bf16.msra.mxu0 %v4576_v15  ;;  %v664_v9 = vld [vmem:[#allocation4 + $0xc08] sm:$0xff]  ;;  %v4705_v13 = vcombine.high %v408_v7, %v416_v8  ;;  %v393_v15 = vld [vmem:[#allocation4 + $0x390] sm:$0xff]  ;;  %v4704_v21 = vcombine.low %v408_v7, %v416_v8 }
  0xa2   : > { %3449 = vmatprep.subr.bf16.mxu0 %v4817_v18  ;;  %v672_v10 = vld [vmem:[#allocation4 + $0xc48] sm:$0xff]  ;;  %v649_v18 = vld [vmem:[#allocation4 + $0xb90] sm:$0xff] }
  0xa3   : > { %3489 = vmatpush1.bf16.msra.mxu1 %v4832_v16  ;;  %v4961_v14 = vcombine.high %v664_v9, %v672_v10  ;;  %v401_v16 = vld [vmem:[#allocation4 + $0x3d0] sm:$0xff]  ;;  %v4960_v22 = vcombine.low %v664_v9, %v672_v10  ;;  %v4947_v24 = vcombine.high %v649_v18, %v657_v19  ;;  %v4946_v30 = vcombine.low %v649_v18, %v657_v19 }
  0xa4   : > { %3490 = vmatprep.subr.bf16.mxu1 %v5073_v23  ;;  %v4691_v23 = vcombine.high %v393_v15, %v401_v16  ;;  %v4690_v29 = vcombine.low %v393_v15, %v401_v16 }
  0xa5   : > { %3450 = vmatpush2.bf16.msra.mxu0 %v4816_v25  ;;  %v377_v25 = vld [vmem:[#allocation4 + $0x310] sm:$0xff] }
  0xa6   : > { %3451 = vmatprep.subr.bf16.mxu0 %v4801_v27  ;;  %v633_v27 = vld [vmem:[#allocation4 + $0xb10] sm:$0xff] }
  0xa7   : > { %3491 = vmatpush2.bf16.msra.mxu1 %v5072_v26  ;;  %v385_v26 = vld [vmem:[#allocation4 + $0x350] sm:$0xff] }
  0xa8   : > { %3492 = vmatprep.subr.bf16.mxu1 %v5057_v28  ;;  %v641_v28 = vld [vmem:[#allocation4 + $0xb50] sm:$0xff]  ;;  %v4675_v31 = vcombine.high %v377_v25, %v385_v26  ;;  %v4674_v37 = vcombine.low %v377_v25, %v385_v26 }
  0xa9   : > { %3452 = vmatpush2.bf16.msra.mxu0 %v4800_v33  ;;  %v4931_v32 = vcombine.high %v633_v27, %v641_v28  ;;  %v361_v33 = vld [vmem:[#allocation4 + $0x290] sm:$0xff]  ;;  %v4930_v38 = vcombine.low %v633_v27, %v641_v28 }
  0xaa   : > { %3453 = vmatprep.subr.bf16.mxu0 %v4785_v35  ;;  %v617_v35 = vld [vmem:[#allocation4 + $0xa90] sm:$0xff] }
  0xab   : > { %3493 = vmatpush2.bf16.msra.mxu1 %v5056_v34  ;;  %v369_v34 = vld [vmem:[#allocation4 + $0x2d0] sm:$0xff] }
  0xac   : > { %3494 = vmatprep.subr.bf16.mxu1 %v5041_v36  ;;  %v625_v36 = vld [vmem:[#allocation4 + $0xad0] sm:$0xff]  ;;  %v4659_v39 = vcombine.high %v361_v33, %v369_v34  ;;  %v4658_v45 = vcombine.low %v361_v33, %v369_v34 }
  0xad   : > { %3454 = vmatpush2.bf16.msra.mxu0 %v4784_v41  ;;  %v4915_v40 = vcombine.high %v617_v35, %v625_v36  ;;  %v345_v41 = vld [vmem:[#allocation4 + $0x210] sm:$0xff]  ;;  %v4914_v46 = vcombine.low %v617_v35, %v625_v36 }
  0xae   : > { %3455 = vmatprep.subr.bf16.mxu0 %v4769_v43  ;;  %v601_v43 = vld [vmem:[#allocation4 + $0xa10] sm:$0xff] }
  0xaf   : > { %3495 = vmatpush2.bf16.msra.mxu1 %v5040_v42  ;;  %v353_v42 = vld [vmem:[#allocation4 + $0x250] sm:$0xff] }
  0xb0   : > { %3496 = vmatprep.subr.bf16.mxu1 %v5025_v44  ;;  %v609_v44 = vld [vmem:[#allocation4 + $0xa50] sm:$0xff]  ;;  %v4643_v47 = vcombine.high %v345_v41, %v353_v42  ;;  %v4642_v53 = vcombine.low %v345_v41, %v353_v42 }
  0xb1   : > { %3456 = vmatpush2.bf16.msra.mxu0 %v4768_v49  ;;  %v4899_v48 = vcombine.high %v601_v43, %v609_v44  ;;  %v329_v49 = vld [vmem:[#allocation4 + $0x190] sm:$0xff]  ;;  %v4898_v54 = vcombine.low %v601_v43, %v609_v44 }
  0xb2   : > { %3457 = vmatprep.subr.bf16.mxu0 %v4753_v51  ;;  %v585_v51 = vld [vmem:[#allocation4 + $0x990] sm:$0xff] }
  0xb3   : > { %3497 = vmatpush2.bf16.msra.mxu1 %v5024_v50  ;;  %v337_v50 = vld [vmem:[#allocation4 + $0x1d0] sm:$0xff] }
  0xb4   : > { %3498 = vmatprep.subr.bf16.mxu1 %v5009_v52  ;;  %v593_v52 = vld [vmem:[#allocation4 + $0x9d0] sm:$0xff]  ;;  %v4627_v55 = vcombine.high %v329_v49, %v337_v50  ;;  %v4626_v63 = vcombine.low %v329_v49, %v337_v50 }
  0xb5   : > { %3458 = vmatpush2.bf16.msra.mxu0 %v4752_v57  ;;  %v4883_v56 = vcombine.high %v585_v51, %v593_v52  ;;  %v313_v57 = vld [vmem:[#allocation4 + $0x110] sm:$0xff]  ;;  %v4882_v0 = vcombine.low %v585_v51, %v593_v52 }
  0xb6   : > { %3459 = vmatprep.subr.bf16.mxu0 %v4737_v61  ;;  %v569_v61 = vld [vmem:[#allocation4 + $0x910] sm:$0xff] }
  0xb7   : > { %3499 = vmatpush2.bf16.msra.mxu1 %v5008_v58  ;;  %v321_v58 = vld [vmem:[#allocation4 + $0x150] sm:$0xff] }
  0xb8   : > { %3500 = vmatprep.subr.bf16.mxu1 %v4993_v62  ;;  %v577_v62 = vld [vmem:[#allocation4 + $0x950] sm:$0xff]  ;;  %v4611_v1 = vcombine.high %v313_v57, %v321_v58  ;;  %v4610_v7 = vcombine.low %v313_v57, %v321_v58 }
  0xb9   : > { %3460 = vmatpush2.bf16.msra.mxu0 %v4736_v3  ;;  %v4867_v2 = vcombine.high %v569_v61, %v577_v62  ;;  %v297_v3 = vld [vmem:[#allocation4 + $0x90] sm:$0xff]  ;;  %v4866_v8 = vcombine.low %v569_v61, %v577_v62 }
  0xba   : > { %3461 = vmatprep.subr.bf16.mxu0 %v4721_v5  ;;  %v553_v5 = vld [vmem:[#allocation4 + $0x890] sm:$0xff] }
  0xbb   : > { %3501 = vmatpush2.bf16.msra.mxu1 %v4992_v4  ;;  %v305_v4 = vld [vmem:[#allocation4 + $0xd0] sm:$0xff] }
  0xbc   : > { %3502 = vmatprep.subr.bf16.mxu1 %v4977_v6  ;;  %v561_v6 = vld [vmem:[#allocation4 + $0x8d0] sm:$0xff]  ;;  %v4595_v9 = vcombine.high %v297_v3, %v305_v4  ;;  %v4594_v15 = vcombine.low %v297_v3, %v305_v4 }
  0xbd   : > { %3462 = vmatpush2.bf16.msra.mxu0 %v4720_v11  ;;  %v4851_v10 = vcombine.high %v553_v5, %v561_v6  ;;  %v281_v11 = vld [vmem:[#allocation4 + $0x10] sm:$0xff]  ;;  %v4850_v16 = vcombine.low %v553_v5, %v561_v6 }
  0xbe   : > { %3463 = vmatprep.subr.bf16.mxu0 %v4705_v13  ;;  %v537_v13 = vld [vmem:[#allocation4 + $0x810] sm:$0xff] }
  0xbf   : > { %3503 = vmatpush2.bf16.msra.mxu1 %v4976_v12  ;;  %v289_v12 = vld [vmem:[#allocation4 + $0x50] sm:$0xff] }
  0xc0   : > { %3504 = vmatprep.subr.bf16.mxu1 %v4961_v14  ;;  %v545_v14 = vld [vmem:[#allocation4 + $0x850] sm:$0xff]  ;;  %v4579_v18 = vcombine.high %v281_v11, %v289_v12  ;;  %v4578_v25 = vcombine.low %v281_v11, %v289_v12 }
  0xc1   : > { %3464 = vmatpush2.bf16.msra.mxu0 %v4704_v21  ;;  %v4835_v19 = vcombine.high %v537_v13, %v545_v14  ;;  %v521_v21 = vld [vmem:[#allocation4 + $0x790] sm:$0xff]  ;;  %v4834_v26 = vcombine.low %v537_v13, %v545_v14 }
  0xc2   : > { %3515 = vmatprep.subr.bf16.mxu0 %v4691_v23  ;;  %v777_v23 = vld [vmem:[#allocation4 + $0xf90] sm:$0xff] }
  0xc3   : > { %3505 = vmatpush2.bf16.msra.mxu1 %v4960_v22  ;;  %v529_v22 = vld [vmem:[#allocation4 + $0x7d0] sm:$0xff] }
  0xc4   : > { %3556 = vmatprep.subr.bf16.mxu1 %v4947_v24  ;;  %3466 = vmatmul.mubr.bf16.vlgmr.msra.gmra.mxu0 %v5538_v17  ;;  %v785_v24 = vld [vmem:[#allocation4 + $0xfd0] sm:$0xff]  ;;  %v4819_v27 = vcombine.high %v521_v21, %v529_v22  ;;  %v4818_v33 = vcombine.low %v521_v21, %v529_v22 }
  0xc5   : > { %3516 = vmatpush1.bf16.msra.mxu0 %v4690_v29  ;;  %3547 = vmatprep.mubr.bf16.mxu0 %v5532_v59  ;;  %v5075_v28 = vcombine.high %v777_v23, %v785_v24  ;;  %v505_v29 = vld [vmem:[#allocation4 + $0x710] sm:$0xff]  ;;  %v5074_v34 = vcombine.low %v777_v23, %v785_v24 }
  0xc6   : > { %3507 = vmatmul.mubr.bf16.vlgmr.msra.gmra.mxu1 %v5540_v20  ;;  %3517 = vmatprep.subr.bf16.mxu0 %v4675_v31  ;;  %v761_v31 = vld [vmem:[#allocation4 + $0xf10] sm:$0xff] }
  0xc7   : > { %3557 = vmatpush1.bf16.msra.mxu1 %v4946_v30  ;;  %3588 = vmatprep.mubr.bf16.mxu1 %v5534_v60  ;;  %v513_v30 = vld [vmem:[#allocation4 + $0x750] sm:$0xff] }
  0xc8   : > { %3558 = vmatprep.subr.bf16.mxu1 %v4931_v32  ;;  %v769_v32 = vld [vmem:[#allocation4 + $0xf50] sm:$0xff]  ;;  %v4803_v35 = vcombine.high %v505_v29, %v513_v30  ;;  %v4802_v41 = vcombine.low %v505_v29, %v513_v30 }
  0xc9   : > { %3518 = vmatpush1.bf16.msra.mxu0 %v4674_v37  ;;  %v5059_v36 = vcombine.high %v761_v31, %v769_v32  ;;  %v489_v37 = vld [vmem:[#allocation4 + $0x690] sm:$0xff]  ;;  %v5058_v42 = vcombine.low %v761_v31, %v769_v32 }
  0xca   : > { %3519 = vmatprep.subr.bf16.mxu0 %v4659_v39  ;;  %v745_v39 = vld [vmem:[#allocation4 + $0xe90] sm:$0xff] }
  0xcb   : > { %3559 = vmatpush1.bf16.msra.mxu1 %v4930_v38  ;;  %v497_v38 = vld [vmem:[#allocation4 + $0x6d0] sm:$0xff] }
  0xcc   : > { %3560 = vmatprep.subr.bf16.mxu1 %v4915_v40  ;;  %v753_v40 = vld [vmem:[#allocation4 + $0xed0] sm:$0xff]  ;;  %v4787_v43 = vcombine.high %v489_v37, %v497_v38  ;;  %v4786_v49 = vcombine.low %v489_v37, %v497_v38 }
  0xcd   : > { %3520 = vmatpush1.bf16.msra.mxu0 %v4658_v45  ;;  %v5043_v44 = vcombine.high %v745_v39, %v753_v40  ;;  %v473_v45 = vld [vmem:[#allocation4 + $0x610] sm:$0xff]  ;;  %v5042_v50 = vcombine.low %v745_v39, %v753_v40 }
  0xce   : > { %3521 = vmatprep.subr.bf16.mxu0 %v4643_v47  ;;  %v729_v47 = vld [vmem:[#allocation4 + $0xe10] sm:$0xff] }
  0xcf   : > { %3561 = vmatpush1.bf16.msra.mxu1 %v4914_v46  ;;  %v481_v46 = vld [vmem:[#allocation4 + $0x650] sm:$0xff] }
  0xd0   : > { %3562 = vmatprep.subr.bf16.mxu1 %v4899_v48  ;;  %v737_v48 = vld [vmem:[#allocation4 + $0xe50] sm:$0xff]  ;;  %v4771_v51 = vcombine.high %v473_v45, %v481_v46  ;;  %v4770_v57 = vcombine.low %v473_v45, %v481_v46 }
  0xd1   : > { %3522 = vmatpush1.bf16.msra.mxu0 %v4642_v53  ;;  %v5027_v52 = vcombine.high %v729_v47, %v737_v48  ;;  %v457_v53 = vld [vmem:[#allocation4 + $0x590] sm:$0xff]  ;;  %v5026_v58 = vcombine.low %v729_v47, %v737_v48 }
  0xd2   : > { %3523 = vmatprep.subr.bf16.mxu0 %v4627_v55  ;;  %v713_v55 = vld [vmem:[#allocation4 + $0xd90] sm:$0xff] }
  0xd3   : > { %3563 = vmatpush1.bf16.msra.mxu1 %v4898_v54  ;;  %v465_v54 = vld [vmem:[#allocation4 + $0x5d0] sm:$0xff] }
  0xd4   : > { %3564 = vmatprep.subr.bf16.mxu1 %v4883_v56  ;;  %v721_v56 = vld [vmem:[#allocation4 + $0xdd0] sm:$0xff]  ;;  %v4755_v61 = vcombine.high %v457_v53, %v465_v54  ;;  %v4754_v3 = vcombine.low %v457_v53, %v465_v54 }
  0xd5   : > { %3524 = vmatpush1.bf16.msra.mxu0 %v4626_v63  ;;  %v5011_v62 = vcombine.high %v713_v55, %v721_v56  ;;  %v441_v63 = vld [vmem:[#allocation4 + $0x510] sm:$0xff]  ;;  %v5010_v4 = vcombine.low %v713_v55, %v721_v56 }
  0xd6   : > { %3525 = vmatprep.subr.bf16.mxu0 %v4611_v1  ;;  %v697_v1 = vld [vmem:[#allocation4 + $0xd10] sm:$0xff] }
  0xd7   : > { %3565 = vmatpush1.bf16.msra.mxu1 %v4882_v0  ;;  %v449_v0 = vld [vmem:[#allocation4 + $0x550] sm:$0xff] }
  0xd8   : > { %3566 = vmatprep.subr.bf16.mxu1 %v4867_v2  ;;  %v705_v2 = vld [vmem:[#allocation4 + $0xd50] sm:$0xff]  ;;  %v4739_v5 = vcombine.high %v441_v63, %v449_v0  ;;  %v4738_v11 = vcombine.low %v441_v63, %v449_v0 }
  0xd9   : > { %3526 = vmatpush1.bf16.msra.mxu0 %v4610_v7  ;;  %v4995_v6 = vcombine.high %v697_v1, %v705_v2  ;;  %v425_v7 = vld [vmem:[#allocation4 + $0x490] sm:$0xff]  ;;  %v4994_v12 = vcombine.low %v697_v1, %v705_v2 }
  0xda   : > { %3527 = vmatprep.subr.bf16.mxu0 %v4595_v9  ;;  %v681_v9 = vld [vmem:[#allocation4 + $0xc90] sm:$0xff] }
  0xdb   : > { %3567 = vmatpush1.bf16.msra.mxu1 %v4866_v8  ;;  %v433_v8 = vld [vmem:[#allocation4 + $0x4d0] sm:$0xff] }
  0xdc   : > { %3568 = vmatprep.subr.bf16.mxu1 %v4851_v10  ;;  %v689_v10 = vld [vmem:[#allocation4 + $0xcd0] sm:$0xff]  ;;  %v4723_v13 = vcombine.high %v425_v7, %v433_v8  ;;  %v4722_v21 = vcombine.low %v425_v7, %v433_v8 }
  0xdd   : > { %3528 = vmatpush1.bf16.msra.mxu0 %v4594_v15  ;;  %v4979_v14 = vcombine.high %v681_v9, %v689_v10  ;;  %v409_v15 = vld [vmem:[#allocation4 + $0x410] sm:$0xff]  ;;  %v4978_v22 = vcombine.low %v681_v9, %v689_v10 }
  0xde   : > { %3529 = vmatprep.subr.bf16.mxu0 %v4579_v18  ;;  %v665_v18 = vld [vmem:[#allocation4 + $0xc10] sm:$0xff] }
  0xdf   : > { %3569 = vmatpush1.bf16.msra.mxu1 %v4850_v16  ;;  %v417_v16 = vld [vmem:[#allocation4 + $0x450] sm:$0xff] }
  0xe0   : > { %3570 = vmatprep.subr.bf16.mxu1 %v4835_v19  ;;  %v673_v19 = vld [vmem:[#allocation4 + $0xc50] sm:$0xff]  ;;  %v4707_v23 = vcombine.high %v409_v15, %v417_v16  ;;  %v4706_v29 = vcombine.low %v409_v15, %v417_v16 }
  0xe1   : > { %3530 = vmatpush1.bf16.msra.mxu0 %v4578_v25  ;;  %v4963_v24 = vcombine.high %v665_v18, %v673_v19  ;;  %v394_v25 = vld [vmem:[#allocation4 + $0x398] sm:$0xff]  ;;  %v4962_v30 = vcombine.low %v665_v18, %v673_v19 }
  0xe2   : > { %3531 = vmatprep.subr.bf16.mxu0 %v4819_v27  ;;  %v650_v27 = vld [vmem:[#allocation4 + $0xb98] sm:$0xff] }
  0xe3   : > { %3571 = vmatpush1.bf16.msra.mxu1 %v4834_v26  ;;  %v402_v26 = vld [vmem:[#allocation4 + $0x3d8] sm:$0xff] }
  0xe4   : > { %3572 = vmatprep.subr.bf16.mxu1 %v5075_v28  ;;  %v658_v28 = vld [vmem:[#allocation4 + $0xbd8] sm:$0xff]  ;;  %v4693_v31 = vcombine.high %v394_v25, %v402_v26  ;;  %v4692_v37 = vcombine.low %v394_v25, %v402_v26 }
  0xe5   : > { %3532 = vmatpush2.bf16.msra.mxu0 %v4818_v33  ;;  %v4949_v32 = vcombine.high %v650_v27, %v658_v28  ;;  %v378_v33 = vld [vmem:[#allocation4 + $0x318] sm:$0xff]  ;;  %v4948_v38 = vcombine.low %v650_v27, %v658_v28 }
  0xe6   : > { %3533 = vmatprep.subr.bf16.mxu0 %v4803_v35  ;;  %v634_v35 = vld [vmem:[#allocation4 + $0xb18] sm:$0xff] }
  0xe7   : > { %3573 = vmatpush2.bf16.msra.mxu1 %v5074_v34  ;;  %v386_v34 = vld [vmem:[#allocation4 + $0x358] sm:$0xff] }
  0xe8   : > { %3574 = vmatprep.subr.bf16.mxu1 %v5059_v36  ;;  %v642_v36 = vld [vmem:[#allocation4 + $0xb58] sm:$0xff]  ;;  %v4677_v39 = vcombine.high %v378_v33, %v386_v34  ;;  %v4676_v45 = vcombine.low %v378_v33, %v386_v34 }
  0xe9   : > { %3534 = vmatpush2.bf16.msra.mxu0 %v4802_v41  ;;  %v4933_v40 = vcombine.high %v634_v35, %v642_v36  ;;  %v362_v41 = vld [vmem:[#allocation4 + $0x298] sm:$0xff]  ;;  %v4932_v46 = vcombine.low %v634_v35, %v642_v36 }
  0xea   : > { %3535 = vmatprep.subr.bf16.mxu0 %v4787_v43  ;;  %v618_v43 = vld [vmem:[#allocation4 + $0xa98] sm:$0xff] }
  0xeb   : > { %3575 = vmatpush2.bf16.msra.mxu1 %v5058_v42  ;;  %v370_v42 = vld [vmem:[#allocation4 + $0x2d8] sm:$0xff] }
  0xec   : > { %3576 = vmatprep.subr.bf16.mxu1 %v5043_v44  ;;  %v626_v44 = vld [vmem:[#allocation4 + $0xad8] sm:$0xff]  ;;  %v4661_v47 = vcombine.high %v362_v41, %v370_v42  ;;  %v4660_v53 = vcombine.low %v362_v41, %v370_v42 }
  0xed   : > { %3536 = vmatpush2.bf16.msra.mxu0 %v4786_v49  ;;  %v4917_v48 = vcombine.high %v618_v43, %v626_v44  ;;  %v346_v49 = vld [vmem:[#allocation4 + $0x218] sm:$0xff]  ;;  %v4916_v54 = vcombine.low %v618_v43, %v626_v44 }
  0xee   : > { %3537 = vmatprep.subr.bf16.mxu0 %v4771_v51  ;;  %v602_v51 = vld [vmem:[#allocation4 + $0xa18] sm:$0xff] }
  0xef   : > { %3577 = vmatpush2.bf16.msra.mxu1 %v5042_v50  ;;  %v354_v50 = vld [vmem:[#allocation4 + $0x258] sm:$0xff] }
  0xf0   : > { %3578 = vmatprep.subr.bf16.mxu1 %v5027_v52  ;;  %v610_v52 = vld [vmem:[#allocation4 + $0xa58] sm:$0xff]  ;;  %v4645_v55 = vcombine.high %v346_v49, %v354_v50  ;;  %v4644_v63 = vcombine.low %v346_v49, %v354_v50 }
  0xf1   : > { %3538 = vmatpush2.bf16.msra.mxu0 %v4770_v57  ;;  %v4901_v56 = vcombine.high %v602_v51, %v610_v52  ;;  %v330_v57 = vld [vmem:[#allocation4 + $0x198] sm:$0xff]  ;;  %v4900_v0 = vcombine.low %v602_v51, %v610_v52 }
  0xf2   : > { %3539 = vmatprep.subr.bf16.mxu0 %v4755_v61  ;;  %v586_v61 = vld [vmem:[#allocation4 + $0x998] sm:$0xff] }
  0xf3   : > { %3579 = vmatpush2.bf16.msra.mxu1 %v5026_v58  ;;  %v338_v58 = vld [vmem:[#allocation4 + $0x1d8] sm:$0xff] }
  0xf4   : > { %3580 = vmatprep.subr.bf16.mxu1 %v5011_v62  ;;  %v594_v62 = vld [vmem:[#allocation4 + $0x9d8] sm:$0xff]  ;;  %v4629_v1 = vcombine.high %v330_v57, %v338_v58  ;;  %v4628_v7 = vcombine.low %v330_v57, %v338_v58 }
  0xf5   : > { %3540 = vmatpush2.bf16.msra.mxu0 %v4754_v3  ;;  %v4885_v2 = vcombine.high %v586_v61, %v594_v62  ;;  %v314_v3 = vld [vmem:[#allocation4 + $0x118] sm:$0xff]  ;;  %v4884_v8 = vcombine.low %v586_v61, %v594_v62 }
  0xf6   : > { %3541 = vmatprep.subr.bf16.mxu0 %v4739_v5  ;;  %v570_v5 = vld [vmem:[#allocation4 + $0x918] sm:$0xff] }
  0xf7   : > { %3581 = vmatpush2.bf16.msra.mxu1 %v5010_v4  ;;  %v322_v4 = vld [vmem:[#allocation4 + $0x158] sm:$0xff] }
  0xf8   : > { %3582 = vmatprep.subr.bf16.mxu1 %v4995_v6  ;;  %v578_v6 = vld [vmem:[#allocation4 + $0x958] sm:$0xff]  ;;  %v4613_v9 = vcombine.high %v314_v3, %v322_v4  ;;  %v4612_v15 = vcombine.low %v314_v3, %v322_v4 }
  0xf9   : > { %3542 = vmatpush2.bf16.msra.mxu0 %v4738_v11  ;;  %v4869_v10 = vcombine.high %v570_v5, %v578_v6  ;;  %v298_v11 = vld [vmem:[#allocation4 + $0x98] sm:$0xff]  ;;  %v4868_v16 = vcombine.low %v570_v5, %v578_v6 }
  0xfa   : > { %3543 = vmatprep.subr.bf16.mxu0 %v4723_v13  ;;  %v554_v13 = vld [vmem:[#allocation4 + $0x898] sm:$0xff] }
  0xfb   : > { %3583 = vmatpush2.bf16.msra.mxu1 %v4994_v12  ;;  %v306_v12 = vld [vmem:[#allocation4 + $0xd8] sm:$0xff] }
  0xfc   : > { %3584 = vmatprep.subr.bf16.mxu1 %v4979_v14  ;;  %v562_v14 = vld [vmem:[#allocation4 + $0x8d8] sm:$0xff]  ;;  %v4597_v18 = vcombine.high %v298_v11, %v306_v12  ;;  %v4596_v25 = vcombine.low %v298_v11, %v306_v12 }
  0xfd   : > { %3544 = vmatpush2.bf16.msra.mxu0 %v4722_v21  ;;  %v4853_v19 = vcombine.high %v554_v13, %v562_v14  ;;  %v282_v21 = vld [vmem:[#allocation4 + $0x18] sm:$0xff]  ;;  %v4852_v26 = vcombine.low %v554_v13, %v562_v14 }
  0xfe   : > { %3545 = vmatprep.subr.bf16.mxu0 %v4707_v23  ;;  %v538_v23 = vld [vmem:[#allocation4 + $0x818] sm:$0xff] }
  0xff   : > { %3585 = vmatpush2.bf16.msra.mxu1 %v4978_v22  ;;  %v290_v22 = vld [vmem:[#allocation4 + $0x58] sm:$0xff] }
 0x100   : > { %3586 = vmatprep.subr.bf16.mxu1 %v4963_v24  ;;  %v546_v24 = vld [vmem:[#allocation4 + $0x858] sm:$0xff]  ;;  %v4581_v27 = vcombine.high %v282_v21, %v290_v22  ;;  %v4580_v33 = vcombine.low %v282_v21, %v290_v22 }
 0x101   : > { %3546 = vmatpush2.bf16.msra.mxu0 %v4706_v29  ;;  %v4837_v28 = vcombine.high %v538_v23, %v546_v24  ;;  %v522_v29 = vld [vmem:[#allocation4 + $0x798] sm:$0xff]  ;;  %v4836_v34 = vcombine.low %v538_v23, %v546_v24 }
 0x102   : > { %3597 = vmatprep.subr.bf16.mxu0 %v4693_v31  ;;  %v778_v31 = vld [vmem:[#allocation4 + $0xf98] sm:$0xff] }
 0x103   : > { %3587 = vmatpush2.bf16.msra.mxu1 %v4962_v30  ;;  %v530_v30 = vld [vmem:[#allocation4 + $0x7d8] sm:$0xff] }
 0x104   : > { %3638 = vmatprep.subr.bf16.mxu1 %v4949_v32  ;;  %3548 = vmatmul.mubr.bf16.vlgmr.msra.gmra.mxu0 %v5538_v17  ;;  %v786_v32 = vld [vmem:[#allocation4 + $0xfd8] sm:$0xff]  ;;  %v4821_v35 = vcombine.high %v522_v29, %v530_v30  ;;  %v4820_v41 = vcombine.low %v522_v29, %v530_v30 }
 0x105   : > { %3598 = vmatpush1.bf16.msra.mxu0 %v4692_v37  ;;  %3629 = vmatprep.mubr.bf16.mxu0 %v5532_v59  ;;  %v5077_v36 = vcombine.high %v778_v31, %v786_v32  ;;  %v506_v37 = vld [vmem:[#allocation4 + $0x718] sm:$0xff]  ;;  %v5076_v42 = vcombine.low %v778_v31, %v786_v32 }
 0x106   : > { %3589 = vmatmul.mubr.bf16.vlgmr.msra.gmra.mxu1 %v5540_v20  ;;  %3599 = vmatprep.subr.bf16.mxu0 %v4677_v39  ;;  %v762_v39 = vld [vmem:[#allocation4 + $0xf18] sm:$0xff] }
 0x107   : > { %3639 = vmatpush1.bf16.msra.mxu1 %v4948_v38  ;;  %3670 = vmatprep.mubr.bf16.mxu1 %v5534_v60  ;;  %v514_v38 = vld [vmem:[#allocation4 + $0x758] sm:$0xff] }
 0x108   : > { %3640 = vmatprep.subr.bf16.mxu1 %v4933_v40  ;;  %v770_v40 = vld [vmem:[#allocation4 + $0xf58] sm:$0xff]  ;;  %v4805_v43 = vcombine.high %v506_v37, %v514_v38  ;;  %v4804_v49 = vcombine.low %v506_v37, %v514_v38 }
 0x109   : > { %3600 = vmatpush1.bf16.msra.mxu0 %v4676_v45  ;;  %v5061_v44 = vcombine.high %v762_v39, %v770_v40  ;;  %v490_v45 = vld [vmem:[#allocation4 + $0x698] sm:$0xff]  ;;  %v5060_v50 = vcombine.low %v762_v39, %v770_v40 }
 0x10a   : > { %3601 = vmatprep.subr.bf16.mxu0 %v4661_v47  ;;  %v746_v47 = vld [vmem:[#allocation4 + $0xe98] sm:$0xff] }
 0x10b   : > { %3641 = vmatpush1.bf16.msra.mxu1 %v4932_v46  ;;  %v498_v46 = vld [vmem:[#allocation4 + $0x6d8] sm:$0xff] }
 0x10c   : > { %3642 = vmatprep.subr.bf16.mxu1 %v4917_v48  ;;  %v754_v48 = vld [vmem:[#allocation4 + $0xed8] sm:$0xff]  ;;  %v4789_v51 = vcombine.high %v490_v45, %v498_v46  ;;  %v4788_v57 = vcombine.low %v490_v45, %v498_v46 }
 0x10d   : > { %3602 = vmatpush1.bf16.msra.mxu0 %v4660_v53  ;;  %v5045_v52 = vcombine.high %v746_v47, %v754_v48  ;;  %v474_v53 = vld [vmem:[#allocation4 + $0x618] sm:$0xff]  ;;  %v5044_v58 = vcombine.low %v746_v47, %v754_v48 }
 0x10e   : > { %3603 = vmatprep.subr.bf16.mxu0 %v4645_v55  ;;  %v730_v55 = vld [vmem:[#allocation4 + $0xe18] sm:$0xff] }
 0x10f   : > { %3643 = vmatpush1.bf16.msra.mxu1 %v4916_v54  ;;  %v482_v54 = vld [vmem:[#allocation4 + $0x658] sm:$0xff] }
 0x110   : > { %3644 = vmatprep.subr.bf16.mxu1 %v4901_v56  ;;  %v738_v56 = vld [vmem:[#allocation4 + $0xe58] sm:$0xff]  ;;  %v4773_v61 = vcombine.high %v474_v53, %v482_v54  ;;  %v4772_v3 = vcombine.low %v474_v53, %v482_v54  ;;  %v627_v53 = vld [vmem:[#allocation4 + $0xae0] sm:$0xff] }
 0x111   : > { %3604 = vmatpush1.bf16.msra.mxu0 %v4644_v63  ;;  %v5029_v62 = vcombine.high %v730_v55, %v738_v56  ;;  %v458_v63 = vld [vmem:[#allocation4 + $0x598] sm:$0xff]  ;;  %v5028_v4 = vcombine.low %v730_v55, %v738_v56 }
 0x112   : > { %3605 = vmatprep.subr.bf16.mxu0 %v4629_v1  ;;  %v714_v1 = vld [vmem:[#allocation4 + $0xd98] sm:$0xff] }
 0x113   : > { %3645 = vmatpush1.bf16.msra.mxu1 %v4900_v0  ;;  %v466_v0 = vld [vmem:[#allocation4 + $0x5d8] sm:$0xff] }
 0x114   : > { %3646 = vmatprep.subr.bf16.mxu1 %v4885_v2  ;;  %v722_v2 = vld [vmem:[#allocation4 + $0xdd8] sm:$0xff]  ;;  %v4757_v5 = vcombine.high %v458_v63, %v466_v0  ;;  %v4756_v11 = vcombine.low %v458_v63, %v466_v0  ;;  %v347_v0 = vld [vmem:[#allocation4 + $0x220] sm:$0xff] }
 0x115   : > { %3606 = vmatpush1.bf16.msra.mxu0 %v4628_v7  ;;  %v5013_v6 = vcombine.high %v714_v1, %v722_v2  ;;  %v442_v7 = vld [vmem:[#allocation4 + $0x518] sm:$0xff]  ;;  %v5012_v12 = vcombine.low %v714_v1, %v722_v2  ;;  %v355_v1 = vld [vmem:[#allocation4 + $0x260] sm:$0xff] }
 0x116   : > { %3607 = vmatprep.subr.bf16.mxu0 %v4613_v9  ;;  %v698_v9 = vld [vmem:[#allocation4 + $0xd18] sm:$0xff] }
 0x117   : > { %3647 = vmatpush1.bf16.msra.mxu1 %v4884_v8  ;;  %v450_v8 = vld [vmem:[#allocation4 + $0x558] sm:$0xff] }
 0x118   : > { %3648 = vmatprep.subr.bf16.mxu1 %v4869_v10  ;;  %v706_v10 = vld [vmem:[#allocation4 + $0xd58] sm:$0xff]  ;;  %v4741_v13 = vcombine.high %v442_v7, %v450_v8  ;;  %v4740_v21 = vcombine.low %v442_v7, %v450_v8 }
 0x119   : > { %3608 = vmatpush1.bf16.msra.mxu0 %v4612_v15  ;;  %v4997_v14 = vcombine.high %v698_v9, %v706_v10  ;;  %v426_v15 = vld [vmem:[#allocation4 + $0x498] sm:$0xff]  ;;  %v4996_v22 = vcombine.low %v698_v9, %v706_v10  ;;  %v4647_v10 = vcombine.high %v347_v0, %v355_v1 }
 0x11a   : > { %3609 = vmatprep.subr.bf16.mxu0 %v4597_v18  ;;  %v682_v18 = vld [vmem:[#allocation4 + $0xc98] sm:$0xff] }
 0x11b   : > { %3649 = vmatpush1.bf16.msra.mxu1 %v4868_v16  ;;  %v434_v16 = vld [vmem:[#allocation4 + $0x4d8] sm:$0xff] }
 0x11c   : > { %3650 = vmatprep.subr.bf16.mxu1 %v4853_v19  ;;  %v690_v19 = vld [vmem:[#allocation4 + $0xcd8] sm:$0xff]  ;;  %v4725_v23 = vcombine.high %v426_v15, %v434_v16  ;;  %v4724_v29 = vcombine.low %v426_v15, %v434_v16  ;;  %v587_v15 = vld [vmem:[#allocation4 + $0x9a0] sm:$0xff] }
 0x11d   : > { %3610 = vmatpush1.bf16.msra.mxu0 %v4596_v25  ;;  %v4981_v24 = vcombine.high %v682_v18, %v690_v19  ;;  %v410_v25 = vld [vmem:[#allocation4 + $0x418] sm:$0xff]  ;;  %v4980_v30 = vcombine.low %v682_v18, %v690_v19  ;;  %v595_v16 = vld [vmem:[#allocation4 + $0x9e0] sm:$0xff]  ;;  %v4646_v18 = vcombine.low %v347_v0, %v355_v1 }
 0x11e   : > { %3611 = vmatprep.subr.bf16.mxu0 %v4581_v27  ;;  %v666_v27 = vld [vmem:[#allocation4 + $0xc18] sm:$0xff] }
 0x11f   : > { %3651 = vmatpush1.bf16.msra.mxu1 %v4852_v26  ;;  %v418_v26 = vld [vmem:[#allocation4 + $0x458] sm:$0xff] }
 0x120   : > { %3652 = vmatprep.subr.bf16.mxu1 %v4837_v28  ;;  %v674_v28 = vld [vmem:[#allocation4 + $0xc58] sm:$0xff]  ;;  %v4709_v31 = vcombine.high %v410_v25, %v418_v26  ;;  %v4708_v37 = vcombine.low %v410_v25, %v418_v26  ;;  %v571_v25 = vld [vmem:[#allocation4 + $0x920] sm:$0xff] }
 0x121   : > { %3612 = vmatpush1.bf16.msra.mxu0 %v4580_v33  ;;  %v4965_v32 = vcombine.high %v666_v27, %v674_v28  ;;  %v395_v33 = vld [vmem:[#allocation4 + $0x3a0] sm:$0xff]  ;;  %v4964_v38 = vcombine.low %v666_v27, %v674_v28  ;;  %v4886_v28 = vcombine.low %v587_v15, %v595_v16 }
 0x122   : > { %3613 = vmatprep.subr.bf16.mxu0 %v4821_v35  ;;  %v651_v35 = vld [vmem:[#allocation4 + $0xba0] sm:$0xff] }
 0x123   : > { %3653 = vmatpush1.bf16.msra.mxu1 %v4836_v34  ;;  %v403_v34 = vld [vmem:[#allocation4 + $0x3e0] sm:$0xff] }
 0x124   : > { %3654 = vmatprep.subr.bf16.mxu1 %v5077_v36  ;;  %v659_v36 = vld [vmem:[#allocation4 + $0xbe0] sm:$0xff]  ;;  %v4695_v39 = vcombine.high %v395_v33, %v403_v34  ;;  %v4694_v45 = vcombine.low %v395_v33, %v403_v34 }
 0x125   : > { %3614 = vmatpush2.bf16.msra.mxu0 %v4820_v41  ;;  %v4951_v40 = vcombine.high %v651_v35, %v659_v36  ;;  %v379_v41 = vld [vmem:[#allocation4 + $0x320] sm:$0xff]  ;;  %v4950_v46 = vcombine.low %v651_v35, %v659_v36 }
 0x126   : > { %3615 = vmatprep.subr.bf16.mxu0 %v4805_v43  ;;  %v635_v43 = vld [vmem:[#allocation4 + $0xb20] sm:$0xff] }
 0x127   : > { %3655 = vmatpush2.bf16.msra.mxu1 %v5076_v42  ;;  %v387_v42 = vld [vmem:[#allocation4 + $0x360] sm:$0xff] }
 0x128   : > { %3656 = vmatprep.subr.bf16.mxu1 %v5061_v44  ;;  %v643_v44 = vld [vmem:[#allocation4 + $0xb60] sm:$0xff]  ;;  %v4679_v47 = vcombine.high %v379_v41, %v387_v42  ;;  %v4678_v55 = vcombine.low %v379_v41, %v387_v42 }
 0x129   : > { %3616 = vmatpush2.bf16.msra.mxu0 %v4804_v49  ;;  %v4935_v48 = vcombine.high %v635_v43, %v643_v44  ;;  %v363_v49 = vld [vmem:[#allocation4 + $0x2a0] sm:$0xff] }
 0x12a   : > { %3617 = vmatprep.subr.bf16.mxu0 %v4789_v51  ;;  %v579_v26 = vld [vmem:[#allocation4 + $0x960] sm:$0xff] }
 0x12b   : > { %3657 = vmatpush2.bf16.msra.mxu1 %v5060_v50  ;;  %v371_v50 = vld [vmem:[#allocation4 + $0x2e0] sm:$0xff]  ;;  %v4870_v36 = vcombine.low %v571_v25, %v579_v26 }
 0x12c   : > { %3658 = vmatprep.subr.bf16.mxu1 %v5045_v52  ;;  %v619_v52 = vld [vmem:[#allocation4 + $0xaa0] sm:$0xff]  ;;  %v4662_v7 = vcombine.low %v363_v49, %v371_v50 }
 0x12d   : > { %3618 = vmatpush2.bf16.msra.mxu0 %v4788_v57  ;;  %v4919_v63 = vcombine.high %v619_v52, %v627_v53  ;;  %v4918_v9 = vcombine.low %v619_v52, %v627_v53  ;;  %v555_v33 = vld [vmem:[#allocation4 + $0x8a0] sm:$0xff] }
 0x12e   : > { %3619 = vmatprep.subr.bf16.mxu0 %v4773_v61  ;;  %v4663_v61 = vcombine.high %v363_v49, %v371_v50  ;;  %v563_v34 = vld [vmem:[#allocation4 + $0x8e0] sm:$0xff] }
 0x12f   : > { %3659 = vmatpush2.bf16.msra.mxu1 %v5044_v58  ;;  %v4934_v58 = vcombine.low %v635_v43, %v643_v44  ;;  %v539_v41 = vld [vmem:[#allocation4 + $0x820] sm:$0xff]  ;;  %v4854_v44 = vcombine.low %v555_v33, %v563_v34 }
 0x130   : > { %3660 = vmatprep.subr.bf16.mxu1 %v5029_v62  ;;  %v547_v42 = vld [vmem:[#allocation4 + $0x860] sm:$0xff] }
 0x131   : > { %3620 = vmatpush2.bf16.msra.mxu0 %v4772_v3  ;;  %v779_v49 = vld [vmem:[#allocation4 + $0xfa0] sm:$0xff]  ;;  %v4838_v52 = vcombine.low %v539_v41, %v547_v42 }
 0x132   : > { %3621 = vmatprep.subr.bf16.mxu0 %v4757_v5  ;;  %v611_v5 = vld [vmem:[#allocation4 + $0xa60] sm:$0xff] }
 0x133   : > { %3661 = vmatpush2.bf16.msra.mxu1 %v5028_v4  ;;  %v603_v4 = vld [vmem:[#allocation4 + $0xa20] sm:$0xff] }
 0x134   : > { %3662 = vmatprep.subr.bf16.mxu1 %v5013_v6  ;;  %v4902_v19 = vcombine.low %v603_v4, %v611_v5  ;;  %v787_v50 = vld [vmem:[#allocation4 + $0xfe0] sm:$0xff] }
 0x135   : > { %3622 = vmatpush2.bf16.msra.mxu0 %v4756_v11 }
 0x136   : > { %3623 = vmatprep.subr.bf16.mxu0 %v4741_v13  ;;  %v331_v13 = vld [vmem:[#allocation4 + $0x1a0] sm:$0xff] }
 0x137   : > { %3663 = vmatpush2.bf16.msra.mxu1 %v5012_v12  ;;  %v4903_v12 = vcombine.high %v603_v4, %v611_v5  ;;  %v499_v4 = vld [vmem:[#allocation4 + $0x6e0] sm:$0xff] }
 0x138   : > { %3664 = vmatprep.subr.bf16.mxu1 %v4997_v14  ;;  %v339_v14 = vld [vmem:[#allocation4 + $0x1e0] sm:$0xff] }
 0x139   : > { %3624 = vmatpush2.bf16.msra.mxu0 %v4740_v21  ;;  %v4631_v21 = vcombine.high %v331_v13, %v339_v14  ;;  %v4630_v27 = vcombine.low %v331_v13, %v339_v14  ;;  %v747_v5 = vld [vmem:[#allocation4 + $0xea0] sm:$0xff] }
 0x13a   : > { %3625 = vmatprep.subr.bf16.mxu0 %v4725_v23  ;;  %v315_v23 = vld [vmem:[#allocation4 + $0x120] sm:$0xff] }
 0x13b   : > { %3665 = vmatpush2.bf16.msra.mxu1 %v4996_v22  ;;  %v4887_v22 = vcombine.high %v587_v15, %v595_v16  ;;  %v731_v13 = vld [vmem:[#allocation4 + $0xe20] sm:$0xff] }
 0x13c   : > { %3666 = vmatprep.subr.bf16.mxu1 %v4981_v24  ;;  %v323_v24 = vld [vmem:[#allocation4 + $0x160] sm:$0xff] }
 0x13d   : > { %3626 = vmatpush2.bf16.msra.mxu0 %v4724_v29  ;;  %v4615_v29 = vcombine.high %v315_v23, %v323_v24  ;;  %v4614_v35 = vcombine.low %v315_v23, %v323_v24  ;;  %v739_v14 = vld [vmem:[#allocation4 + $0xe60] sm:$0xff] }
 0x13e   : > { %3627 = vmatprep.subr.bf16.mxu0 %v4709_v31  ;;  %v299_v31 = vld [vmem:[#allocation4 + $0xa0] sm:$0xff] }
 0x13f   : > { %3667 = vmatpush2.bf16.msra.mxu1 %v4980_v30  ;;  %v4871_v30 = vcombine.high %v571_v25, %v579_v26  ;;  %v715_v23 = vld [vmem:[#allocation4 + $0xda0] sm:$0xff]  ;;  %v5030_v26 = vcombine.low %v731_v13, %v739_v14 }
 0x140   : > { %3668 = vmatprep.subr.bf16.mxu1 %v4965_v32  ;;  %v307_v32 = vld [vmem:[#allocation4 + $0xe0] sm:$0xff] }
 0x141   : > { %3628 = vmatpush2.bf16.msra.mxu0 %v4708_v37  ;;  %v4599_v37 = vcombine.high %v299_v31, %v307_v32  ;;  %v4598_v43 = vcombine.low %v299_v31, %v307_v32  ;;  %v723_v24 = vld [vmem:[#allocation4 + $0xde0] sm:$0xff] }
 0x142   : > { %3679 = vmatprep.subr.bf16.mxu0 %v4695_v39  ;;  %v283_v39 = vld [vmem:[#allocation4 + $0x20] sm:$0xff] }
 0x143   : > { %3669 = vmatpush2.bf16.msra.mxu1 %v4964_v38  ;;  %v4855_v38 = vcombine.high %v555_v33, %v563_v34  ;;  %v699_v31 = vld [vmem:[#allocation4 + $0xd20] sm:$0xff]  ;;  %v5014_v34 = vcombine.low %v715_v23, %v723_v24 }
 0x144   : > { %3720 = vmatprep.subr.bf16.mxu1 %v4951_v40  ;;  %v3385_v51 = vpop.f32.mrf.mxu0  ;;  %3630 = vmatmul.mubr.bf16.vlgmr.msra.gmra.mxu0 %v5538_v17  ;;  %v291_v40 = vld [vmem:[#allocation4 + $0x60] sm:$0xff] }
 0x145   : > { %3680 = vmatpush1.bf16.msra.mxu0 %v4694_v45  ;;  %3711 = vmatprep.mubr.bf16.mxu0 %v5532_v59  ;;  %v4583_v45 = vcombine.high %v283_v39, %v291_v40  ;;  %v707_v32 = vld [vmem:[#allocation4 + $0xd60] sm:$0xff] }
 0x146   : > { %v3426_v54 = vpop.f32.mrf.mxu1  ;;  %3671 = vmatmul.mubr.bf16.vlgmr.msra.gmra.mxu1 %v5540_v20  ;;  %v3387_v57 = vpop.f32.mrf.mxu0  ;;  %3681 = vmatprep.subr.bf16.mxu0 %v4679_v47  ;;  %v523_v47 = vld [vmem:[#allocation4 + $0x7a0] sm:$0xff] }
 0x147   : > { %v5556_v56 = vadd.f32 %v3426_v54, %v3385_v51  ;;  %3721 = vmatpush1.bf16.msra.mxu1 %v4950_v46  ;;  %3752 = vmatprep.mubr.bf16.mxu1 %v5534_v60  ;;  %v4839_v46 = vcombine.high %v539_v41, %v547_v42  ;;  %v4582_v51 = vcombine.low %v283_v39, %v291_v40  ;;  %v683_v39 = vld [vmem:[#allocation4 + $0xca0] sm:$0xff] }
 0x148   : > { %v3428_v62 = vpop.f32.mrf.mxu1  ;;  %3722 = vmatprep.subr.bf16.mxu1 %v4935_v48  ;;  %v3389_v3 = vpop.f32.mrf.mxu0  ;;  %v531_v48 = vld [vmem:[#allocation4 + $0x7e0] sm:$0xff]  ;;  %v5079_v54 = vcombine.high %v779_v49, %v787_v50  ;;  %v4998_v42 = vcombine.low %v699_v31, %v707_v32 }
 0x149   : > { %v5559_v2 = vadd.f32 %v3428_v62, %v3387_v57  ;;  %3682 = vmatpush1.bf16.msra.mxu0 %v4678_v55  ;;  %v4823_v53 = vcombine.high %v523_v47, %v531_v48  ;;  %v507_v55 = vld [vmem:[#allocation4 + $0x720] sm:$0xff]  ;;  %v4822_v62 = vcombine.low %v523_v47, %v531_v48 }
 0x14a   : > { %v3430_v6 = vpop.f32.mrf.mxu1  ;;  %v3390_v8 = vpop.f32.mrf.mxu0  ;;  %3683 = vmatprep.subr.bf16.mxu0 %v4663_v61  ;;  %v515_v57 = vld [vmem:[#allocation4 + $0x760] sm:$0xff] }
 0x14b   : > { %3723 = vmatpush1.bf16.msra.mxu1 %v4934_v58  ;;  %v763_v58 = vld [vmem:[#allocation4 + $0xf20] sm:$0xff]  ;;  %v4807_v0 = vcombine.high %v507_v55, %v515_v57 }
 0x14c   : > { %v3431_v11 = vpop.f32.mrf.mxu1  ;;  %3724 = vmatprep.subr.bf16.mxu1 %v4919_v63  ;;  %v771_v61 = vld [vmem:[#allocation4 + $0xf60] sm:$0xff]  ;;  %v5078_v63 = vcombine.low %v779_v49, %v787_v50 }
 0x14d   : > { %3684 = vmatpush1.bf16.msra.mxu0 %v4662_v7  ;;  %v5063_v1 = vcombine.high %v763_v58, %v771_v61  ;;  %v491_v3 = vld [vmem:[#allocation4 + $0x6a0] sm:$0xff]  ;;  %v4806_v7 = vcombine.low %v507_v55, %v515_v57  ;;  %v5062_v8 = vcombine.low %v763_v58, %v771_v61  ;;  %v652_v55 = vld [vmem:[#allocation4 + $0xba8] sm:$0xff] }
 0x14e   : > { %3685 = vmatprep.subr.bf16.mxu0 %v4647_v10  ;;  %v755_v6 = vld [vmem:[#allocation4 + $0xee0] sm:$0xff]  ;;  %v4790_v15 = vcombine.low %v491_v3, %v499_v4  ;;  %v660_v57 = vld [vmem:[#allocation4 + $0xbe8] sm:$0xff] }
 0x14f   : > { %3725 = vmatpush1.bf16.msra.mxu1 %v4918_v9  ;;  %v4791_v9 = vcombine.high %v491_v3, %v499_v4  ;;  %v5047_v10 = vcombine.high %v747_v5, %v755_v6  ;;  %v475_v11 = vld [vmem:[#allocation4 + $0x620] sm:$0xff]  ;;  %v5046_v16 = vcombine.low %v747_v5, %v755_v6  ;;  %v636_v3 = vld [vmem:[#allocation4 + $0xb28] sm:$0xff]  ;;  %v4952_v6 = vcombine.low %v652_v55, %v660_v57 }
 0x150   : > { %3726 = vmatprep.subr.bf16.mxu1 %v4903_v12  ;;  %v483_v12 = vld [vmem:[#allocation4 + $0x660] sm:$0xff]  ;;  %v644_v4 = vld [vmem:[#allocation4 + $0xb68] sm:$0xff] }
 0x151   : > { %3686 = vmatpush1.bf16.msra.mxu0 %v4646_v18  ;;  %v4775_v18 = vcombine.high %v475_v11, %v483_v12  ;;  %v4774_v25 = vcombine.low %v475_v11, %v483_v12  ;;  %v691_v40 = vld [vmem:[#allocation4 + $0xce0] sm:$0xff]  ;;  %v620_v12 = vld [vmem:[#allocation4 + $0xaa8] sm:$0xff] }
 0x152   : > { %3687 = vmatprep.subr.bf16.mxu0 %v4631_v21  ;;  %v459_v21 = vld [vmem:[#allocation4 + $0x5a0] sm:$0xff]  ;;  %v4982_v50 = vcombine.low %v683_v39, %v691_v40 }
 0x153   : > { %3727 = vmatpush1.bf16.msra.mxu1 %v4902_v19  ;;  %v5031_v19 = vcombine.high %v731_v13, %v739_v14  ;;  %v667_v47 = vld [vmem:[#allocation4 + $0xc20] sm:$0xff]  ;;  %v628_v13 = vld [vmem:[#allocation4 + $0xae8] sm:$0xff] }
 0x154   : > { %3728 = vmatprep.subr.bf16.mxu1 %v4887_v22  ;;  %v467_v22 = vld [vmem:[#allocation4 + $0x5e0] sm:$0xff] }
 0x155   : > { %3688 = vmatpush1.bf16.msra.mxu0 %v4630_v27  ;;  %v4759_v27 = vcombine.high %v459_v21, %v467_v22  ;;  %v4758_v33 = vcombine.low %v459_v21, %v467_v22  ;;  %v675_v48 = vld [vmem:[#allocation4 + $0xc60] sm:$0xff] }
 0x156   : > { %3689 = vmatprep.subr.bf16.mxu0 %v4615_v29  ;;  %v443_v29 = vld [vmem:[#allocation4 + $0x520] sm:$0xff]  ;;  %v4966_v61 = vcombine.low %v667_v47, %v675_v48 }
 0x157   : > { %3729 = vmatpush1.bf16.msra.mxu1 %v4886_v28  ;;  %v5015_v28 = vcombine.high %v715_v23, %v723_v24  ;;  %v4921_v23 = vcombine.high %v620_v12, %v628_v13  ;;  %v348_v24 = vld [vmem:[#allocation4 + $0x228] sm:$0xff] }
 0x158   : > { %3730 = vmatprep.subr.bf16.mxu1 %v4871_v30  ;;  %v451_v30 = vld [vmem:[#allocation4 + $0x560] sm:$0xff] }
 0x159   : > { %3690 = vmatpush1.bf16.msra.mxu0 %v4614_v35  ;;  %v4743_v35 = vcombine.high %v443_v29, %v451_v30  ;;  %v4742_v41 = vcombine.low %v443_v29, %v451_v30  ;;  %v612_v29 = vld [vmem:[#allocation4 + $0xa68] sm:$0xff] }
 0x15a   : > { %3691 = vmatprep.subr.bf16.mxu0 %v4599_v37  ;;  %v427_v37 = vld [vmem:[#allocation4 + $0x4a0] sm:$0xff] }
 0x15b   : > { %3731 = vmatpush1.bf16.msra.mxu1 %v4870_v36  ;;  %v4999_v36 = vcombine.high %v699_v31, %v707_v32 }
 0x15c   : > { %3732 = vmatprep.subr.bf16.mxu1 %v4855_v38  ;;  %v435_v38 = vld [vmem:[#allocation4 + $0x4e0] sm:$0xff] }
 0x15d   : > { %3692 = vmatpush1.bf16.msra.mxu0 %v4598_v43  ;;  %v4727_v43 = vcombine.high %v427_v37, %v435_v38  ;;  %v4726_v49 = vcombine.low %v427_v37, %v435_v38  ;;  %v332_v37 = vld [vmem:[#allocation4 + $0x1a8] sm:$0xff] }
 0x15e   : > { %3693 = vmatprep.subr.bf16.mxu0 %v4583_v45  ;;  %v411_v45 = vld [vmem:[#allocation4 + $0x420] sm:$0xff]  ;;  %v340_v38 = vld [vmem:[#allocation4 + $0x1e8] sm:$0xff] }
 0x15f   : > { %3733 = vmatpush1.bf16.msra.mxu1 %v4854_v44  ;;  %v4983_v44 = vcombine.high %v683_v39, %v691_v40  ;;  %v588_v39 = vld [vmem:[#allocation4 + $0x9a8] sm:$0xff] }
 0x160   : > { %3734 = vmatprep.subr.bf16.mxu1 %v4839_v46  ;;  %v419_v46 = vld [vmem:[#allocation4 + $0x460] sm:$0xff]  ;;  %v596_v40 = vld [vmem:[#allocation4 + $0x9e8] sm:$0xff] }
 0x161   : > { %3694 = vmatpush1.bf16.msra.mxu0 %v4582_v51  ;;  %v4711_v51 = vcombine.high %v411_v45, %v419_v46  ;;  %v4710_v58 = vcombine.low %v411_v45, %v419_v46  ;;  %v316_v45 = vld [vmem:[#allocation4 + $0x128] sm:$0xff] }
 0x162   : > { %3695 = vmatprep.subr.bf16.mxu0 %v4823_v53  ;;  %v396_v53 = vld [vmem:[#allocation4 + $0x3a8] sm:$0xff] }
 0x163   : > { %3735 = vmatpush1.bf16.msra.mxu1 %v4838_v52  ;;  %v4967_v52 = vcombine.high %v667_v47, %v675_v48  ;;  %v324_v46 = vld [vmem:[#allocation4 + $0x168] sm:$0xff] }
 0x164   : > { %3736 = vmatprep.subr.bf16.mxu1 %v5079_v54  ;;  %v404_v54 = vld [vmem:[#allocation4 + $0x3e8] sm:$0xff] }
 0x165   : > { %3696 = vmatpush2.bf16.msra.mxu0 %v4822_v62  ;;  %v4697_v62 = vcombine.high %v396_v53, %v404_v54  ;;  %v4696_v5 = vcombine.low %v396_v53, %v404_v54  ;;  %v572_v47 = vld [vmem:[#allocation4 + $0x928] sm:$0xff] }
 0x166   : > { %3697 = vmatprep.subr.bf16.mxu0 %v4807_v0  ;;  %v380_v0 = vld [vmem:[#allocation4 + $0x328] sm:$0xff] }
 0x167   : > { %3737 = vmatpush2.bf16.msra.mxu1 %v5078_v63  ;;  %v4953_v63 = vcombine.high %v652_v55, %v660_v57  ;;  %v580_v48 = vld [vmem:[#allocation4 + $0x968] sm:$0xff] }
 0x168   : > { %3738 = vmatprep.subr.bf16.mxu1 %v5063_v1  ;;  %v388_v1 = vld [vmem:[#allocation4 + $0x368] sm:$0xff] }
 0x169   : > { %3698 = vmatpush2.bf16.msra.mxu0 %v4806_v7  ;;  %v4681_v7 = vcombine.high %v380_v0, %v388_v1  ;;  %v300_v53 = vld [vmem:[#allocation4 + $0xa8] sm:$0xff] }
 0x16a   : > { %3699 = vmatprep.subr.bf16.mxu0 %v4791_v9  ;;  %v364_v9 = vld [vmem:[#allocation4 + $0x2a8] sm:$0xff] }
 0x16b   : > { %3739 = vmatpush2.bf16.msra.mxu1 %v5062_v8  ;;  %v4937_v8 = vcombine.high %v636_v3, %v644_v4  ;;  %v308_v54 = vld [vmem:[#allocation4 + $0xe8] sm:$0xff] }
 0x16c   : > { %3740 = vmatprep.subr.bf16.mxu1 %v5047_v10  ;;  %v372_v10 = vld [vmem:[#allocation4 + $0x2e8] sm:$0xff] }
 0x16d   : > { %3700 = vmatpush2.bf16.msra.mxu0 %v4790_v15  ;;  %v4680_v15 = vcombine.low %v380_v0, %v388_v1  ;;  %v4665_v21 = vcombine.high %v364_v9, %v372_v10  ;;  %v4664_v31 = vcombine.low %v364_v9, %v372_v10  ;;  %v556_v55 = vld [vmem:[#allocation4 + $0x8a8] sm:$0xff] }
 0x16e   : > { %3701 = vmatprep.subr.bf16.mxu0 %v4775_v18  ;;  %v564_v57 = vld [vmem:[#allocation4 + $0x8e8] sm:$0xff] }
 0x16f   : > { %3741 = vmatpush2.bf16.msra.mxu1 %v5046_v16  ;;  %v284_v0 = vld [vmem:[#allocation4 + $0x28] sm:$0xff] }
 0x170   : > { %3742 = vmatprep.subr.bf16.mxu1 %v5031_v19  ;;  %v4936_v19 = vcombine.low %v636_v3, %v644_v4  ;;  %v292_v1 = vld [vmem:[#allocation4 + $0x68] sm:$0xff] }
 0x171   : > { %3702 = vmatpush2.bf16.msra.mxu0 %v4774_v25  ;;  %v356_v25 = vld [vmem:[#allocation4 + $0x268] sm:$0xff] }
 0x172   : > { %3703 = vmatprep.subr.bf16.mxu0 %v4759_v27  ;;  %v540_v3 = vld [vmem:[#allocation4 + $0x828] sm:$0xff] }
 0x173   : > { %3743 = vmatpush2.bf16.msra.mxu1 %v5030_v26  ;;  %v548_v4 = vld [vmem:[#allocation4 + $0x868] sm:$0xff] }
 0x174   : > { %3744 = vmatprep.subr.bf16.mxu1 %v5015_v28  ;;  %v604_v28 = vld [vmem:[#allocation4 + $0xa28] sm:$0xff] }
 0x175   : > { %3704 = vmatpush2.bf16.msra.mxu0 %v4758_v33  ;;  %v4920_v33 = vcombine.low %v620_v12, %v628_v13  ;;  %v524_v9 = vld [vmem:[#allocation4 + $0x7a8] sm:$0xff]  ;;  %v4584_v13 = vcombine.low %v284_v0, %v292_v1 }
 0x176   : > { %3705 = vmatprep.subr.bf16.mxu0 %v4743_v35  ;;  %v532_v10 = vld [vmem:[#allocation4 + $0x7e8] sm:$0xff] }
 0x177   : > { %3745 = vmatpush2.bf16.msra.mxu1 %v5014_v34  ;;  %v4649_v34 = vcombine.high %v348_v24, %v356_v25  ;;  %v788_v12 = vld [vmem:[#allocation4 + $0xfe8] sm:$0xff] }
 0x178   : > { %3746 = vmatprep.subr.bf16.mxu1 %v4999_v36  ;;  %v4905_v36 = vcombine.high %v604_v28, %v612_v29 }
 0x179   : > { %3706 = vmatpush2.bf16.msra.mxu0 %v4742_v41  ;;  %v4648_v41 = vcombine.low %v348_v24, %v356_v25  ;;  %v4824_v24 = vcombine.low %v524_v9, %v532_v10 }
 0x17a   : > { %3707 = vmatprep.subr.bf16.mxu0 %v4727_v43  ;;  %v4633_v43 = vcombine.high %v332_v37, %v340_v38 }
 0x17b   : > { %3747 = vmatpush2.bf16.msra.mxu1 %v4998_v42  ;;  %v4904_v42 = vcombine.low %v604_v28, %v612_v29  ;;  %v492_v29 = vld [vmem:[#allocation4 + $0x6a8] sm:$0xff] }
 0x17c   : > { %3748 = vmatprep.subr.bf16.mxu1 %v4983_v44  ;;  %v4889_v44 = vcombine.high %v588_v39, %v596_v40 }
 0x17d   : > { %3708 = vmatpush2.bf16.msra.mxu0 %v4726_v49  ;;  %v4632_v49 = vcombine.low %v332_v37, %v340_v38  ;;  %v476_v37 = vld [vmem:[#allocation4 + $0x628] sm:$0xff] }
 0x17e   : > { %3709 = vmatprep.subr.bf16.mxu0 %v4711_v51  ;;  %v4617_v51 = vcombine.high %v316_v45, %v324_v46  ;;  %v484_v38 = vld [vmem:[#allocation4 + $0x668] sm:$0xff] }
 0x17f   : > { %3749 = vmatpush2.bf16.msra.mxu1 %v4982_v50  ;;  %v4888_v50 = vcombine.low %v588_v39, %v596_v40  ;;  %v732_v39 = vld [vmem:[#allocation4 + $0xe28] sm:$0xff] }
 0x180   : > { %3750 = vmatprep.subr.bf16.mxu1 %v4967_v52  ;;  %v4873_v52 = vcombine.high %v572_v47, %v580_v48  ;;  %v740_v40 = vld [vmem:[#allocation4 + $0xe68] sm:$0xff] }
 0x181   : > { %3710 = vmatpush2.bf16.msra.mxu0 %v4710_v58  ;;  %v4616_v58 = vcombine.low %v316_v45, %v324_v46  ;;  %v460_v45 = vld [vmem:[#allocation4 + $0x5a8] sm:$0xff] }
 0x182   : > { %3761 = vmatprep.subr.bf16.mxu0 %v4697_v62  ;;  %v4601_v62 = vcombine.high %v300_v53, %v308_v54  ;;  %v468_v46 = vld [vmem:[#allocation4 + $0x5e8] sm:$0xff] }
 0x183   : > { %3751 = vmatpush2.bf16.msra.mxu1 %v4966_v61  ;;  %v4872_v61 = vcombine.low %v572_v47, %v580_v48  ;;  %v716_v47 = vld [vmem:[#allocation4 + $0xda8] sm:$0xff] }
 0x184   : > { %3802 = vmatprep.subr.bf16.mxu1 %v4953_v63  ;;  %v3467_v11 = vpop.f32.mrf.mxu0  ;;  %3712 = vmatmul.mubr.bf16.vlgmr.msra.gmra.mxu0 %v5538_v17  ;;  %v4857_v63 = vcombine.high %v556_v55, %v564_v57  ;;  %v724_v48 = vld [vmem:[#allocation4 + $0xde8] sm:$0xff] }
 0x185   : > { %3762 = vmatpush1.bf16.msra.mxu0 %v4696_v5  ;;  %3793 = vmatprep.mubr.bf16.mxu0 %v5532_v59  ;;  %v4600_v5 = vcombine.low %v300_v53, %v308_v54  ;;  %v444_v53 = vld [vmem:[#allocation4 + $0x528] sm:$0xff] }
 0x186   : > { %v3508_v14 = vpop.f32.mrf.mxu1  ;;  %3753 = vmatmul.mubr.bf16.vlgmr.msra.gmra.mxu1 %v5540_v20  ;;  %v3469_v18 = vpop.f32.mrf.mxu0  ;;  %3763 = vmatprep.subr.bf16.mxu0 %v4681_v7  ;;  %v4585_v7 = vcombine.high %v284_v0, %v292_v1  ;;  %v452_v54 = vld [vmem:[#allocation4 + $0x568] sm:$0xff] }
 0x187   : > { %v5564_v16 = vadd.f32 %v3508_v14, %v3467_v11  ;;  %3803 = vmatpush1.bf16.msra.mxu1 %v4952_v6  ;;  %3834 = vmatprep.mubr.bf16.mxu1 %v5534_v60  ;;  %v4856_v6 = vcombine.low %v556_v55, %v564_v57  ;;  %v780_v11 = vld [vmem:[#allocation4 + $0xfa8] sm:$0xff]  ;;  %v4840_v14 = vcombine.low %v540_v3, %v548_v4 }
 0x188   : > { %v3510_v22 = vpop.f32.mrf.mxu1  ;;  %3804 = vmatprep.subr.bf16.mxu1 %v4937_v8  ;;  %v3471_v27 = vpop.f32.mrf.mxu0  ;;  %v4841_v8 = vcombine.high %v540_v3, %v548_v4  ;;  %v5080_v25 = vcombine.low %v780_v11, %v788_v12  ;;  %v700_v55 = vld [vmem:[#allocation4 + $0xd28] sm:$0xff] }
 0x189   : > { %v5567_v26 = vadd.f32 %v3510_v22, %v3469_v18  ;;  %3764 = vmatpush1.bf16.msra.mxu0 %v4680_v15  ;;  %v4825_v15 = vcombine.high %v524_v9, %v532_v10  ;;  %v5081_v18 = vcombine.high %v780_v11, %v788_v12  ;;  %v764_v22 = vld [vmem:[#allocation4 + $0xf28] sm:$0xff] }
 0x18a   : > { %v3512_v30 = vpop.f32.mrf.mxu1  ;;  %v3472_v32 = vpop.f32.mrf.mxu0  ;;  %3765 = vmatprep.subr.bf16.mxu0 %v4665_v21  ;;  %v516_v21 = vld [vmem:[#allocation4 + $0x768] sm:$0xff] }
 0x18b   : > { %3805 = vmatpush1.bf16.msra.mxu1 %v4936_v19  ;;  %v508_v19 = vld [vmem:[#allocation4 + $0x728] sm:$0xff] }
 0x18c   : > { %v3513_v35 = vpop.f32.mrf.mxu1  ;;  %3806 = vmatprep.subr.bf16.mxu1 %v4921_v23  ;;  %v772_v23 = vld [vmem:[#allocation4 + $0xf68] sm:$0xff]  ;;  %v4809_v27 = vcombine.high %v508_v19, %v516_v21 }
 0x18d   : > { %3766 = vmatpush1.bf16.msra.mxu0 %v4664_v31  ;;  %v5065_v28 = vcombine.high %v764_v22, %v772_v23  ;;  %v500_v30 = vld [vmem:[#allocation4 + $0x6e8] sm:$0xff] }
 0x18e   : > { %3767 = vmatprep.subr.bf16.mxu0 %v4649_v34  ;;  %v748_v31 = vld [vmem:[#allocation4 + $0xea8] sm:$0xff]  ;;  %v5064_v34 = vcombine.low %v764_v22, %v772_v23  ;;  %v4793_v35 = vcombine.high %v492_v29, %v500_v30  ;;  %v653_v22 = vld [vmem:[#allocation4 + $0xbb0] sm:$0xff] }
 0x18f   : > { %3807 = vmatpush1.bf16.msra.mxu1 %v4920_v33  ;;  %v756_v32 = vld [vmem:[#allocation4 + $0xee8] sm:$0xff]  ;;  %v4808_v33 = vcombine.low %v508_v19, %v516_v21  ;;  %v397_v19 = vld [vmem:[#allocation4 + $0x3b0] sm:$0xff] }
 0x190   : > { %3808 = vmatprep.subr.bf16.mxu1 %v4905_v36  ;;  %v5049_v36 = vcombine.high %v748_v31, %v756_v32  ;;  %v708_v57 = vld [vmem:[#allocation4 + $0xd68] sm:$0xff]  ;;  %v405_v21 = vld [vmem:[#allocation4 + $0x3f0] sm:$0xff] }
 0x191   : > { %3768 = vmatpush1.bf16.msra.mxu0 %v4648_v41  ;;  %v4792_v41 = vcombine.low %v492_v29, %v500_v30  ;;  %v428_v0 = vld [vmem:[#allocation4 + $0x4a8] sm:$0xff]  ;;  %v661_v23 = vld [vmem:[#allocation4 + $0xbf0] sm:$0xff] }
 0x192   : > { %3769 = vmatprep.subr.bf16.mxu0 %v4633_v43  ;;  %v4777_v43 = vcombine.high %v476_v37, %v484_v38  ;;  %v436_v1 = vld [vmem:[#allocation4 + $0x4e8] sm:$0xff]  ;;  %v381_v29 = vld [vmem:[#allocation4 + $0x330] sm:$0xff] }
 0x193   : > { %3809 = vmatpush1.bf16.msra.mxu1 %v4904_v42  ;;  %v5048_v42 = vcombine.low %v748_v31, %v756_v32  ;;  %v684_v3 = vld [vmem:[#allocation4 + $0xca8] sm:$0xff]  ;;  %v389_v30 = vld [vmem:[#allocation4 + $0x370] sm:$0xff] }
 0x194   : > { %3810 = vmatprep.subr.bf16.mxu1 %v4889_v44  ;;  %v5033_v44 = vcombine.high %v732_v39, %v740_v40  ;;  %v692_v4 = vld [vmem:[#allocation4 + $0xce8] sm:$0xff]  ;;  %v637_v31 = vld [vmem:[#allocation4 + $0xb30] sm:$0xff] }
 0x195   : > { %3770 = vmatpush1.bf16.msra.mxu0 %v4632_v49  ;;  %v4776_v49 = vcombine.low %v476_v37, %v484_v38  ;;  %v412_v9 = vld [vmem:[#allocation4 + $0x428] sm:$0xff]  ;;  %v645_v32 = vld [vmem:[#allocation4 + $0xb70] sm:$0xff] }
 0x196   : > { %3771 = vmatprep.subr.bf16.mxu0 %v4617_v51  ;;  %v4761_v51 = vcombine.high %v460_v45, %v468_v46  ;;  %v420_v10 = vld [vmem:[#allocation4 + $0x468] sm:$0xff]  ;;  %v365_v37 = vld [vmem:[#allocation4 + $0x2b0] sm:$0xff] }
 0x197   : > { %3811 = vmatpush1.bf16.msra.mxu1 %v4888_v50  ;;  %v5032_v50 = vcombine.low %v732_v39, %v740_v40  ;;  %v668_v11 = vld [vmem:[#allocation4 + $0xc28] sm:$0xff]  ;;  %v373_v38 = vld [vmem:[#allocation4 + $0x2f0] sm:$0xff] }
 0x198   : > { %3812 = vmatprep.subr.bf16.mxu1 %v4873_v52  ;;  %v5017_v52 = vcombine.high %v716_v47, %v724_v48  ;;  %v676_v12 = vld [vmem:[#allocation4 + $0xc68] sm:$0xff]  ;;  %v621_v40 = vld [vmem:[#allocation4 + $0xab0] sm:$0xff] }
 0x199   : > { %3772 = vmatpush1.bf16.msra.mxu0 %v4616_v58  ;;  %v4760_v58 = vcombine.low %v460_v45, %v468_v46  ;;  %v4938_v46 = vcombine.low %v637_v31, %v645_v32 }
 0x19a   : > { %3773 = vmatprep.subr.bf16.mxu0 %v4601_v62  ;;  %v4745_v62 = vcombine.high %v444_v53, %v452_v54 }
 0x19b   : > { %3813 = vmatpush1.bf16.msra.mxu1 %v4872_v61  ;;  %v5016_v61 = vcombine.low %v716_v47, %v724_v48  ;;  %v4667_v47 = vcombine.high %v365_v37, %v373_v38 }
 0x19c   : > { %3814 = vmatprep.subr.bf16.mxu1 %v4857_v63  ;;  %v5001_v63 = vcombine.high %v700_v55, %v708_v57 }
 0x19d   : > { %3774 = vmatpush1.bf16.msra.mxu0 %v4600_v5  ;;  %v4744_v5 = vcombine.low %v444_v53, %v452_v54  ;;  %v605_v54 = vld [vmem:[#allocation4 + $0xa30] sm:$0xff] }
 0x19e   : > { %3775 = vmatprep.subr.bf16.mxu0 %v4585_v7  ;;  %v4729_v7 = vcombine.high %v428_v0, %v436_v1 }
 0x19f   : > { %3815 = vmatpush1.bf16.msra.mxu1 %v4856_v6  ;;  %v5000_v6 = vcombine.low %v700_v55, %v708_v57  ;;  %v613_v55 = vld [vmem:[#allocation4 + $0xa70] sm:$0xff] }
 0x1a0   : > { %3816 = vmatprep.subr.bf16.mxu1 %v4841_v8  ;;  %v4985_v8 = vcombine.high %v684_v3, %v692_v4 }
 0x1a1   : > { %3776 = vmatpush1.bf16.msra.mxu0 %v4584_v13  ;;  %v4728_v13 = vcombine.low %v428_v0, %v436_v1  ;;  %v4907_v1 = vcombine.high %v605_v54, %v613_v55 }
 0x1a2   : > { %3777 = vmatprep.subr.bf16.mxu0 %v4825_v15  ;;  %v4713_v15 = vcombine.high %v412_v9, %v420_v10 }
 0x1a3   : > { %3817 = vmatpush1.bf16.msra.mxu1 %v4840_v14  ;;  %v4984_v14 = vcombine.low %v684_v3, %v692_v4  ;;  %v333_v3 = vld [vmem:[#allocation4 + $0x1b0] sm:$0xff] }
 0x1a4   : > { %3818 = vmatprep.subr.bf16.mxu1 %v5081_v18  ;;  %v4969_v18 = vcombine.high %v668_v11, %v676_v12  ;;  %v341_v4 = vld [vmem:[#allocation4 + $0x1f0] sm:$0xff] }
 0x1a5   : > { %3778 = vmatpush2.bf16.msra.mxu0 %v4824_v24  ;;  %v4712_v24 = vcombine.low %v412_v9, %v420_v10  ;;  %v4635_v9 = vcombine.high %v333_v3, %v341_v4 }
 0x1a6   : > { %3779 = vmatprep.subr.bf16.mxu0 %v4809_v27  ;;  %v4699_v27 = vcombine.high %v397_v19, %v405_v21 }
 0x1a7   : > { %3819 = vmatpush2.bf16.msra.mxu1 %v5080_v25  ;;  %v4968_v25 = vcombine.low %v668_v11, %v676_v12  ;;  %v317_v11 = vld [vmem:[#allocation4 + $0x130] sm:$0xff] }
 0x1a8   : > { %3820 = vmatprep.subr.bf16.mxu1 %v5065_v28  ;;  %v4955_v28 = vcombine.high %v653_v22, %v661_v23  ;;  %v325_v12 = vld [vmem:[#allocation4 + $0x170] sm:$0xff] }
 0x1a9   : > { %3780 = vmatpush2.bf16.msra.mxu0 %v4808_v33  ;;  %v4698_v33 = vcombine.low %v397_v19, %v405_v21  ;;  %v4619_v19 = vcombine.high %v317_v11, %v325_v12 }
 0x1aa   : > { %3781 = vmatprep.subr.bf16.mxu0 %v4793_v35  ;;  %v4683_v35 = vcombine.high %v381_v29, %v389_v30 }
 0x1ab   : > { %3821 = vmatpush2.bf16.msra.mxu1 %v5064_v34  ;;  %v4954_v34 = vcombine.low %v653_v22, %v661_v23  ;;  %v301_v22 = vld [vmem:[#allocation4 + $0xb0] sm:$0xff] }
 0x1ac   : > { %3822 = vmatprep.subr.bf16.mxu1 %v5049_v36  ;;  %v4939_v36 = vcombine.high %v637_v31, %v645_v32  ;;  %v309_v23 = vld [vmem:[#allocation4 + $0xf0] sm:$0xff] }
 0x1ad   : > { %3782 = vmatpush2.bf16.msra.mxu0 %v4792_v41  ;;  %v629_v41 = vld [vmem:[#allocation4 + $0xaf0] sm:$0xff] }
 0x1ae   : > { %3783 = vmatprep.subr.bf16.mxu0 %v4777_v43  ;;  %v4682_v43 = vcombine.low %v381_v29, %v389_v30  ;;  %v4603_v29 = vcombine.high %v301_v22, %v309_v23  ;;  %v285_v31 = vld [vmem:[#allocation4 + $0x30] sm:$0xff] }
 0x1af   : > { %3823 = vmatpush2.bf16.msra.mxu1 %v5048_v42  ;;  %v293_v32 = vld [vmem:[#allocation4 + $0x70] sm:$0xff] }
 0x1b0   : > { %3824 = vmatprep.subr.bf16.mxu1 %v5033_v44 }
 0x1b1   : > { %3784 = vmatpush2.bf16.msra.mxu0 %v4776_v49  ;;  %v4923_v49 = vcombine.high %v621_v40, %v629_v41 }
 0x1b2   : > { %3785 = vmatprep.subr.bf16.mxu0 %v4761_v51  ;;  %v357_v51 = vld [vmem:[#allocation4 + $0x270] sm:$0xff] }
 0x1b3   : > { %3825 = vmatpush2.bf16.msra.mxu1 %v5032_v50  ;;  %v349_v50 = vld [vmem:[#allocation4 + $0x230] sm:$0xff] }
 0x1b4   : > { %3826 = vmatprep.subr.bf16.mxu1 %v5017_v52 }
 0x1b5   : > { %3786 = vmatpush2.bf16.msra.mxu0 %v4760_v58  ;;  %v4666_v58 = vcombine.low %v365_v37, %v373_v38  ;;  %v4587_v37 = vcombine.high %v285_v31, %v293_v32 }
 0x1b6   : > { %3787 = vmatprep.subr.bf16.mxu0 %v4745_v62  ;;  %v4922_v62 = vcombine.low %v621_v40, %v629_v41  ;;  %v533_v40 = vld [vmem:[#allocation4 + $0x7f0] sm:$0xff] }
 0x1b7   : > { %3827 = vmatpush2.bf16.msra.mxu1 %v5016_v61  ;;  %v781_v41 = vld [vmem:[#allocation4 + $0xfb0] sm:$0xff] }
 0x1b8   : > { %3828 = vmatprep.subr.bf16.mxu1 %v5001_v63  ;;  %v4651_v63 = vcombine.high %v349_v50, %v357_v51 }
 0x1b9   : > { %3788 = vmatpush2.bf16.msra.mxu0 %v4744_v5  ;;  %v589_v5 = vld [vmem:[#allocation4 + $0x9b0] sm:$0xff] }
 0x1ba   : > { %3789 = vmatprep.subr.bf16.mxu0 %v4729_v7  ;;  %v4650_v7 = vcombine.low %v349_v50, %v357_v51  ;;  %v765_v50 = vld [vmem:[#allocation4 + $0xf30] sm:$0xff] }
 0x1bb   : > { %3829 = vmatpush2.bf16.msra.mxu1 %v5000_v6  ;;  %v597_v6 = vld [vmem:[#allocation4 + $0x9f0] sm:$0xff] }
 0x1bc   : > { %3830 = vmatprep.subr.bf16.mxu1 %v4985_v8  ;;  %v4906_v8 = vcombine.low %v605_v54, %v613_v55  ;;  %v4891_v10 = vcombine.high %v589_v5, %v597_v6  ;;  %v773_v51 = vld [vmem:[#allocation4 + $0xf70] sm:$0xff] }
 0x1bd   : > { %3790 = vmatpush2.bf16.msra.mxu0 %v4728_v13  ;;  %v573_v13 = vld [vmem:[#allocation4 + $0x930] sm:$0xff] }
 0x1be   : > { %3791 = vmatprep.subr.bf16.mxu0 %v4713_v15  ;;  %v4634_v15 = vcombine.low %v333_v3, %v341_v4 }
 0x1bf   : > { %3831 = vmatpush2.bf16.msra.mxu1 %v4984_v14  ;;  %v581_v14 = vld [vmem:[#allocation4 + $0x970] sm:$0xff] }
 0x1c0   : > { %3832 = vmatprep.subr.bf16.mxu1 %v4969_v18  ;;  %v4890_v18 = vcombine.low %v589_v5, %v597_v6  ;;  %v4875_v21 = vcombine.high %v573_v13, %v581_v14  ;;  %v477_v5 = vld [vmem:[#allocation4 + $0x630] sm:$0xff] }
 0x1c1   : > { %3792 = vmatpush2.bf16.msra.mxu0 %v4712_v24  ;;  %v557_v24 = vld [vmem:[#allocation4 + $0x8b0] sm:$0xff] }
 0x1c2   : > { %3843 = vmatprep.subr.bf16.mxu0 %v4699_v27  ;;  %v4618_v27 = vcombine.low %v317_v11, %v325_v12  ;;  %v485_v6 = vld [vmem:[#allocation4 + $0x670] sm:$0xff] }
 0x1c3   : > { %3833 = vmatpush2.bf16.msra.mxu1 %v4968_v25  ;;  %v565_v25 = vld [vmem:[#allocation4 + $0x8f0] sm:$0xff]  ;;  %v4779_v11 = vcombine.high %v477_v5, %v485_v6 }
 0x1c4   : > { %3884 = vmatprep.subr.bf16.mxu1 %v4955_v28  ;;  %v3549_v39 = vpop.f32.mrf.mxu0  ;;  %3794 = vmatmul.mubr.bf16.vlgmr.msra.gmra.mxu0 %v5538_v17  ;;  %v4874_v28 = vcombine.low %v573_v13, %v581_v14  ;;  %v4859_v30 = vcombine.high %v557_v24, %v565_v25  ;;  %v461_v13 = vld [vmem:[#allocation4 + $0x5b0] sm:$0xff] }
 0x1c5   : > { %3844 = vmatpush1.bf16.msra.mxu0 %v4698_v33  ;;  %3875 = vmatprep.mubr.bf16.mxu0 %v5532_v59  ;;  %v541_v33 = vld [vmem:[#allocation4 + $0x830] sm:$0xff] }
 0x1c6   : > { %v3590_v42 = vpop.f32.mrf.mxu1  ;;  %3835 = vmatmul.mubr.bf16.vlgmr.msra.gmra.mxu1 %v5540_v20  ;;  %v3551_v45 = vpop.f32.mrf.mxu0  ;;  %3845 = vmatprep.subr.bf16.mxu0 %v4683_v35  ;;  %v4602_v35 = vcombine.low %v301_v22, %v309_v23  ;;  %v469_v14 = vld [vmem:[#allocation4 + $0x5f0] sm:$0xff] }
 0x1c7   : > { %v5572_v44 = vadd.f32 %v3590_v42, %v3549_v39  ;;  %3885 = vmatpush1.bf16.msra.mxu1 %v4954_v34  ;;  %3916 = vmatprep.mubr.bf16.mxu1 %v5534_v60  ;;  %v549_v34 = vld [vmem:[#allocation4 + $0x870] sm:$0xff]  ;;  %v4763_v22 = vcombine.high %v461_v13, %v469_v14 }
 0x1c8   : > { %v3592_v48 = vpop.f32.mrf.mxu1  ;;  %3886 = vmatprep.subr.bf16.mxu1 %v4939_v36  ;;  %v3553_v53 = vpop.f32.mrf.mxu0  ;;  %v4858_v36 = vcombine.low %v557_v24, %v565_v25  ;;  %v4843_v38 = vcombine.high %v541_v33, %v549_v34  ;;  %v525_v39 = vld [vmem:[#allocation4 + $0x7b0] sm:$0xff] }
 0x1c9   : > { %v5575_v52 = vadd.f32 %v3592_v48, %v3551_v45  ;;  %3846 = vmatpush1.bf16.msra.mxu0 %v4682_v43  ;;  %v789_v42 = vld [vmem:[#allocation4 + $0xff0] sm:$0xff]  ;;  %v4586_v43 = vcombine.low %v285_v31, %v293_v32  ;;  %v4842_v45 = vcombine.low %v541_v33, %v549_v34  ;;  %v4826_v53 = vcombine.low %v525_v39, %v533_v40 }
 0x1ca   : > { %v3594_v57 = vpop.f32.mrf.mxu1  ;;  %v3554_v61 = vpop.f32.mrf.mxu0  ;;  %3847 = vmatprep.subr.bf16.mxu0 %v4667_v47  ;;  %v5083_v47 = vcombine.high %v781_v41, %v789_v42  ;;  %v509_v48 = vld [vmem:[#allocation4 + $0x730] sm:$0xff]  ;;  %v5082_v54 = vcombine.low %v781_v41, %v789_v42 }
 0x1cb   : > { %3887 = vmatpush1.bf16.msra.mxu1 %v4938_v46  ;;  %v4827_v46 = vcombine.high %v525_v39, %v533_v40  ;;  %v5067_v57 = vcombine.high %v765_v50, %v773_v51  ;;  %v501_v61 = vld [vmem:[#allocation4 + $0x6f0] sm:$0xff] }
 0x1cc   : > { %v3595_v0 = vpop.f32.mrf.mxu1  ;;  %3888 = vmatprep.subr.bf16.mxu1 %v4923_v49  ;;  %v517_v49 = vld [vmem:[#allocation4 + $0x770] sm:$0xff] }
 0x1cd   : > { %3848 = vmatpush1.bf16.msra.mxu0 %v4666_v58  ;;  %v4811_v55 = vcombine.high %v509_v48, %v517_v49  ;;  %v493_v58 = vld [vmem:[#allocation4 + $0x6b0] sm:$0xff]  ;;  %v4810_v0 = vcombine.low %v509_v48, %v517_v49 }
 0x1ce   : > { %3849 = vmatprep.subr.bf16.mxu0 %v4651_v63  ;;  %v757_v63 = vld [vmem:[#allocation4 + $0xef0] sm:$0xff]  ;;  %v4795_v3 = vcombine.high %v493_v58, %v501_v61 }
 0x1cf   : > { %3889 = vmatpush1.bf16.msra.mxu1 %v4922_v62  ;;  %v749_v62 = vld [vmem:[#allocation4 + $0xeb0] sm:$0xff] }
 0x1d0   : > { %3890 = vmatprep.subr.bf16.mxu1 %v4907_v1  ;;  %v5066_v1 = vcombine.low %v765_v50, %v773_v51  ;;  %v5051_v4 = vcombine.high %v749_v62, %v757_v63  ;;  %v445_v24 = vld [vmem:[#allocation4 + $0x530] sm:$0xff]  ;;  %v398_v50 = vld [vmem:[#allocation4 + $0x3b8] sm:$0xff] }
 0x1d1   : > { %3850 = vmatpush1.bf16.msra.mxu0 %v4650_v7  ;;  %v733_v7 = vld [vmem:[#allocation4 + $0xe30] sm:$0xff]  ;;  %v406_v51 = vld [vmem:[#allocation4 + $0x3f8] sm:$0xff] }
 0x1d2   : > { %3851 = vmatprep.subr.bf16.mxu0 %v4635_v9  ;;  %v4794_v9 = vcombine.low %v493_v58, %v501_v61  ;;  %v453_v25 = vld [vmem:[#allocation4 + $0x570] sm:$0xff]  ;;  %v4701_v58 = vcombine.high %v398_v50, %v406_v51 }
 0x1d3   : > { %3891 = vmatpush1.bf16.msra.mxu1 %v4906_v8  ;;  %v741_v8 = vld [vmem:[#allocation4 + $0xe70] sm:$0xff]  ;;  %v4747_v31 = vcombine.high %v445_v24, %v453_v25 }
 0x1d4   : > { %3892 = vmatprep.subr.bf16.mxu1 %v4891_v10  ;;  %v5050_v10 = vcombine.low %v749_v62, %v757_v63  ;;  %v5035_v12 = vcombine.high %v733_v7, %v741_v8  ;;  %v429_v33 = vld [vmem:[#allocation4 + $0x4b0] sm:$0xff]  ;;  %v382_v62 = vld [vmem:[#allocation4 + $0x338] sm:$0xff] }
 0x1d5   : > { %3852 = vmatpush1.bf16.msra.mxu0 %v4634_v15  ;;  %v717_v15 = vld [vmem:[#allocation4 + $0xdb0] sm:$0xff]  ;;  %v390_v63 = vld [vmem:[#allocation4 + $0x378] sm:$0xff] }
 0x1d6   : > { %3853 = vmatprep.subr.bf16.mxu0 %v4619_v19  ;;  %v4778_v19 = vcombine.low %v477_v5, %v485_v6  ;;  %v437_v34 = vld [vmem:[#allocation4 + $0x4f0] sm:$0xff]  ;;  %v4685_v5 = vcombine.high %v382_v62, %v390_v63 }
 0x1d7   : > { %3893 = vmatpush1.bf16.msra.mxu1 %v4890_v18  ;;  %v725_v18 = vld [vmem:[#allocation4 + $0xdf0] sm:$0xff]  ;;  %v4731_v39 = vcombine.high %v429_v33, %v437_v34 }
 0x1d8   : > { %3894 = vmatprep.subr.bf16.mxu1 %v4875_v21  ;;  %v5034_v21 = vcombine.low %v733_v7, %v741_v8  ;;  %v5019_v23 = vcombine.high %v717_v15, %v725_v18  ;;  %v413_v41 = vld [vmem:[#allocation4 + $0x430] sm:$0xff]  ;;  %v366_v7 = vld [vmem:[#allocation4 + $0x2b8] sm:$0xff] }
 0x1d9   : > { %3854 = vmatpush1.bf16.msra.mxu0 %v4618_v27  ;;  %v701_v27 = vld [vmem:[#allocation4 + $0xd30] sm:$0xff]  ;;  %v374_v8 = vld [vmem:[#allocation4 + $0x2f8] sm:$0xff] }
 0x1da   : > { %3855 = vmatprep.subr.bf16.mxu0 %v4603_v29  ;;  %v4762_v29 = vcombine.low %v461_v13, %v469_v14  ;;  %v421_v42 = vld [vmem:[#allocation4 + $0x470] sm:$0xff]  ;;  %v4684_v13 = vcombine.low %v382_v62, %v390_v63 }
 0x1db   : > { %3895 = vmatpush1.bf16.msra.mxu1 %v4874_v28  ;;  %v709_v28 = vld [vmem:[#allocation4 + $0xd70] sm:$0xff]  ;;  %v4715_v48 = vcombine.high %v413_v41, %v421_v42 }
 0x1dc   : > { %3896 = vmatprep.subr.bf16.mxu1 %v4859_v30  ;;  %v5018_v30 = vcombine.low %v717_v15, %v725_v18  ;;  %v5003_v32 = vcombine.high %v701_v27, %v709_v28 }
 0x1dd   : > { %3856 = vmatpush1.bf16.msra.mxu0 %v4602_v35  ;;  %v685_v35 = vld [vmem:[#allocation4 + $0xcb0] sm:$0xff] }
 0x1de   : > { %3857 = vmatprep.subr.bf16.mxu0 %v4587_v37  ;;  %v4746_v37 = vcombine.low %v445_v24, %v453_v25  ;;  %v358_v24 = vld [vmem:[#allocation4 + $0x278] sm:$0xff] }
 0x1df   : > { %3897 = vmatpush1.bf16.msra.mxu1 %v4858_v36  ;;  %v693_v36 = vld [vmem:[#allocation4 + $0xcf0] sm:$0xff] }
 0x1e0   : > { %3898 = vmatprep.subr.bf16.mxu1 %v4843_v38  ;;  %v5002_v38 = vcombine.low %v701_v27, %v709_v28  ;;  %v4987_v40 = vcombine.high %v685_v35, %v693_v36  ;;  %v606_v28 = vld [vmem:[#allocation4 + $0xa38] sm:$0xff] }
 0x1e1   : > { %3858 = vmatpush1.bf16.msra.mxu0 %v4586_v43  ;;  %v669_v43 = vld [vmem:[#allocation4 + $0xc30] sm:$0xff] }
 0x1e2   : > { %3859 = vmatprep.subr.bf16.mxu0 %v4827_v46  ;;  %v4730_v46 = vcombine.low %v429_v33, %v437_v34 }
 0x1e3   : > { %3899 = vmatpush1.bf16.msra.mxu1 %v4842_v45  ;;  %v677_v45 = vld [vmem:[#allocation4 + $0xc70] sm:$0xff] }
 0x1e4   : > { %3900 = vmatprep.subr.bf16.mxu1 %v5083_v47  ;;  %v4986_v47 = vcombine.low %v685_v35, %v693_v36  ;;  %v4971_v49 = vcombine.high %v669_v43, %v677_v45 }
 0x1e5   : > { %3860 = vmatpush2.bf16.msra.mxu0 %v4826_v53  ;;  %v654_v53 = vld [vmem:[#allocation4 + $0xbb8] sm:$0xff] }
 0x1e6   : > { %3861 = vmatprep.subr.bf16.mxu0 %v4811_v55  ;;  %v4714_v55 = vcombine.low %v413_v41, %v421_v42 }
 0x1e7   : > { %3901 = vmatpush2.bf16.msra.mxu1 %v5082_v54  ;;  %v662_v54 = vld [vmem:[#allocation4 + $0xbf8] sm:$0xff] }
 0x1e8   : > { %3902 = vmatprep.subr.bf16.mxu1 %v5067_v57  ;;  %v4970_v57 = vcombine.low %v669_v43, %v677_v45  ;;  %v4957_v61 = vcombine.high %v654_v53, %v662_v54  ;;  %v318_v43 = vld [vmem:[#allocation4 + $0x138] sm:$0xff] }
 0x1e9   : > { %3862 = vmatpush2.bf16.msra.mxu0 %v4810_v0  ;;  %v638_v0 = vld [vmem:[#allocation4 + $0xb38] sm:$0xff] }
 0x1ea   : > { %3863 = vmatprep.subr.bf16.mxu0 %v4795_v3  ;;  %v4700_v3 = vcombine.low %v398_v50, %v406_v51  ;;  %v326_v45 = vld [vmem:[#allocation4 + $0x178] sm:$0xff] }
 0x1eb   : > { %3903 = vmatpush2.bf16.msra.mxu1 %v5066_v1  ;;  %v646_v1 = vld [vmem:[#allocation4 + $0xb78] sm:$0xff]  ;;  %v4621_v50 = vcombine.high %v318_v43, %v326_v45 }
 0x1ec   : > { %3904 = vmatprep.subr.bf16.mxu1 %v5051_v4  ;;  %v4956_v4 = vcombine.low %v654_v53, %v662_v54  ;;  %v4941_v6 = vcombine.high %v638_v0, %v646_v1  ;;  %v4940_v18 = vcombine.low %v638_v0, %v646_v1  ;;  %v302_v53 = vld [vmem:[#allocation4 + $0xb8] sm:$0xff] }
 0x1ed   : > { %3864 = vmatpush2.bf16.msra.mxu0 %v4794_v9  ;;  %v310_v54 = vld [vmem:[#allocation4 + $0xf8] sm:$0xff] }
 0x1ee   : > { %3865 = vmatprep.subr.bf16.mxu0 %v4779_v11  ;;  %v630_v11 = vld [vmem:[#allocation4 + $0xaf8] sm:$0xff]  ;;  %v4605_v62 = vcombine.high %v302_v53, %v310_v54 }
 0x1ef   : > { %3905 = vmatpush2.bf16.msra.mxu1 %v5050_v10  ;;  %v622_v10 = vld [vmem:[#allocation4 + $0xab8] sm:$0xff] }
 0x1f0   : > { %3906 = vmatprep.subr.bf16.mxu1 %v5035_v12  ;;  %v4924_v33 = vcombine.low %v622_v10, %v630_v11  ;;  %v286_v0 = vld [vmem:[#allocation4 + $0x38] sm:$0xff] }
 0x1f1   : > { %3866 = vmatpush2.bf16.msra.mxu0 %v4778_v19  ;;  %v4669_v19 = vcombine.high %v366_v7, %v374_v8  ;;  %v294_v1 = vld [vmem:[#allocation4 + $0x78] sm:$0xff] }
 0x1f2   : > { %3867 = vmatprep.subr.bf16.mxu0 %v4763_v22  ;;  %v4925_v22 = vcombine.high %v622_v10, %v630_v11  ;;  %v534_v10 = vld [vmem:[#allocation4 + $0x7f8] sm:$0xff] }
 0x1f3   : > { %3907 = vmatpush2.bf16.msra.mxu1 %v5034_v21  ;;  %v782_v11 = vld [vmem:[#allocation4 + $0xfb8] sm:$0xff] }
 0x1f4   : > { %3908 = vmatprep.subr.bf16.mxu1 %v5019_v23  ;;  %v350_v23 = vld [vmem:[#allocation4 + $0x238] sm:$0xff] }
 0x1f5   : > { %3868 = vmatpush2.bf16.msra.mxu0 %v4762_v29  ;;  %v614_v29 = vld [vmem:[#allocation4 + $0xa78] sm:$0xff]  ;;  %v4653_v34 = vcombine.high %v350_v23, %v358_v24 }
 0x1f6   : > { %3869 = vmatprep.subr.bf16.mxu0 %v4747_v31  ;;  %v4668_v31 = vcombine.low %v366_v7, %v374_v8  ;;  %v4909_v36 = vcombine.high %v606_v28, %v614_v29  ;;  %v4589_v7 = vcombine.high %v286_v0, %v294_v1 }
 0x1f7   : > { %3909 = vmatpush2.bf16.msra.mxu1 %v5018_v30 }
 0x1f8   : > { %3910 = vmatprep.subr.bf16.mxu1 %v5003_v32 }
 0x1f9   : > { %3870 = vmatpush2.bf16.msra.mxu0 %v4746_v37  ;;  %v334_v37 = vld [vmem:[#allocation4 + $0x1b8] sm:$0xff] }
 0x1fa   : > { %3871 = vmatprep.subr.bf16.mxu0 %v4731_v39  ;;  %v598_v39 = vld [vmem:[#allocation4 + $0x9f8] sm:$0xff] }
 0x1fb   : > { %3911 = vmatpush2.bf16.msra.mxu1 %v5002_v38  ;;  %v590_v38 = vld [vmem:[#allocation4 + $0x9b8] sm:$0xff] }
 0x1fc   : > { %3912 = vmatprep.subr.bf16.mxu1 %v4987_v40  ;;  %v4652_v40 = vcombine.low %v350_v23, %v358_v24  ;;  %v4893_v42 = vcombine.high %v590_v38, %v598_v39  ;;  %v766_v23 = vld [vmem:[#allocation4 + $0xf38] sm:$0xff] }
 0x1fd   : > { %3872 = vmatpush2.bf16.msra.mxu0 %v4730_v46  ;;  %v574_v46 = vld [vmem:[#allocation4 + $0x938] sm:$0xff] }
 0x1fe   : > { %3873 = vmatprep.subr.bf16.mxu0 %v4715_v48  ;;  %v774_v24 = vld [vmem:[#allocation4 + $0xf78] sm:$0xff] }
 0x1ff   : > { %3913 = vmatpush2.bf16.msra.mxu1 %v4986_v47  ;;  %v582_v47 = vld [vmem:[#allocation4 + $0x978] sm:$0xff] }
 0x200   : > { %3914 = vmatprep.subr.bf16.mxu1 %v4971_v49  ;;  %v4892_v49 = vcombine.low %v590_v38, %v598_v39  ;;  %v4877_v51 = vcombine.high %v574_v46, %v582_v47  ;;  %v478_v38 = vld [vmem:[#allocation4 + $0x638] sm:$0xff] }
 0x201   : > { %3874 = vmatpush2.bf16.msra.mxu0 %v4714_v55  ;;  %v558_v55 = vld [vmem:[#allocation4 + $0x8b8] sm:$0xff] }
 0x202   : > { %3925 = vmatprep.subr.bf16.mxu0 %v4701_v58  ;;  %v4620_v58 = vcombine.low %v318_v43, %v326_v45  ;;  %v486_v39 = vld [vmem:[#allocation4 + $0x678] sm:$0xff]  ;;  %v264_v45 = vld [vmem:[%s5523_s19 + $0x28] sm:$0xff] }
 0x203   : > { %3915 = vmatpush2.bf16.msra.mxu1 %v4970_v57  ;;  %v566_v57 = vld [vmem:[#allocation4 + $0x8f8] sm:$0xff] }
 0x204   : > { %3966 = vmatprep.subr.bf16.mxu1 %v4957_v61  ;;  %v3631_v9 = vpop.f32.mrf.mxu0  ;;  %3876 = vmatmul.mubr.bf16.vlgmr.msra.gmra.mxu0 %v5538_v17  ;;  %v4876_v61 = vcombine.low %v574_v46, %v582_v47  ;;  %v4861_v63 = vcombine.high %v558_v55, %v566_v57  ;;  %v4781_v47 = vcombine.high %v478_v38, %v486_v39 }
 0x205   : > { %3926 = vmatpush1.bf16.msra.mxu0 %v4700_v3  ;;  %3957 = vmatprep.mubr.bf16.mxu0 %v5532_v59  ;;  %v342_v59 = vld [vmem:[#allocation4 + $0x1f8] sm:$0xff] }
 0x206   : > { %v3672_v12 = vpop.f32.mrf.mxu1  ;;  %3917 = vmatmul.mubr.bf16.vlgmr.msra.gmra.mxu1 %v5540_v20  ;;  %v3633_v15 = vpop.f32.mrf.mxu0  ;;  %3927 = vmatprep.subr.bf16.mxu0 %v4685_v5  ;;  %v4637_v41 = vcombine.high %v334_v37, %v342_v59  ;;  %v4636_v48 = vcombine.low %v334_v37, %v342_v59  ;;  %v542_v3 = vld [vmem:[#allocation4 + $0x838] sm:$0xff]  ;;  %v4604_v5 = vcombine.low %v302_v53, %v310_v54  ;;  %v260_v53 = vld [vmem:[%s5523_s19 + $0x8] sm:$0xff] }
 0x207   : > { %v5580_v14 = vadd.f32 %v3672_v12, %v3631_v9  ;;  %3967 = vmatpush1.bf16.msra.mxu1 %v4956_v4  ;;  %3998 = vmatprep.mubr.bf16.mxu1 %v5534_v60  ;;  %v4908_v60 = vcombine.low %v606_v28, %v614_v29  ;;  %v550_v4 = vld [vmem:[#allocation4 + $0x878] sm:$0xff] }
 0x208   : > { %v3674_v21 = vpop.f32.mrf.mxu1  ;;  %3968 = vmatprep.subr.bf16.mxu1 %v4941_v6  ;;  %v3635_v27 = vpop.f32.mrf.mxu0  ;;  %v4860_v6 = vcombine.low %v558_v55, %v566_v57  ;;  %v4845_v8 = vcombine.high %v542_v3, %v550_v4  ;;  %v526_v9 = vld [vmem:[#allocation4 + $0x7b8] sm:$0xff] }
 0x209   : > { %v5583_v25 = vadd.f32 %v3674_v21, %v3633_v15  ;;  %3928 = vmatpush1.bf16.msra.mxu0 %v4684_v13  ;;  %v790_v12 = vld [vmem:[#allocation4 + $0xff8] sm:$0xff]  ;;  %v4588_v13 = vcombine.low %v286_v0, %v294_v1  ;;  %v4844_v15 = vcombine.low %v542_v3, %v550_v4  ;;  %v4828_v27 = vcombine.low %v526_v9, %v534_v10 }
 0x20a   : > { %v3676_v30 = vpop.f32.mrf.mxu1  ;;  %v3636_v32 = vpop.f32.mrf.mxu0  ;;  %3929 = vmatprep.subr.bf16.mxu0 %v4669_v19  ;;  %v5085_v19 = vcombine.high %v782_v11, %v790_v12  ;;  %v510_v21 = vld [vmem:[#allocation4 + $0x738] sm:$0xff]  ;;  %v5084_v28 = vcombine.low %v782_v11, %v790_v12 }
 0x20b   : > { %3969 = vmatpush1.bf16.msra.mxu1 %v4940_v18  ;;  %v4829_v18 = vcombine.high %v526_v9, %v534_v10  ;;  %v5069_v30 = vcombine.high %v766_v23, %v774_v24  ;;  %v502_v32 = vld [vmem:[#allocation4 + $0x6f8] sm:$0xff] }
 0x20c   : > { %v3677_v35 = vpop.f32.mrf.mxu1  ;;  %3970 = vmatprep.subr.bf16.mxu1 %v4925_v22  ;;  %v518_v22 = vld [vmem:[#allocation4 + $0x778] sm:$0xff] }
 0x20d   : > { %3930 = vmatpush1.bf16.msra.mxu0 %v4668_v31  ;;  %v4813_v29 = vcombine.high %v510_v21, %v518_v22  ;;  %v494_v31 = vld [vmem:[#allocation4 + $0x6b8] sm:$0xff]  ;;  %v4812_v35 = vcombine.low %v510_v21, %v518_v22 }
 0x20e   : > { %3931 = vmatprep.subr.bf16.mxu0 %v4653_v34  ;;  %v758_v34 = vld [vmem:[#allocation4 + $0xef8] sm:$0xff]  ;;  %v4797_v37 = vcombine.high %v494_v31, %v502_v32  ;;  %v4796_v43 = vcombine.low %v494_v31, %v502_v32 }
 0x20f   : > { %3971 = vmatpush1.bf16.msra.mxu1 %v4924_v33  ;;  %v750_v33 = vld [vmem:[#allocation4 + $0xeb8] sm:$0xff] }
 0x210   : > { %3972 = vmatprep.subr.bf16.mxu1 %v4909_v36  ;;  %v5068_v36 = vcombine.low %v766_v23, %v774_v24  ;;  %v5053_v59 = vcombine.high %v750_v33, %v758_v34  ;;  %v5052_v46 = vcombine.low %v750_v33, %v758_v34  ;;  %v718_v55 = vld [vmem:[#allocation4 + $0xdb8] sm:$0xff] }
 0x211   : > { %3932 = vmatpush1.bf16.msra.mxu0 %v4652_v40  ;;  %v259_v40 = vld [vmem:[%s5523_s19] sm:$0xff]  ;;  %v726_v57 = vld [vmem:[#allocation4 + $0xdf8] sm:$0xff] }
 0x212   : > { %3933 = vmatprep.subr.bf16.mxu0 %v4637_v41  ;;  %v742_v41 = vld [vmem:[#allocation4 + $0xe78] sm:$0xff]  ;;  %v5021_v1 = vcombine.high %v718_v55, %v726_v57 }
 0x213   : > { %3973 = vmatpush1.bf16.msra.mxu1 %v4908_v60  ;;  %v734_v60 = vld [vmem:[#allocation4 + $0xe38] sm:$0xff] }
 0x214   : > { %3974 = vmatprep.subr.bf16.mxu1 %v4893_v42  ;;  %v263_v42 = vld [vmem:[%s5523_s19 + $0x20] sm:$0xff]  ;;  %v446_v3 = vld [vmem:[#allocation4 + $0x538] sm:$0xff] }
 0x215   : > { %3934 = vmatpush1.bf16.msra.mxu0 %v4636_v48  ;;  %v4007_v48 = vadd.f32 %v5556_v56, %v259_v40  ;;  %v4011_v54 = vadd.f32 %v5572_v44, %v263_v42  ;;  %v4008_v56 = vadd.f32 %v5559_v2, %v260_v53  ;;  %v454_v4 = vld [vmem:[#allocation4 + $0x578] sm:$0xff] }
 0x216   : > { %3935 = vmatprep.subr.bf16.mxu0 %v4621_v50  ;;  %v462_v50 = vld [vmem:[#allocation4 + $0x5b8] sm:$0xff]  ;;  %v4749_v9 = vcombine.high %v446_v3, %v454_v4 }
 0x217   : > { %3975 = vmatpush1.bf16.msra.mxu1 %v4892_v49  ;;  %v5037_v49 = vcombine.high %v734_v60, %v742_v41  ;;  %v5086_v0 = vmul.f32 -1.442695, %v4007_v48  ;;  %v710_v44 = vld [vmem:[#allocation4 + $0xd78] sm:$0xff]  ;;  %v5087_v10 = vmul.f32 -1.442695, %v4008_v56 }
 0x218   : > { %3976 = vmatprep.subr.bf16.mxu1 %v4877_v51  ;;  %v470_v51 = vld [vmem:[#allocation4 + $0x5f8] sm:$0xff] }
 0x219   : > { %3936 = vmatpush1.bf16.msra.mxu0 %v4620_v58  ;;  %v4012_v58 = vadd.f32 %v5575_v52, %v264_v45  ;;  %v5020_v52 = vcombine.low %v718_v55, %v726_v57  ;;  %5253 = vpow2.f32 %v5086_v0  ;;  %v430_v12 = vld [vmem:[#allocation4 + $0x4b8] sm:$0xff]  ;;  %v255_v0 = vld [vmem:[#allocation3] sm:$0xff] }
 0x21a   : > { %3937 = vmatprep.subr.bf16.mxu0 %v4605_v62  ;;  %v5036_v62 = vcombine.low %v734_v60, %v742_v41  ;;  %v438_v2 = vld [vmem:[#allocation4 + $0x4f8] sm:$0xff]  ;;  %v267_v41 = vld [vmem:[%s5523_s19 + $0x40] sm:$0xff] }
 0x21b   : > { %3977 = vmatpush1.bf16.msra.mxu1 %v4876_v61  ;;  %v4780_v61 = vcombine.low %v478_v38, %v486_v39  ;;  %v4733_v21 = vcombine.high %v430_v12, %v438_v2  ;;  %v414_v23 = vld [vmem:[#allocation4 + $0x438] sm:$0xff] }
 0x21c   : > { %3978 = vmatprep.subr.bf16.mxu1 %v4861_v63  ;;  %v4765_v63 = vcombine.high %v462_v50, %v470_v51  ;;  %v422_v24 = vld [vmem:[#allocation4 + $0x478] sm:$0xff] }
 0x21d   : > { %3938 = vmatpush1.bf16.msra.mxu0 %v4604_v5  ;;  %v5090_v5 = vmul.f32 -1.442695, %v4011_v54  ;;  %v4717_v31 = vcombine.high %v414_v23, %v422_v24  ;;  %v4716_v33 = vcombine.low %v414_v23, %v422_v24  ;;  %v5221_v57 = vld [vmem:[#allocation6 + $0x78] sm:$0xff]   ;;  %v5235_v23 = vld [vmem:[#allocation6 + $0x40] sm:$0xff]   ;;  %v261_v24 = vld [vmem:[%s5523_s19 + $0x10] sm:$0xff] }
 0x21e   : > { %3939 = vmatprep.subr.bf16.mxu0 %v4589_v7  ;;  %v5091_v7 = vmul.f32 -1.442695, %v4012_v58  ;;  %v5223_v58 = vld [vmem:[#allocation6 + $0x70] sm:$0xff]  }
 0x21f   : > { %3979 = vmatpush1.bf16.msra.mxu1 %v4860_v6  ;;  %v702_v6 = vld [vmem:[#allocation4 + $0xd38] sm:$0xff]  ;;  %5255 = vpow2.f32 %v5090_v5 }
 0x220   : > { %3980 = vmatprep.subr.bf16.mxu1 %v4845_v8  ;;  %v4764_v8 = vcombine.low %v462_v50, %v470_v51  ;;  %v5005_v11 = vcombine.high %v702_v6, %v710_v44  ;;  %5257 = vpow2.f32 %v5091_v7  ;;  %v5226_v7 = vld [vmem:[#allocation6 + $0x28] sm:$0xff]  }
 0x221   : > { %3940 = vmatpush1.bf16.msra.mxu0 %v4588_v13  ;;  %v686_v13 = vld [vmem:[#allocation4 + $0xcb8] sm:$0xff]  ;;  %5259 = vpow2.f32 %v5087_v10 }
 0x222   : > { %3941 = vmatprep.subr.bf16.mxu0 %v4829_v18  ;;  %v4748_v18 = vcombine.low %v446_v3, %v454_v4  ;;  %v256_v3 = vld [vmem:[#allocation3 + $0x18] sm:$0xff]  ;;  %v5225_v4 = vld [vmem:[#allocation6 + $0x68] sm:$0xff]  }
 0x223   : > { %3981 = vmatpush1.bf16.msra.mxu1 %v4844_v15  ;;  %v694_v15 = vld [vmem:[#allocation4 + $0xcf8] sm:$0xff] }
 0x224   : > { %3982 = vmatprep.subr.bf16.mxu1 %v5085_v19  ;;  %v5004_v19 = vcombine.low %v702_v6, %v710_v44  ;;  %v4989_v22 = vcombine.high %v686_v13, %v694_v15 }
 0x225   : > { %3942 = vmatpush2.bf16.msra.mxu0 %v4828_v27  ;;  %v670_v27 = vld [vmem:[#allocation4 + $0xc38] sm:$0xff] }
 0x226   : > { %3943 = vmatprep.subr.bf16.mxu0 %v4813_v29  ;;  %v4732_v29 = vcombine.low %v430_v12, %v438_v2  ;;  %v5228_v2 = vld [vmem:[#allocation6 + $0x20] sm:$0xff]  }
 0x227   : > { %3983 = vmatpush2.bf16.msra.mxu1 %v5084_v28  ;;  %v678_v28 = vld [vmem:[#allocation4 + $0xc78] sm:$0xff] }
 0x228   : > { %3984 = vmatprep.subr.bf16.mxu1 %v5069_v30  ;;  %v4988_v30 = vcombine.low %v686_v13, %v694_v15  ;;  %v4973_v32 = vcombine.high %v670_v27, %v678_v28  ;;  %v4972_v34 = vcombine.low %v670_v27, %v678_v28  ;;  %v5229_v13 = vld [vmem:[#allocation6 + $0x58] sm:$0xff]   ;;  %v265_v27 = vld [vmem:[%s5523_s19 + $0x30] sm:$0xff] }
 0x229   : > { %3944 = vmatpush2.bf16.msra.mxu0 %v4812_v35  ;;  %v5254_v35 = vpop.eup %5253  ;;  %v5230_v15 = vld [vmem:[#allocation6 + $0x18] sm:$0xff]  }
 0x22a   : > { %3945 = vmatprep.subr.bf16.mxu0 %v4797_v37  ;;  %v266_v28 = vld [vmem:[%s5523_s19 + $0x38] sm:$0xff] }
 0x22b   : > { %3985 = vmatpush2.bf16.msra.mxu1 %v5068_v36 }
 0x22c   : > { %3986 = vmatprep.subr.bf16.mxu1 %v5053_v59  ;;  %v5256_v36 = vpop.eup %5255  ;;  %v4035_v59 = vadd.f32 1.0, %v5254_v35 }
 0x22d   : > { %3946 = vmatpush2.bf16.msra.mxu0 %v4796_v43  ;;  %v5258_v37 = vpop.eup %5257  ;;  %v4059_v39 = vadd.f32 1.0, %v5256_v36 }
 0x22e   : > { %3947 = vmatprep.subr.bf16.mxu0 %v4781_v47  ;;  %v5260_v38 = vpop.eup %5259  ;;  %v4060_v60 = vadd.f32 1.0, %v5258_v37  ;;  %5261 = vrcp.f32 %v4035_v59  ;;  %v268_v47 = vld [vmem:[%s5523_s19 + $0x48] sm:$0xff] }
 0x22f   : > { %3987 = vmatpush2.bf16.msra.mxu1 %v5052_v46  ;;  %v4036_v46 = vadd.f32 1.0, %v5260_v38  ;;  %5263 = vrcp.f32 %v4059_v39 }
 0x230   : > { %3988 = vmatprep.subr.bf16.mxu1 %v5037_v49  ;;  %5265 = vrcp.f32 %v4060_v60 }
 0x231   : > { %3948 = vmatpush2.bf16.msra.mxu0 %v4780_v61 }
 0x232   : > { %3949 = vmatprep.subr.bf16.mxu0 %v4765_v63 }
 0x233   : > { %3989 = vmatpush2.bf16.msra.mxu1 %v5036_v62  ;;  %v5224_v62 = vld [vmem:[#allocation6 + $0x30] sm:$0xff]  }
 0x234   : > { %3990 = vmatprep.subr.bf16.mxu1 %v5021_v1 }
 0x235   : > { %3950 = vmatpush2.bf16.msra.mxu0 %v4764_v8 }
 0x236   : > { %3951 = vmatprep.subr.bf16.mxu0 %v4749_v9 }
 0x237   : > { %3991 = vmatpush2.bf16.msra.mxu1 %v5020_v52 }
 0x238   : > { %3992 = vmatprep.subr.bf16.mxu1 %v5005_v11  ;;  %v5227_v11 = vld [vmem:[#allocation6 + $0x60] sm:$0xff]  }
 0x239   : > { %3952 = vmatpush2.bf16.msra.mxu0 %v4748_v18  ;;  %v5231_v18 = vld [vmem:[#allocation6 + $0x50] sm:$0xff]  }
 0x23a   : > { %3953 = vmatprep.subr.bf16.mxu0 %v4733_v21  ;;  %v5233_v21 = vld [vmem:[#allocation6 + $0x48] sm:$0xff]  }
 0x23b   : > { %3993 = vmatpush2.bf16.msra.mxu1 %v5004_v19  ;;  %v5262_v61 = vpop.eup %5261  ;;  %v5232_v19 = vld [vmem:[#allocation6 + $0x10] sm:$0xff]  }
 0x23c   : > { %3994 = vmatprep.subr.bf16.mxu1 %v4989_v22  ;;  %v5264_v63 = vpop.eup %5263  ;;  %v5234_v22 = vld [vmem:[#allocation6 + $0x8] sm:$0xff]  }
 0x23d   : > { %3954 = vmatpush2.bf16.msra.mxu0 %v4732_v29  ;;  %v5266_v56 = vpop.eup %5265  ;;  %v4099_v6 = vmul.f32 %v5264_v63, %v255_v0  ;;  %v5236_v29 = vld [vmem:[#allocation6] sm:$0xff]   ;;  %v257_v0 = vld [vmem:[#allocation3 + $0x8] sm:$0xff] }
 0x23e   : > { %3955 = vmatprep.subr.bf16.mxu0 %v4717_v31  ;;  %v4100_v9 = vmul.f32 %v5266_v56, %v256_v3  ;;  %v262_v31 = vld [vmem:[%s5523_s19 + $0x18] sm:$0xff]  ;;  %v258_v3 = vld [vmem:[#allocation3 + $0x10] sm:$0xff] }
 0x23f   : > { %3995 = vmatpush2.bf16.msra.mxu1 %v4988_v30  ;;  %v4009_v30 = vadd.f32 %v5564_v16, %v261_v24  ;;  %v4010_v35 = vadd.f32 %v5567_v26, %v262_v31  ;;  %v5250_v24 = vld [vmem:[#allocation6 + $0x88] sm:$0xff]  }
 0x240   : > { %3996 = vmatprep.subr.bf16.mxu1 %v4973_v32  ;;  %v4013_v32 = vadd.f32 %v5580_v14, %v265_v27  ;;  %v5251_v27 = vld [vmem:[#allocation6 + $0xc0] sm:$0xff]  }
 0x241   : > { %3956 = vmatpush2.bf16.msra.mxu0 %v4716_v33  ;;  %v4014_v33 = vadd.f32 %v5583_v25, %v266_v28  ;;  %v5089_v59 = vmul.f32 -1.442695, %v4010_v35  ;;  %v5252_v28 = vld [vmem:[#allocation6 + $0x80] sm:$0xff]  }
 0x242   : > { %5134 = vmatprep.subr.bf16.mxu0 %v5221_v57  ;;  %v5092_v36 = vmul.f32 -1.442695, %v4013_v32  ;;  %v5237_v57 = vld [vmem:[#allocation6 + $0xf8] sm:$0xff]  }
 0x243   : > { %3997 = vmatpush2.bf16.msra.mxu1 %v4972_v34  ;;  %v5088_v34 = vmul.f32 -1.442695, %v4009_v30  ;;  %v5093_v37 = vmul.f32 -1.442695, %v4014_v33  ;;  %v271_v30 = vld [vmem:[%s5523_s19 + $0x60] sm:$0xff] }
 0x244   : > { %v3713_v40 = vpop.f32.mrf.mxu0  ;;  %3958 = vmatmul.mubr.bf16.vlgmr.msra.gmra.mxu0 %v5538_v17  ;;  %5156 = vmatprep.subr.bf16.mxu1 %v5237_v57 }
 0x246   : > { %v3754_v42 = vpop.f32.mrf.mxu1  ;;  %3999 = vmatmul.mubr.bf16.vlgmr.msra.gmra.mxu1 %v5540_v20  ;;  %v3715_v45 = vpop.f32.mrf.mxu0  ;;  %v5222_v20 = vld [vmem:[#allocation6 + $0x38] sm:$0xff]  }
 0x247   : > { %v3755_v43 = vadd.f32 %v3754_v42, %v3713_v40  ;;  %5135 = vmatpush3.bf16.msra.mxu0 %v5222_v20  ;;  %v269_v42 = vld [vmem:[%s5523_s19 + $0x50] sm:$0xff]  ;;  %v5238_v20 = vld [vmem:[#allocation6 + $0xb8] sm:$0xff]  }
 0x248   : > { %v3756_v48 = vpop.f32.mrf.mxu1  ;;  %v3717_v51 = vpop.f32.mrf.mxu0  ;;  %5136 = vmatprep.subr.bf16.mxu0 %v5223_v58  ;;  %5157 = vmatpush3.bf16.msra.mxu1 %v5238_v20  ;;  %v5239_v58 = vld [vmem:[#allocation6 + $0xf0] sm:$0xff]  }
 0x249   : > { %v4015_v49 = vadd.f32 %v3755_v43, %v267_v41  ;;  %v3757_v50 = vadd.f32 %v3756_v48, %v3715_v45  ;;  %5158 = vmatprep.subr.bf16.mxu1 %v5239_v58 }
 0x24a   : > { %v3758_v53 = vpop.f32.mrf.mxu1  ;;  %v3718_v17 = vpop.f32.mrf.mxu0 }
 0x24b   : > { %5267 = vtanh.f32 %v4015_v49  ;;  %v4016_v54 = vadd.f32 %v3757_v50, %v268_v47  ;;  %5137 = vmatpush3.bf16.msra.mxu0 %v5224_v62  ;;  %v270_v47 = vld [vmem:[%s5523_s19 + $0x58] sm:$0xff]  ;;  %v5240_v62 = vld [vmem:[#allocation6 + $0xb0] sm:$0xff]  }
 0x24c   : > { %5269 = vrcp.f32 %v4036_v46  ;;  %v3759_v55 = vpop.f32.mrf.mxu1  ;;  %5138 = vmatprep.subr.bf16.mxu0 %v5225_v4  ;;  %5159 = vmatpush3.bf16.msra.mxu1 %v5240_v62  ;;  %v5241_v4 = vld [vmem:[#allocation6 + $0xe8] sm:$0xff]  }
 0x24d   : > { %5271 = vtanh.f32 %v4016_v54  ;;  %5160 = vmatprep.subr.bf16.mxu1 %v5241_v4 }
 0x24e   : > { %5273 = vpow2.f32 %v5088_v34  ;;  %v272_v34 = vld [vmem:[%s5523_s19 + $0x68] sm:$0xff] }
 0x24f   : > { %5139 = vmatpush3.bf16.msra.mxu0 %v5226_v7  ;;  %5275 = vpow2.f32 %v5092_v36  ;;  %v5242_v7 = vld [vmem:[#allocation6 + $0xa8] sm:$0xff]  }
 0x250   : > { %5140 = vmatprep.subr.bf16.mxu0 %v5227_v11  ;;  %5277 = vpow2.f32 %v5093_v37  ;;  %5161 = vmatpush3.bf16.msra.mxu1 %v5242_v7 }
 0x251   : > { %5279 = vpow2.f32 %v5089_v59 }
 0x253   : > { %5141 = vmatpush3.bf16.msra.mxu0 %v5228_v2  ;;  %v5243_v2 = vld [vmem:[#allocation6 + $0xe0] sm:$0xff]  }
 0x254   : > { %5142 = vmatprep.subr.bf16.mxu0 %v5229_v13  ;;  %5162 = vmatprep.subr.bf16.mxu1 %v5243_v2 }
 0x257   : > { %5143 = vmatpush3.bf16.msra.mxu0 %v5230_v15  ;;  %v5244_v15 = vld [vmem:[#allocation6 + $0xa0] sm:$0xff]  }
 0x258   : > { %v5268_v1 = vpop.eup %5267  ;;  %5144 = vmatprep.subr.bf16.mxu0 %v5231_v18  ;;  %5163 = vmatpush3.bf16.msra.mxu1 %v5244_v15  ;;  %v5245_v18 = vld [vmem:[#allocation6 + $0xd8] sm:$0xff]  }
 0x259   : > { %v5270_v5 = vpop.eup %5269  ;;  %v4103_v44 = vmul.f32 %v5268_v1, %v5262_v61  ;;  %5164 = vmatprep.subr.bf16.mxu1 %v5245_v18 }
 0x25a   : > { %v5272_v8 = vpop.eup %5271 }
 0x25b   : > { %v5598_v52 = vadd.f32 %v4103_v44, %v4099_v6  ;;  %v4104_v10 = vmul.f32 %v5272_v8, %v5270_v5  ;;  %5145 = vmatpush3.bf16.msra.mxu0 %v5232_v19  ;;  %v5274_v16 = vpop.eup %5273  ;;  %v5246_v19 = vld [vmem:[#allocation6 + $0x98] sm:$0xff]  }
 0x25c   : > { %5146 = vmatprep.subr.bf16.mxu0 %v5233_v21  ;;  %v5276_v38 = vpop.eup %5275  ;;  %v4037_v40 = vadd.f32 1.0, %v5274_v16  ;;  %v5247_v21 = vld [vmem:[#allocation6 + $0xd0] sm:$0xff]   ;;  %5165 = vmatpush3.bf16.msra.mxu1 %v5246_v19 }
 0x25d   : > { %4119 = vst [vmem:[#allocation3] sm:$0xff] %v5598_v52  ;;  %v5601_v12 = vadd.f32 %v4104_v10, %v4100_v9  ;;  %v5278_v39 = vpop.eup %5277  ;;  %v4061_v60 = vadd.f32 1.0, %v5276_v38  ;;  %5166 = vmatprep.subr.bf16.mxu1 %v5247_v21 }
 0x25e   : > { %v5280_v14 = vpop.eup %5279  ;;  %v4062_v41 = vadd.f32 1.0, %v5278_v39  ;;  %5281 = vrcp.f32 %v4037_v40 }
 0x25f   : > { %4120 = vst [vmem:[#allocation3 + $0x18] sm:$0xff] %v5601_v12  ;;  %5147 = vmatpush3.bf16.msra.mxu0 %v5234_v22  ;;  %v4038_v46 = vadd.f32 1.0, %v5280_v14  ;;  %5283 = vrcp.f32 %v4061_v60  ;;  %v5248_v22 = vld [vmem:[#allocation6 + $0x90] sm:$0xff]  }
 0x260   : > { %5148 = vmatprep.subr.bf16.mxu0 %v5235_v23  ;;  %5285 = vrcp.f32 %v4062_v41  ;;  %v5249_v23 = vld [vmem:[#allocation6 + $0xc8] sm:$0xff]   ;;  %5167 = vmatpush3.bf16.msra.mxu1 %v5248_v22 }
 0x261   : > { %5168 = vmatprep.subr.bf16.mxu1 %v5249_v23 }
 0x263   : > { %5149 = vmatpush3.bf16.msra.mxu0 %v5236_v29 }
 0x264   : > { %5169 = vmatpush3.bf16.msra.mxu1 %v5250_v24 }
 0x265   : > { %5170 = vmatprep.subr.bf16.mxu1 %v5251_v27 }
 0x268   : > { %5171 = vmatpush3.bf16.msra.mxu1 %v5252_v28 }
 0x26b   : > { %v5282_v61 = vpop.eup %5281 }
 0x26c   : > { %v5284_v63 = vpop.eup %5283 }
 0x26d   : > { %v5286_v56 = vpop.eup %5285  ;;  %v4101_v6 = vmul.f32 %v5284_v63, %v257_v0 }
 0x26e   : > { %v4102_v10 = vmul.f32 %v5286_v56, %v258_v3 }
 0x284   : > { %v3795_v25 = vpop.f32.mrf.mxu0 }
 0x286   : > { %v3836_v43 = vpop.f32.mrf.mxu1  ;;  %v3797_v45 = vpop.f32.mrf.mxu0 }
 0x287   : > { %v3837_v26 = vadd.f32 %v3836_v43, %v3795_v25 }
 0x288   : > { %v3838_v48 = vpop.f32.mrf.mxu1  ;;  %v3799_v51 = vpop.f32.mrf.mxu0 }
 0x289   : > { %v4017_v49 = vadd.f32 %v3837_v26, %v269_v42  ;;  %v3839_v50 = vadd.f32 %v3838_v48, %v3797_v45 }
 0x28a   : > { %v3840_v53 = vpop.f32.mrf.mxu1  ;;  %v3800_v17 = vpop.f32.mrf.mxu0 }
 0x28b   : > { %5287 = vtanh.f32 %v4017_v49  ;;  %v4018_v54 = vadd.f32 %v3839_v50, %v270_v47  ;;  %v273_v53 = vld [vmem:[%s5523_s19 + $0x70] sm:$0xff] }
 0x28c   : > { %5289 = vrcp.f32 %v4038_v46  ;;  %v3841_v55 = vpop.f32.mrf.mxu1 }
 0x28d   : > { %5291 = vtanh.f32 %v4018_v54 }
 0x298   : > { %v5288_v1 = vpop.eup %5287 }
 0x299   : > { %v5290_v5 = vpop.eup %5289  ;;  %v4105_v44 = vmul.f32 %v5288_v1, %v5282_v61 }
 0x29a   : > { %v5292_v8 = vpop.eup %5291 }
 0x29b   : > { %v5614_v9 = vadd.f32 %v4105_v44, %v4101_v6  ;;  %v4106_v11 = vmul.f32 %v5292_v8, %v5290_v5 }
 0x29d   : > { %4121 = vst [vmem:[#allocation3 + $0x8] sm:$0xff] %v5614_v9  ;;  %v5617_v13 = vadd.f32 %v4106_v11, %v4102_v10 }
 0x29f   : > { %4122 = vst [vmem:[#allocation3 + $0x10] sm:$0xff] %v5617_v13 }
 0x2c4   : > { %v3877_v29 = vpop.f32.mrf.mxu0 }
 0x2c6   : > { %v3918_v31 = vpop.f32.mrf.mxu1  ;;  %v3879_v33 = vpop.f32.mrf.mxu0 }
 0x2c7   : > { %v3919_v32 = vadd.f32 %v3918_v31, %v3877_v29 }
 0x2c8   : > { %v3920_v35 = vpop.f32.mrf.mxu1  ;;  %v3881_v59 = vpop.f32.mrf.mxu0 }
 0x2c9   : > { %v4019_v36 = vadd.f32 %v3919_v32, %v271_v30  ;;  %v3921_v37 = vadd.f32 %v3920_v35, %v3879_v33 }
 0x2ca   : > { %v3922_v16 = vpop.f32.mrf.mxu1  ;;  %v3882_v40 = vpop.f32.mrf.mxu0 }
 0x2cb   : > { %v5094_v38 = vmul.f32 -1.442695, %v4019_v36  ;;  %v4020_v39 = vadd.f32 %v3921_v37, %v272_v34 }
 0x2cc   : > { %v3923_v14 = vpop.f32.mrf.mxu1 }
 0x2cd   : > { %5293 = vpow2.f32 %v5094_v38  ;;  %v5095_v60 = vmul.f32 -1.442695, %v4020_v39 }
 0x2cf   : > { %5295 = vpow2.f32 %v5095_v60 }
 0x2d0   : > { %5297 = vtanh.f32 %v5598_v52 }
 0x2da   : > { %v5294_v25 = vpop.eup %5293 }
 0x2db   : > { %v4087_v41 = vadd.f32 1.0, %v5294_v25 }
 0x2dc   : > { %v5296_v42 = vpop.eup %5295 }
 0x2dd   : > { %5299 = vrcp.f32 %v4087_v41  ;;  %v4088_v43 = vadd.f32 1.0, %v5296_v42  ;;  %v5298_v26 = vpop.eup %5297 }
 0x2de   : > { %5301 = vtanh.f32 %v5601_v12  ;;  %v274_v12 = vld [vmem:[%s5523_s19 + $0x78] sm:$0xff] }
 0x2df   : > { %5303 = vrcp.f32 %v4088_v43 }
 0x2ea   : > { %v5300_v45 = vpop.eup %5299 }
 0x2eb   : > { %v5302_v46 = vpop.eup %5301  ;;  %v4115_v47 = vmul.f32 %v5300_v45, %v5298_v26 }
 0x2ec   : > { %v5304_v48 = vpop.eup %5303 }
 0x2ed   : > { %v4116_v49 = vmul.f32 %v5304_v48, %v5302_v46  ;;  %4123 = vst [vmem:[#allocation2 + $0x10] sm:$0xff] %v4115_v47  ;;  %v4127_v51 = vpack.c.bf16 %v4115_v47, %v4115_v47 }
 0x2ef   : > { %4124 = vst [vmem:[#allocation2] sm:$0xff] %v4116_v49  ;;  %v4128_v50 = vpack.c.bf16 %v4116_v49, %v4116_v49 }
 0x2f1   : > { %4426 = vmatprep.mubr.bf16.mxu0 %v4128_v50 }
 0x2f2   : > { %4427 = vmatmul.mubr.bf16.vlgmr.msra.gmra.mxu0 %v4127_v51 }
 0x304   : > { %v3959_v52 = vpop.f32.mrf.mxu0 }
 0x306   : > { %v4000_v54 = vpop.f32.mrf.mxu1  ;;  %v3961_v55 = vpop.f32.mrf.mxu0 }
 0x307   : > { %v4001_v17 = vadd.f32 %v4000_v54, %v3959_v52 }
 0x308   : > { %v4002_v57 = vpop.f32.mrf.mxu1  ;;  %v3963_v61 = vpop.f32.mrf.mxu0 }
 0x309   : > { %v4021_v20 = vadd.f32 %v4001_v17, %v273_v53  ;;  %v4003_v58 = vadd.f32 %v4002_v57, %v3961_v55 }
 0x30a   : > { %v4004_v62 = vpop.f32.mrf.mxu1  ;;  %v3964_v56 = vpop.f32.mrf.mxu0 }
 0x30b   : > { %v5096_v63 = vmul.f32 -1.442695, %v4021_v20  ;;  %v4022_v0 = vadd.f32 %v4003_v58, %v274_v12 }
 0x30c   : > { %v4005_v1 = vpop.f32.mrf.mxu1 }
 0x30d   : > { %5305 = vpow2.f32 %v5096_v63  ;;  %v5097_v3 = vmul.f32 -1.442695, %v4022_v0 }
 0x30f   : > { %5307 = vpow2.f32 %v5097_v3 }
 0x310   : > { %5309 = vtanh.f32 %v5614_v9 }
 0x31a   : > { %v5306_v4 = vpop.eup %5305 }
 0x31b   : > { %v4089_v5 = vadd.f32 1.0, %v5306_v4 }
 0x31c   : > { %v5308_v6 = vpop.eup %5307 }
 0x31d   : > { %5311 = vrcp.f32 %v4089_v5  ;;  %v4090_v44 = vadd.f32 1.0, %v5308_v6  ;;  %v5310_v7 = vpop.eup %5309 }
 0x31e   : > { %5313 = vtanh.f32 %v5617_v13  ;;  %v5098_v13 = vld [vmem:[#allocation8] ss:$0 sm:$0xff] }
 0x31f   : > { %5315 = vrcp.f32 %v4090_v44 }
 0x32a   : > { %v5312_v8 = vpop.eup %5311 }
 0x32b   : > { %v5314_v10 = vpop.eup %5313  ;;  %v4117_v11 = vmul.f32 %v5312_v8, %v5310_v7 }
 0x32c   : > { %v5316_v2 = vpop.eup %5315 }
 0x32d   : > { %v4118_v15 = vmul.f32 %v5316_v2, %v5314_v10  ;;  %4125 = vst [vmem:[#allocation2 + $0x18] sm:$0xff] %v4117_v11  ;;  %v4129_v19 = vpack.c.bf16 %v4117_v11, %v4117_v11 }
 0x32f   : > { %4126 = vst [vmem:[#allocation2 + $0x8] sm:$0xff] %v4118_v15  ;;  %v4130_v18 = vpack.c.bf16 %v4118_v15, %v4118_v15 }
 0x331   : > { %4466 = vmatprep.mubr.bf16.mxu1 %v4130_v18 }
 0x332   : > { %4467 = vmatmul.mubr.bf16.vlgmr.msra.gmra.mxu1 %v4129_v19 }
 0x3b2   : > { %v5150_v21 = vpop.f32.mrf.mxu0 }
 0x3b4   : > { %v5151_v9 = vpop.f32.mrf.mxu0 }
 0x3b5   : > { %v5152_v24 = vadd.f32 %v5151_v9, %v5150_v21 }
 0x3b6   : > { %v5153_v22 = vpop.f32.mrf.mxu0 }
 0x3b7   : > { %v4429_v29 = vadd.f32 %v5152_v24, %v5098_v13 }
 0x3b8   : > { %v5154_v23 = vpop.f32.mrf.mxu0 }
 0x3f2   : > { %v5172_v27 = vpop.f32.mrf.mxu1 }
 0x3f4   : > { %v5173_v28 = vpop.f32.mrf.mxu1 }
 0x3f5   : > { %v5174_v30 = vadd.f32 %v5173_v28, %v5172_v27 }
 0x3f6   : > { %v5175_v31 = vpop.f32.mrf.mxu1 }
 0x3f7   : > { %v4469_v32 = vadd.f32 %v5174_v30, %v4429_v29 }
 0x3f8   : > { %v5176_v33 = vpop.f32.mrf.mxu1 }
 0x3f9   : > { %4474 = vst [vmem:[%s5528_s22] sm:$0xff] %v4469_v32 }
 0x3fa PF: > { %s16_s15 = sadd.s32 1, %s5409_s15  }
 0x3fb   : > { %p13_p2 = scmp.ge.s32.totalorder %s16_s15, 10  }
 0x3fd   :  { %15 = sbr.rel (!%p13_p2) target bundleno = 2 (0x2), region = 83 }
 0x402   :  { %4494 = vsyncpa [#allocation5], 1 }
 0x403   :  { %4496 = vsyncpa [#allocation5 + $0x1], 1 }
 0x404   :  { %4497 = vsyncpa [#allocation7], 1 }

</bundles_post_ra>
